<compile_context>
chip_gen: v6e
topology: v6e:2x2x1
jax: 0.10.0
libtpu: 0.0.40
codegen_flags: <defaults>
</compile_context>

<pallas_src>
import functools
import math

import numpy as np
import jax
import jax.numpy as jnp
from jax.experimental import pallas as pl
from jax.experimental.pallas import tpu as pltpu

PRELU_SLOPE = 0.2
_BF16 = jnp.bfloat16


# ----------------------------------------------------------------------------
# In-kernel helpers
# ----------------------------------------------------------------------------
def _prelu(y, slope):
    return jnp.where(y >= 0, y, slope * y)


def _mm(w_ref, x, b_ref):
    return jnp.dot(w_ref[...], x, preferred_element_type=jnp.float32) + b_ref[...]


# ----------------------------------------------------------------------------
# Pallas kernels (one grid step = one batch image; all blocks full-array)
# ----------------------------------------------------------------------------
def _preproc_kernel(x_ref, bdh_ref, bwt_ref, bdu_ref, uwt_ref, blur_ref, up_ref):
    """Separable Gaussian blur + (scaled) bilinear upsample, both passes fused."""
    x = x_ref[...]                                                     # (C*H, W) f32
    t = jnp.dot(bdh_ref[...], x, preferred_element_type=jnp.float32)
    blur_ref[...] = jnp.dot(t, bwt_ref[...], preferred_element_type=jnp.float32)
    u = jnp.dot(bdu_ref[...], x, preferred_element_type=jnp.float32)
    up_ref[...] = jnp.dot(u, uwt_ref[...], preferred_element_type=jnp.float32)


def _feat_kernel(ax_ref, ab_ref, wc_ref, bc_ref, wf_ref, bf_ref, wci_ref, bci_ref,
                 feat_ref, lr0_ref, *, slope):
    """conv_in(+sub_mean fold)+feat_in for x and blur paths, add, first compress_in."""
    yx = _prelu(_mm(wc_ref, ax_ref[...], bc_ref), slope).astype(_BF16)
    yb = _prelu(_mm(wc_ref, ab_ref[...], bc_ref), slope).astype(_BF16)
    feat = (_prelu(_mm(wf_ref, yx, bf_ref), slope)
            + _prelu(_mm(wf_ref, yb, bf_ref), slope)).astype(_BF16)
    feat_ref[...] = feat
    lr0_ref[...] = _prelu(_mm(wci_ref, feat, bci_ref), slope).astype(_BF16)


def _deconv_kernel(a_ref, w_ref, b_ref, o_ref, *, s2, cout, m, slope):
    """Sub-pixel deconv + PReLU; output is the phase layout (C, s*s*H*W)."""
    y = _prelu(_mm(w_ref, a_ref[...], b_ref), slope)                   # (s2*cout, m)
    for ph in range(s2):
        o_ref[:, ph * m:(ph + 1) * m] = y[ph * cout:(ph + 1) * cout, :].astype(o_ref.dtype)


def _deconv_dtr_kernel(*refs, n_prev, s2, cout, m, slope, emit_hr):
    """Sub-pixel deconv + PReLU fused with the following downtran 1x1."""
    a_ref = refs[0]
    hr_prev = refs[1:1 + n_prev]
    w_dec = refs[1 + n_prev]
    b_dec = refs[2 + n_prev]
    w_dt = refs[3 + n_prev:4 + 2 * n_prev]
    b_dt = refs[4 + 2 * n_prev]
    outs = refs[5 + 2 * n_prev:]
    if emit_hr:
        hr_ref, dtr_ref = outs
    else:
        (dtr_ref,) = outs
    y = _prelu(_mm(w_dec, a_ref[...], b_dec), slope)                   # (s2*cout, m) f32
    for ph in range(s2):
        h_ph = y[ph * cout:(ph + 1) * cout, :].astype(_BF16)
        if emit_hr:
            hr_ref[:, ph * m:(ph + 1) * m] = h_ph
        acc = jnp.dot(w_dt[-1][...], h_ph, preferred_element_type=jnp.float32) + b_dt[...]
        for i in range(n_prev):
            acc = acc + jnp.dot(w_dt[i][...], hr_prev[i][:, ph * m:(ph + 1) * m],
                                preferred_element_type=jnp.float32)
        dtr_ref[:, ph * m:(ph + 1) * m] = _prelu(acc, slope).astype(_BF16)


def _down_uptran_kernel(*refs, n_lr, slope):
    """Strided down-conv + PReLU fused with the next group's uptran 1x1."""
    d_ref = refs[0]
    lr_prev = refs[1:1 + n_lr]
    w_down = refs[1 + n_lr]
    b_down = refs[2 + n_lr]
    w_ut = refs[3 + n_lr:4 + 2 * n_lr]
    b_ut = refs[4 + 2 * n_lr]
    lr_ref, utr_ref = refs[5 + 2 * n_lr:]
    lr_new = _prelu(_mm(w_down, d_ref[...], b_down), slope).astype(_BF16)
    lr_ref[...] = lr_new
    acc = jnp.dot(w_ut[-1][...], lr_new, preferred_element_type=jnp.float32) + b_ut[...]
    for i in range(n_lr):
        acc = acc + jnp.dot(w_ut[i][...], lr_prev[i][...], preferred_element_type=jnp.float32)
    utr_ref[...] = _prelu(acc, slope).astype(_BF16)


def _down_final_kernel(*refs, n_lr, slope):
    """Last down-conv fused with compress_out and the next step's compress_in."""
    d_ref = refs[0]
    lr_prev = refs[1:1 + n_lr]
    feat_ref = refs[1 + n_lr]
    w_down = refs[2 + n_lr]
    b_down = refs[3 + n_lr]
    w_co = refs[4 + n_lr:5 + 2 * n_lr]
    b_co = refs[5 + 2 * n_lr]
    w_ci_a = refs[6 + 2 * n_lr]
    w_ci_b = refs[7 + 2 * n_lr]
    b_ci = refs[8 + 2 * n_lr]
    out_ref, lr0_ref = refs[9 + 2 * n_lr:]
    lr_new = _prelu(_mm(w_down, d_ref[...], b_down), slope).astype(_BF16)
    acc = jnp.dot(w_co[-1][...], lr_new, preferred_element_type=jnp.float32) + b_co[...]
    for i in range(n_lr):
        acc = acc + jnp.dot(w_co[i][...], lr_prev[i][...], preferred_element_type=jnp.float32)
    out_blk = _prelu(acc, slope).astype(_BF16)
    out_ref[...] = out_blk
    z = (jnp.dot(w_ci_a[...], feat_ref[...], preferred_element_type=jnp.float32)
         + jnp.dot(w_ci_b[...], out_blk, preferred_element_type=jnp.float32)
         + b_ci[...])
    lr0_ref[...] = _prelu(z, slope).astype(_BF16)


def _convout_kernel(a_ref, r_ref, w_ref, b_ref, o_ref):
    """conv_out (add_mean folded) + residual add (f32), no activation."""
    y = jnp.dot(w_ref[...], a_ref[...], preferred_element_type=jnp.float32) + b_ref[...]
    o_ref[...] = (y + r_ref[...]).astype(o_ref.dtype)


# ----------------------------------------------------------------------------
# pallas_call wrapper: grid over batch, weights broadcast, full-array blocks
# ----------------------------------------------------------------------------
def fused_call(kernel, acts, weights, out_defs):
    n = acts[0].shape[0]
    in_specs = []
    for a in acts:                                      # (N, R, C) activations
        in_specs.append(pl.BlockSpec((None,) + a.shape[1:], lambda i: (i, 0, 0)))
    for w in weights:                                   # (R, C) weights / (R,1) biases
        in_specs.append(pl.BlockSpec(w.shape, lambda i: (0, 0)))
    out_shape = tuple(jax.ShapeDtypeStruct((n, r, c), dt) for r, c, dt in out_defs)
    out_specs = tuple(pl.BlockSpec((None, r, c), lambda i: (i, 0, 0))
                      for r, c, _ in out_defs)
    res = pl.pallas_call(
        kernel,
        grid=(n,),
        in_specs=in_specs,
        out_specs=out_specs,
        out_shape=out_shape,
        compiler_params=pltpu.CompilerParams(
            dimension_semantics=("parallel",),
            vmem_limit_bytes=32 * 1024 * 1024),
    )(*acts, *weights)
    if not isinstance(res, (tuple, list)):
        res = (res,)
    return tuple(res)


# ----------------------------------------------------------------------------
# XLA glue: im2col tap gathers (channel-planar, no transposes)
# ----------------------------------------------------------------------------
def _im2col(x, offs):
    """x (N,C,H,W); offs list of (dy,dx). Returns (N, T*C, H*W)."""
    n, c, h, w = x.shape
    ys = [o[0] for o in offs]
    xs = [o[1] for o in offs]
    ly, hy = max(0, -min(ys)), max(0, max(ys))
    lx, hx = max(0, -min(xs)), max(0, max(xs))
    xp = jnp.pad(x, ((0, 0), (0, 0), (ly, hy), (lx, hx)))
    cols = [xp[:, :, ly + dy:ly + dy + h, lx + dx:lx + dx + w].reshape(n, c, h * w)
            for dy, dx in offs]
    return jnp.concatenate(cols, axis=1)


def _im2col_phase(x6, offs):
    """x6 (N,C,s,s,H,W) phase layout; offs list of (py,px,dy,dx). -> (N,T*C,H*W)."""
    n, c, s, _, h, w = x6.shape
    ys = [o[2] for o in offs]
    xs = [o[3] for o in offs]
    ly, hy = max(0, -min(ys)), max(0, max(ys))
    lx, hx = max(0, -min(xs)), max(0, max(xs))
    xp = jnp.pad(x6, ((0, 0), (0, 0), (0, 0), (0, 0), (ly, hy), (lx, hx)))
    cols = [xp[:, :, py, px, ly + dy:ly + dy + h, lx + dx:lx + dx + w].reshape(n, c, h * w)
            for py, px, dy, dx in offs]
    return jnp.concatenate(cols, axis=1)


# ----------------------------------------------------------------------------
# Constant matrices for the fused blur / bilinear kernel
# ----------------------------------------------------------------------------
def _gaussian_1d(ksize=7, sigma=1.6):
    ax = np.arange(ksize, dtype=np.float64)
    mean = (ksize - 1) / 2.0
    g = np.exp(-((ax - mean) / sigma) ** 2 / 2.0)
    return (g / g.sum()).astype(np.float32)


def _blur_matrix(n, ksize=7, sigma=1.6):
    g = _gaussian_1d(ksize, sigma)
    pad = (ksize - 1) // 2
    mat = np.zeros((n, n), np.float32)
    for o in range(n):
        for t in range(ksize):
            i = o + t - pad
            if i < 0:
                i = -i
            elif i >= n:
                i = 2 * n - 2 - i
            mat[o, i] += g[t]
    return mat


def _bilinear_matrix(in_size, out_size):
    scale = in_size / out_size
    dst = np.arange(out_size, dtype=np.float64)
    src = np.maximum(0.0, (dst + 0.5) * scale - 0.5)
    x0 = np.minimum(np.floor(src).astype(np.int64), in_size - 1)
    x1 = np.minimum(x0 + 1, in_size - 1)
    w1 = (src - x0).astype(np.float32)
    w0 = 1.0 - w1
    mat = np.zeros((out_size, in_size), np.float32)
    mat[np.arange(out_size), x0] += w0
    mat[np.arange(out_size), x1] += w1
    return mat


def _block_diag(blocks):
    rs = sum(b.shape[0] for b in blocks)
    cs = sum(b.shape[1] for b in blocks)
    out = np.zeros((rs, cs), np.float32)
    r = c = 0
    for b in blocks:
        out[r:r + b.shape[0], c:c + b.shape[1]] = b
        r += b.shape[0]
        c += b.shape[1]
    return out


def _build_preproc_consts(c, h, w, s, resid_scale):
    bh = _blur_matrix(h)
    bw = _blur_matrix(w)
    uh = _bilinear_matrix(h, s * h)
    uw = _bilinear_matrix(w, s * w)
    bd_blur = _block_diag([bh] * c)
    bd_up = _block_diag([uh * float(resid_scale[i % len(resid_scale)]) for i in range(c)])
    return (jnp.asarray(bd_blur), jnp.asarray(bw.T),
            jnp.asarray(bd_up), jnp.asarray(uw.T))


# ----------------------------------------------------------------------------
# Parameter construction (deterministic; weights pre-packed for the kernels)
# ----------------------------------------------------------------------------
def _rand_conv(key, cin, cout, k):
    kw_, kb = jax.random.split(key)
    w = np.asarray(jax.random.normal(kw_, (cout, cin, k, k), jnp.float32)) / math.sqrt(cin * k * k)
    b = np.asarray(0.01 * jax.random.normal(kb, (cout,), jnp.float32))
    return w, b


def _bf(a):
    return jnp.asarray(np.asarray(a, np.float32), _BF16)


def _col(b):
    return jnp.asarray(np.asarray(b, np.float32).reshape(-1, 1), jnp.float32)


def _pack_conv(w):
    cout, cin, k, _ = w.shape
    p = (k - 1) // 2
    offs = []
    wmat = np.zeros((cout, k * k * cin), np.float32)
    t = 0
    for ky in range(k):
        for kx in range(k):
            offs.append((ky - p, kx - p))
            wmat[:, t * cin:(t + 1) * cin] = w[:, :, ky, kx]
            t += 1
    return wmat, offs


def _pack_down_conv(w, stride, padding):
    """kxk / stride s / pad 2 conv re-expressed over the deconv phase layout."""
    cout, cin, k, _ = w.shape
    offs = []
    wmat = np.zeros((cout, k * k * cin), np.float32)
    t = 0
    for ky in range(k):
        for kx in range(k):
            offs.append(((ky - padding) % stride, (kx - padding) % stride,
                         (ky - padding) // stride, (kx - padding) // stride))
            wmat[:, t * cin:(t + 1) * cin] = w[:, :, ky, kx]
            t += 1
    return wmat, offs


def _make_deconv(key, cin, cout, ksz, stride, padding):
    """ConvTranspose2d -> per-phase sub-pixel weight (s*s*Cout, T*Cin)."""
    kw_, kb = jax.random.split(key)
    w = np.asarray(jax.random.normal(kw_, (cin, cout, ksz, ksz),
                                     jnp.float32)) / math.sqrt(cout * ksz * ksz)
    b = np.asarray(0.01 * jax.random.normal(kb, (cout,), jnp.float32))
    s = stride
    phase_info = []
    union = set()
    for ph in range(s):
        r = (ph + padding) % s
        off = (ph + padding) // s
        t = (ksz - r + s - 1) // s
        ds = [off - j for j in range(t)]
        phase_info.append((r, off, set(ds)))
        union.update(ds)
    dlist = sorted(union)
    offs = [(dy, dx) for dy in dlist for dx in dlist]
    wmat = np.zeros((s * s * cout, len(offs) * cin), np.float32)
    for py in range(s):
        ry, offy, dsy = phase_info[py]
        for px in range(s):
            rx, offx, dsx = phase_info[px]
            row0 = (py * s + px) * cout
            for t_i, (dy, dx) in enumerate(offs):
                if dy not in dsy or dx not in dsx:
                    continue
                ky = ry + s * (offy - dy)
                kx = rx + s * (offx - dx)
                wmat[row0:row0 + cout, t_i * cin:(t_i + 1) * cin] = w[:, :, ky, kx].T
    return {"w": _bf(wmat), "b": _col(np.tile(b, s * s)), "offs": offs}


def make_params(in_channels, out_channels, num_features, num_groups,
                upscale_factor, seed=0):
    if upscale_factor == 2:
        stride, padding, ksz = 2, 2, 6
    elif upscale_factor == 3:
        stride, padding, ksz = 3, 2, 7
    elif upscale_factor == 4:
        stride, padding, ksz = 4, 2, 8
    elif upscale_factor == 8:
        stride, padding, ksz = 8, 2, 12
    else:
        raise ValueError(upscale_factor)

    nf = num_features
    rgb_mean = np.array((0.4488, 0.4371, 0.404), np.float32)
    rgb_std = np.array((1.0, 1.0, 1.0), np.float32)
    s_vec = (1.0 / rgb_std).astype(np.float32)
    keys = iter(jax.random.split(jax.random.PRNGKey(seed), 128))

    # conv_in (3x3) with sub_mean folded in (affine 1x1 before it).
    w_cin, b_cin = _rand_conv(next(keys), in_channels, 4 * nf, 3)
    w_cin_f = w_cin * s_vec[None, :, None, None]
    b_cin_f = b_cin - np.einsum('oikl,i->o', w_cin, s_vec * rgb_mean)
    wmat_convin, offs3 = _pack_conv(w_cin_f)

    w_fi, b_fi = _rand_conv(next(keys), 4 * nf, nf, 1)
    w_ci, b_ci = _rand_conv(next(keys), 2 * nf, nf, 1)
    w_ci2 = w_ci.reshape(nf, 2 * nf)
    w_ci_a, w_ci_b = w_ci2[:, :nf], w_ci2[:, nf:]
    w_co, b_co = _rand_conv(next(keys), num_groups * nf, nf, 1)
    w_co2 = w_co.reshape(nf, num_groups * nf)

    out_dec = _make_deconv(next(keys), nf, nf, ksz, stride, padding)

    # conv_out (3x3) with add_mean folded in; residual scale folded into bilinear.
    w_cf, b_cf = _rand_conv(next(keys), nf, out_channels, 3)
    sv = s_vec[:out_channels]
    mv = rgb_mean[:out_channels]
    w_cf_f = w_cf * sv[:, None, None, None]
    b_cf_f = sv * b_cf + sv * mv * (1.0 - sv)
    wmat_convout, _ = _pack_conv(w_cf_f)

    p = {
        "stride": stride, "nf": nf, "out_channels": out_channels,
        "offs3": offs3, "resid_scale": sv ** 2,
        "head": {
            "w_convin": _bf(wmat_convin), "b_convin": _col(b_cin_f),
            "w_featin": _bf(w_fi.reshape(nf, 4 * nf)), "b_featin": _col(b_fi),
            "w_ci_sum": _bf(w_ci_a + w_ci_b), "b_ci": _col(b_ci),
        },
        "compress_in": {"w_a": _bf(w_ci_a), "w_b": _bf(w_ci_b), "b": _col(b_ci)},
        "compress_out": {
            "w_parts": [_bf(w_co2[:, i * nf:(i + 1) * nf]) for i in range(num_groups)],
            "b": _col(b_co)},
        "out": out_dec,
        "w_convout": _bf(wmat_convout), "b_convout": _col(b_cf_f),
        "up": [], "down": [], "uptran": [], "downtran": [],
    }
    for idx in range(num_groups):
        p["up"].append(_make_deconv(next(keys), nf, nf, ksz, stride, padding))
        w_d, b_d = _rand_conv(next(keys), nf, nf, ksz)
        wmat_d, offs_d = _pack_down_conv(w_d, stride, padding)
        p["down"].append({"w": _bf(wmat_d), "b": _col(b_d), "offs": offs_d})
        if idx > 0:
            cin_t = nf * (idx + 1)
            w_u, b_u = _rand_conv(next(keys), cin_t, nf, 1)
            w_u2 = w_u.reshape(nf, cin_t)
            p["uptran"].append({
                "w_parts": [_bf(w_u2[:, i * nf:(i + 1) * nf]) for i in range(idx + 1)],
                "b": _col(b_u)})
            w_dn, b_dn = _rand_conv(next(keys), cin_t, nf, 1)
            w_dn2 = w_dn.reshape(nf, cin_t)
            p["downtran"].append({
                "w_parts": [_bf(w_dn2[:, i * nf:(i + 1) * nf]) for i in range(idx + 1)],
                "b": _col(b_dn)})
    return p


# ----------------------------------------------------------------------------
# Model forward (channel-planar layout, spatial on lanes)
# ----------------------------------------------------------------------------
def srfbn_forward(params, x, num_steps, num_groups):
    slope = PRELU_SLOPE
    n, c_in, h, w = x.shape
    s = params["stride"]
    s2 = s * s
    nf = params["nf"]
    c_out = params["out_channels"]
    m = h * w
    offs3 = params["offs3"]

    # ---- fused separable blur + (scaled) bilinear upsample (1 launch) ----
    bd_blur, blur_wt, bd_up, up_wt = _build_preproc_consts(
        c_in, h, w, s, params["resid_scale"])
    x32 = x.astype(jnp.float32)
    blur_rows, up_rows = fused_call(
        _preproc_kernel, [x32.reshape(n, c_in * h, w)],
        [bd_blur, blur_wt, bd_up, up_wt],
        [(c_in * h, w, jnp.float32), (c_in * s * h, s * w, jnp.float32)])
    blur = blur_rows.reshape(n, c_in, h, w)
    resid = up_rows.reshape(n, c_in, s2 * m)                    # f32, true-HR order

    # ---- conv_in + feat_in (x & blur) + add + first compress_in (1 launch) ----
    a_x = _im2col(x32.astype(_BF16), offs3)
    a_b = _im2col(blur.astype(_BF16), offs3)
    hp = params["head"]
    feat, lr0 = fused_call(
        functools.partial(_feat_kernel, slope=slope),
        [a_x, a_b],
        [hp["w_convin"], hp["b_convin"], hp["w_featin"], hp["b_featin"],
         hp["w_ci_sum"], hp["b_ci"]],
        [(nf, m, _BF16), (nf, m, _BF16)])

    outs = []
    for _ in range(num_steps):
        lr_feats = [lr0]
        hr_feats = []
        utr = lr0
        out_blk = None
        for idx in range(num_groups):
            up_p = params["up"][idx]
            a_up = _im2col(utr.reshape(n, nf, h, w), up_p["offs"])
            if idx == 0:
                (hr,) = fused_call(
                    functools.partial(_deconv_kernel, s2=s2, cout=nf, m=m, slope=slope),
                    [a_up], [up_p["w"], up_p["b"]], [(nf, s2 * m, _BF16)])
                hr_feats.append(hr)
                dtr = hr
            else:
                emit_hr = idx < num_groups - 1
                dt_p = params["downtran"][idx - 1]
                acts = [a_up] + hr_feats
                wts = [up_p["w"], up_p["b"]] + list(dt_p["w_parts"]) + [dt_p["b"]]
                out_defs = ([(nf, s2 * m, _BF16)] if emit_hr else []) + [(nf, s2 * m, _BF16)]
                res = fused_call(
                    functools.partial(_deconv_dtr_kernel, n_prev=idx, s2=s2,
                                      cout=nf, m=m, slope=slope, emit_hr=emit_hr),
                    acts, wts, out_defs)
                if emit_hr:
                    hr, dtr = res
                    hr_feats.append(hr)
                else:
                    (dtr,) = res

            dn_p = params["down"][idx]
            d_cols = _im2col_phase(dtr.reshape(n, nf, s, s, h, w), dn_p["offs"])
            if idx < num_groups - 1:
                ut_p = params["uptran"][idx]
                acts = [d_cols] + lr_feats
                wts = [dn_p["w"], dn_p["b"]] + list(ut_p["w_parts"]) + [ut_p["b"]]
                lr_new, utr = fused_call(
                    functools.partial(_down_uptran_kernel, n_lr=len(lr_feats), slope=slope),
                    acts, wts, [(nf, m, _BF16), (nf, m, _BF16)])
                lr_feats.append(lr_new)
            else:
                co_p = params["compress_out"]
                ci_p = params["compress_in"]
                acts = [d_cols] + lr_feats[1:] + [feat]
                wts = ([dn_p["w"], dn_p["b"]] + list(co_p["w_parts"])
                       + [co_p["b"], ci_p["w_a"], ci_p["w_b"], ci_p["b"]])
                out_blk, lr0 = fused_call(
                    functools.partial(_down_final_kernel, n_lr=len(lr_feats) - 1, slope=slope),
                    acts, wts, [(nf, m, _BF16), (nf, m, _BF16)])

        # ---- reconstruction tail: out deconv -> interleave -> conv_out(+res) ----
        op = params["out"]
        a_o = _im2col(out_blk.reshape(n, nf, h, w), op["offs"])
        (hr_out,) = fused_call(
            functools.partial(_deconv_kernel, s2=s2, cout=nf, m=m, slope=slope),
            [a_o], [op["w"], op["b"]], [(nf, s2 * m, _BF16)])
        hr_img = (hr_out.reshape(n, nf, s, s, h, w)
                  .transpose(0, 1, 4, 2, 5, 3)
                  .reshape(n, nf, s * h, s * w))
        a_c = _im2col(hr_img, offs3)
        (y,) = fused_call(
            _convout_kernel, [a_c, resid],
            [params["w_convout"], params["b_convout"]],
            [(c_out, s2 * m, jnp.float32)])
        outs.append(y.reshape(n, c_out, s * h, s * w))
    return outs


# ----------------------------------------------------------------------------
if __name__ == "__main__":
    # SRFBN_mod(in=3, out=3, num_features=8, num_steps=2, num_groups=2,
    #           upscale_factor=2, act='prelu')
    in_channels, out_channels = 3, 3
    num_features, num_steps, num_groups, upscale = 8, 2, 2, 2

    params = make_params(in_channels, out_channels, num_features,
                         num_groups, upscale, seed=0)

    x = jax.random.normal(jax.random.PRNGKey(0), (2, 3, 16, 16), jnp.float32)

    fwd = jax.jit(lambda inp: srfbn_forward(params, inp, num_steps, num_groups))
    outs = fwd(x)
    outs = [jax.block_until_ready(o) for o in outs]

    expected = (2, out_channels, 16 * upscale, 16 * upscale)
    assert len(outs) == num_steps
    for o in outs:
        assert o.shape == expected, (o.shape, expected)
        assert bool(jnp.all(jnp.isfinite(o)))
    print("KERNEL_OK")
</pallas_src>

<mosaic_0001>
module attributes {stable_mosaic.version = 11 : i64} {
  func.func @_preproc_kernel(%arg0: i32, %arg1: memref<1x48x16xf32, #tpu.memory_space<vmem>>, %arg2: memref<48x48xf32, #tpu.memory_space<vmem>>, %arg3: memref<16x16xf32, #tpu.memory_space<vmem>>, %arg4: memref<96x48xf32, #tpu.memory_space<vmem>>, %arg5: memref<16x32xf32, #tpu.memory_space<vmem>>, %arg6: memref<1x48x16xf32, #tpu.memory_space<vmem>>, %arg7: memref<1x96x32xf32, #tpu.memory_space<vmem>>) attributes {dimension_semantics = [#tpu.dimension_semantics<parallel>], iteration_bounds = array<i64: 2>, scalar_prefetch = 0 : i64, scratch_operands = 0 : i64, tpu.core_type = #tpu.core_type<tc>, window_params = [{transform_indices = @transform_0, window_bounds = array<i64: 1, 48, 16>}, {pipeline_mode = #tpu.pipeline_mode<synchronous>, transform_indices = @transform_1, window_bounds = array<i64: 48, 48>}, {pipeline_mode = #tpu.pipeline_mode<synchronous>, transform_indices = @transform_2, window_bounds = array<i64: 16, 16>}, {pipeline_mode = #tpu.pipeline_mode<synchronous>, transform_indices = @transform_3, window_bounds = array<i64: 96, 48>}, {pipeline_mode = #tpu.pipeline_mode<synchronous>, transform_indices = @transform_4, window_bounds = array<i64: 16, 32>}, {transform_indices = @transform_5, window_bounds = array<i64: 1, 48, 16>}, {transform_indices = @transform_6, window_bounds = array<i64: 1, 96, 32>}]} {
    %c0 = arith.constant 0 : index
    %c0_0 = arith.constant 0 : index
    %c0_1 = arith.constant 0 : index
    %0 = vector.load %arg1[%c0, %c0_0, %c0_1] : memref<1x48x16xf32, #tpu.memory_space<vmem>>, vector<1x48x16xf32>
    %1 = vector.shape_cast %0 : vector<1x48x16xf32> to vector<48x16xf32>
    %c0_2 = arith.constant 0 : index
    %c0_3 = arith.constant 0 : index
    %2 = vector.load %arg2[%c0_2, %c0_3] : memref<48x48xf32, #tpu.memory_space<vmem>>, vector<48x48xf32>
    %cst = arith.constant dense<0.000000e+00> : vector<48x16xf32>
    %3 = tpu.matmul %2, %1, %cst {dimension_numbers = #tpu.dot_dimension_numbers<[1], [0], [0], [1], [0, 0, 1, 1], [], []>} : vector<48x48xf32>, vector<48x16xf32>, vector<48x16xf32> -> vector<48x16xf32>
    %c0_4 = arith.constant 0 : index
    %c0_5 = arith.constant 0 : index
    %4 = vector.load %arg3[%c0_4, %c0_5] : memref<16x16xf32, #tpu.memory_space<vmem>>, vector<16x16xf32>
    %cst_6 = arith.constant dense<0.000000e+00> : vector<48x16xf32>
    %5 = tpu.matmul %3, %4, %cst_6 {dimension_numbers = #tpu.dot_dimension_numbers<[1], [0], [0], [1], [0, 0, 1, 1], [], []>} : vector<48x16xf32>, vector<16x16xf32>, vector<48x16xf32> -> vector<48x16xf32>
    %c0_7 = arith.constant 0 : index
    %c0_8 = arith.constant 0 : index
    %c0_9 = arith.constant 0 : index
    %6 = vector.load %arg6[%c0_7, %c0_8, %c0_9] : memref<1x48x16xf32, #tpu.memory_space<vmem>>, vector<1x48x16xf32>
    %7 = vector.shape_cast %6 : vector<1x48x16xf32> to vector<48x16xf32>
    %8 = vector.shape_cast %5 : vector<48x16xf32> to vector<1x48x16xf32>
    tpu.vector_store %arg6[%c0_7, %c0_8, %c0_9], %8 {strides = array<i32>} : memref<1x48x16xf32, #tpu.memory_space<vmem>>, vector<1x48x16xf32>,
    %c0_10 = arith.constant 0 : index
    %c0_11 = arith.constant 0 : index
    %9 = vector.load %arg4[%c0_10, %c0_11] : memref<96x48xf32, #tpu.memory_space<vmem>>, vector<96x48xf32>
    %cst_12 = arith.constant dense<0.000000e+00> : vector<96x16xf32>
    %10 = tpu.matmul %9, %1, %cst_12 {dimension_numbers = #tpu.dot_dimension_numbers<[1], [0], [0], [1], [0, 0, 1, 1], [], []>} : vector<96x48xf32>, vector<48x16xf32>, vector<96x16xf32> -> vector<96x16xf32>
    %c0_13 = arith.constant 0 : index
    %c0_14 = arith.constant 0 : index
    %11 = vector.load %arg5[%c0_13, %c0_14] : memref<16x32xf32, #tpu.memory_space<vmem>>, vector<16x32xf32>
    %cst_15 = arith.constant dense<0.000000e+00> : vector<96x32xf32>
    %12 = tpu.matmul %10, %11, %cst_15 {dimension_numbers = #tpu.dot_dimension_numbers<[1], [0], [0], [1], [0, 0, 1, 1], [], []>} : vector<96x16xf32>, vector<16x32xf32>, vector<96x32xf32> -> vector<96x32xf32>
    %c0_16 = arith.constant 0 : index
    %c0_17 = arith.constant 0 : index
    %c0_18 = arith.constant 0 : index
    %13 = vector.load %arg7[%c0_16, %c0_17, %c0_18] : memref<1x96x32xf32, #tpu.memory_space<vmem>>, vector<1x96x32xf32>
    %14 = vector.shape_cast %13 : vector<1x96x32xf32> to vector<96x32xf32>
    %15 = vector.shape_cast %12 : vector<96x32xf32> to vector<1x96x32xf32>
    tpu.vector_store %arg7[%c0_16, %c0_17, %c0_18], %15 {strides = array<i32>} : memref<1x96x32xf32, #tpu.memory_space<vmem>>, vector<1x96x32xf32>,
    return
  }
  func.func @transform_0(%arg0: i32) -> (i32, i32, i32) {
    %c0_i32 = arith.constant 0 : i32
    %c0_i32_0 = arith.constant 0 : i32
    %c0_i32_1 = arith.constant 0 : i32
    return %arg0, %c0_i32, %c0_i32_0 : i32, i32, i32
  }
  func.func @transform_1(%arg0: i32) -> (i32, i32) {
    %c0_i32 = arith.constant 0 : i32
    %c0_i32_0 = arith.constant 0 : i32
    %c0_i32_1 = arith.constant 0 : i32
    return %c0_i32, %c0_i32_0 : i32, i32
  }
  func.func @transform_2(%arg0: i32) -> (i32, i32) {
    %c0_i32 = arith.constant 0 : i32
    %c0_i32_0 = arith.constant 0 : i32
    %c0_i32_1 = arith.constant 0 : i32
    return %c0_i32, %c0_i32_0 : i32, i32
  }
  func.func @transform_3(%arg0: i32) -> (i32, i32) {
    %c0_i32 = arith.constant 0 : i32
    %c0_i32_0 = arith.constant 0 : i32
    %c0_i32_1 = arith.constant 0 : i32
    return %c0_i32, %c0_i32_0 : i32, i32
  }
  func.func @transform_4(%arg0: i32) -> (i32, i32) {
    %c0_i32 = arith.constant 0 : i32
    %c0_i32_0 = arith.constant 0 : i32
    %c0_i32_1 = arith.constant 0 : i32
    return %c0_i32, %c0_i32_0 : i32, i32
  }
  func.func @transform_5(%arg0: i32) -> (i32, i32, i32) {
    %c0_i32 = arith.constant 0 : i32
    %c0_i32_0 = arith.constant 0 : i32
    %c0_i32_1 = arith.constant 0 : i32
    return %arg0, %c0_i32, %c0_i32_0 : i32, i32, i32
  }
  func.func @transform_6(%arg0: i32) -> (i32, i32, i32) {
    %c0_i32 = arith.constant 0 : i32
    %c0_i32_0 = arith.constant 0 : i32
    %c0_i32_1 = arith.constant 0 : i32
    return %arg0, %c0_i32, %c0_i32_0 : i32, i32, i32
  }
}

module attributes {stable_mosaic.version = 11 : i64} {
  func.func @_feat_kernel(%arg0: i32, %arg1: memref<1x27x256xbf16, #tpu.memory_space<vmem>>, %arg2: memref<1x27x256xbf16, #tpu.memory_space<vmem>>, %arg3: memref<32x27xbf16, #tpu.memory_space<vmem>>, %arg4: memref<32x1xf32, #tpu.memory_space<vmem>>, %arg5: memref<8x32xbf16, #tpu.memory_space<vmem>>, %arg6: memref<8x1xf32, #tpu.memory_space<vmem>>, %arg7: memref<8x8xbf16, #tpu.memory_space<vmem>>, %arg8: memref<8x1xf32, #tpu.memory_space<vmem>>, %arg9: memref<1x8x256xbf16, #tpu.memory_space<vmem>>, %arg10: memref<1x8x256xbf16, #tpu.memory_space<vmem>>) attributes {dimension_semantics = [#tpu.dimension_semantics<parallel>], iteration_bounds = array<i64: 2>, scalar_prefetch = 0 : i64, scratch_operands = 0 : i64, tpu.core_type = #tpu.core_type<tc>, window_params = [{transform_indices = @transform_0, window_bounds = array<i64: 1, 27, 256>}, {transform_indices = @transform_1, window_bounds = array<i64: 1, 27, 256>}, {pipeline_mode = #tpu.pipeline_mode<synchronous>, transform_indices = @transform_2, window_bounds = array<i64: 32, 27>}, {pipeline_mode = #tpu.pipeline_mode<synchronous>, transform_indices = @transform_3, window_bounds = array<i64: 32, 1>}, {pipeline_mode = #tpu.pipeline_mode<synchronous>, transform_indices = @transform_4, window_bounds = array<i64: 8, 32>}, {pipeline_mode = #tpu.pipeline_mode<synchronous>, transform_indices = @transform_5, window_bounds = array<i64: 8, 1>}, {pipeline_mode = #tpu.pipeline_mode<synchronous>, transform_indices = @transform_6, window_bounds = array<i64: 8, 8>}, {pipeline_mode = #tpu.pipeline_mode<synchronous>, transform_indices = @transform_7, window_bounds = array<i64: 8, 1>}, {transform_indices = @transform_8, window_bounds = array<i64: 1, 8, 256>}, {transform_indices = @transform_9, window_bounds = array<i64: 1, 8, 256>}]} {
    %c0 = arith.constant 0 : index
    %c0_0 = arith.constant 0 : index
    %c0_1 = arith.constant 0 : index
    %0 = vector.load %arg1[%c0, %c0_0, %c0_1] : memref<1x27x256xbf16, #tpu.memory_space<vmem>>, vector<1x27x256xbf16>
    %1 = vector.shape_cast %0 : vector<1x27x256xbf16> to vector<27x256xbf16>
    %c0_2 = arith.constant 0 : index
    %c0_3 = arith.constant 0 : index
    %2 = vector.load %arg3[%c0_2, %c0_3] : memref<32x27xbf16, #tpu.memory_space<vmem>>, vector<32x27xbf16>
    %cst = arith.constant dense<0.000000e+00> : vector<32x256xf32>
    %3 = tpu.matmul %2, %1, %cst {dimension_numbers = #tpu.dot_dimension_numbers<[1], [0], [0], [1], [0, 0, 1, 1], [], []>} : vector<32x27xbf16>, vector<27x256xbf16>, vector<32x256xf32> -> vector<32x256xf32>
    %c0_4 = arith.constant 0 : index
    %c0_5 = arith.constant 0 : index
    %4 = vector.load %arg4[%c0_4, %c0_5] : memref<32x1xf32, #tpu.memory_space<vmem>>, vector<32x1xf32>
    %5 = vector.broadcast %4 : vector<32x1xf32> to vector<32x256xf32>
    %6 = arith.addf %3, %5 : vector<32x256xf32>
    %cst_6 = arith.constant 0.000000e+00 : f32
    %7 = vector.broadcast %cst_6 : f32 to vector<32x256xf32>
    %8 = arith.cmpf oge, %6, %7 : vector<32x256xf32>
    %cst_7 = arith.constant 2.000000e-01 : f32
    %9 = vector.broadcast %cst_7 : f32 to vector<32x256xf32>
    %10 = arith.mulf %9, %6 : vector<32x256xf32>
    %11 = arith.select %8, %6, %10 : vector<32x256xi1>, vector<32x256xf32>
    %12 = arith.truncf %11 : vector<32x256xf32> to vector<32x256xbf16>
    %c0_8 = arith.constant 0 : index
    %c0_9 = arith.constant 0 : index
    %c0_10 = arith.constant 0 : index
    %13 = vector.load %arg2[%c0_8, %c0_9, %c0_10] : memref<1x27x256xbf16, #tpu.memory_space<vmem>>, vector<1x27x256xbf16>
    %14 = vector.shape_cast %13 : vector<1x27x256xbf16> to vector<27x256xbf16>
    %c0_11 = arith.constant 0 : index
    %c0_12 = arith.constant 0 : index
    %15 = vector.load %arg3[%c0_11, %c0_12] : memref<32x27xbf16, #tpu.memory_space<vmem>>, vector<32x27xbf16>
    %cst_13 = arith.constant dense<0.000000e+00> : vector<32x256xf32>
    %16 = tpu.matmul %15, %14, %cst_13 {dimension_numbers = #tpu.dot_dimension_numbers<[1], [0], [0], [1], [0, 0, 1, 1], [], []>} : vector<32x27xbf16>, vector<27x256xbf16>, vector<32x256xf32> -> vector<32x256xf32>
    %c0_14 = arith.constant 0 : index
    %c0_15 = arith.constant 0 : index
    %17 = vector.load %arg4[%c0_14, %c0_15] : memref<32x1xf32, #tpu.memory_space<vmem>>, vector<32x1xf32>
    %18 = vector.broadcast %17 : vector<32x1xf32> to vector<32x256xf32>
    %19 = arith.addf %16, %18 : vector<32x256xf32>
    %cst_16 = arith.constant 0.000000e+00 : f32
    %20 = vector.broadcast %cst_16 : f32 to vector<32x256xf32>
    %21 = arith.cmpf oge, %19, %20 : vector<32x256xf32>
    %cst_17 = arith.constant 2.000000e-01 : f32
    %22 = vector.broadcast %cst_17 : f32 to vector<32x256xf32>
    %23 = arith.mulf %22, %19 : vector<32x256xf32>
    %24 = arith.select %21, %19, %23 : vector<32x256xi1>, vector<32x256xf32>
    %25 = arith.truncf %24 : vector<32x256xf32> to vector<32x256xbf16>
    %c0_18 = arith.constant 0 : index
    %c0_19 = arith.constant 0 : index
    %26 = vector.load %arg5[%c0_18, %c0_19] : memref<8x32xbf16, #tpu.memory_space<vmem>>, vector<8x32xbf16>
    %cst_20 = arith.constant dense<0.000000e+00> : vector<8x256xf32>
    %27 = tpu.matmul %26, %12, %cst_20 {dimension_numbers = #tpu.dot_dimension_numbers<[1], [0], [0], [1], [0, 0, 1, 1], [], []>} : vector<8x32xbf16>, vector<32x256xbf16>, vector<8x256xf32> -> vector<8x256xf32>
    %c0_21 = arith.constant 0 : index
    %c0_22 = arith.constant 0 : index
    %28 = vector.load %arg6[%c0_21, %c0_22] : memref<8x1xf32, #tpu.memory_space<vmem>>, vector<8x1xf32>
    %29 = vector.broadcast %28 : vector<8x1xf32> to vector<8x256xf32>
    %30 = arith.addf %27, %29 : vector<8x256xf32>
    %cst_23 = arith.constant 0.000000e+00 : f32
    %31 = vector.broadcast %cst_23 : f32 to vector<8x256xf32>
    %32 = arith.cmpf oge, %30, %31 : vector<8x256xf32>
    %cst_24 = arith.constant 2.000000e-01 : f32
    %33 = vector.broadcast %cst_24 : f32 to vector<8x256xf32>
    %34 = arith.mulf %33, %30 : vector<8x256xf32>
    %35 = arith.select %32, %30, %34 : vector<8x256xi1>, vector<8x256xf32>
    %c0_25 = arith.constant 0 : index
    %c0_26 = arith.constant 0 : index
    %36 = vector.load %arg5[%c0_25, %c0_26] : memref<8x32xbf16, #tpu.memory_space<vmem>>, vector<8x32xbf16>
    %cst_27 = arith.constant dense<0.000000e+00> : vector<8x256xf32>
    %37 = tpu.matmul %36, %25, %cst_27 {dimension_numbers = #tpu.dot_dimension_numbers<[1], [0], [0], [1], [0, 0, 1, 1], [], []>} : vector<8x32xbf16>, vector<32x256xbf16>, vector<8x256xf32> -> vector<8x256xf32>
    %c0_28 = arith.constant 0 : index
    %c0_29 = arith.constant 0 : index
    %38 = vector.load %arg6[%c0_28, %c0_29] : memref<8x1xf32, #tpu.memory_space<vmem>>, vector<8x1xf32>
    %39 = vector.broadcast %38 : vector<8x1xf32> to vector<8x256xf32>
    %40 = arith.addf %37, %39 : vector<8x256xf32>
    %cst_30 = arith.constant 0.000000e+00 : f32
    %41 = vector.broadcast %cst_30 : f32 to vector<8x256xf32>
    %42 = arith.cmpf oge, %40, %41 : vector<8x256xf32>
    %cst_31 = arith.constant 2.000000e-01 : f32
    %43 = vector.broadcast %cst_31 : f32 to vector<8x256xf32>
    %44 = arith.mulf %43, %40 : vector<8x256xf32>
    %45 = arith.select %42, %40, %44 : vector<8x256xi1>, vector<8x256xf32>
    %46 = arith.addf %35, %45 : vector<8x256xf32>
    %47 = arith.truncf %46 : vector<8x256xf32> to vector<8x256xbf16>
    %c0_32 = arith.constant 0 : index
    %c0_33 = arith.constant 0 : index
    %c0_34 = arith.constant 0 : index
    %48 = vector.load %arg9[%c0_32, %c0_33, %c0_34] : memref<1x8x256xbf16, #tpu.memory_space<vmem>>, vector<1x8x256xbf16>
    %49 = vector.shape_cast %48 : vector<1x8x256xbf16> to vector<8x256xbf16>
    %50 = vector.shape_cast %47 : vector<8x256xbf16> to vector<1x8x256xbf16>
    tpu.vector_store %arg9[%c0_32, %c0_33, %c0_34], %50 {strides = array<i32>} : memref<1x8x256xbf16, #tpu.memory_space<vmem>>, vector<1x8x256xbf16>,
    %c0_35 = arith.constant 0 : index
    %c0_36 = arith.constant 0 : index
    %51 = vector.load %arg7[%c0_35, %c0_36] : memref<8x8xbf16, #tpu.memory_space<vmem>>, vector<8x8xbf16>
    %cst_37 = arith.constant dense<0.000000e+00> : vector<8x256xf32>
    %52 = tpu.matmul %51, %47, %cst_37 {dimension_numbers = #tpu.dot_dimension_numbers<[1], [0], [0], [1], [0, 0, 1, 1], [], []>} : vector<8x8xbf16>, vector<8x256xbf16>, vector<8x256xf32> -> vector<8x256xf32>
    %c0_38 = arith.constant 0 : index
    %c0_39 = arith.constant 0 : index
    %53 = vector.load %arg8[%c0_38, %c0_39] : memref<8x1xf32, #tpu.memory_space<vmem>>, vector<8x1xf32>
    %54 = vector.broadcast %53 : vector<8x1xf32> to vector<8x256xf32>
    %55 = arith.addf %52, %54 : vector<8x256xf32>
    %cst_40 = arith.constant 0.000000e+00 : f32
    %56 = vector.broadcast %cst_40 : f32 to vector<8x256xf32>
    %57 = arith.cmpf oge, %55, %56 : vector<8x256xf32>
    %cst_41 = arith.constant 2.000000e-01 : f32
    %58 = vector.broadcast %cst_41 : f32 to vector<8x256xf32>
    %59 = arith.mulf %58, %55 : vector<8x256xf32>
    %60 = arith.select %57, %55, %59 : vector<8x256xi1>, vector<8x256xf32>
    %61 = arith.truncf %60 : vector<8x256xf32> to vector<8x256xbf16>
    %c0_42 = arith.constant 0 : index
    %c0_43 = arith.constant 0 : index
    %c0_44 = arith.constant 0 : index
    %62 = vector.load %arg10[%c0_42, %c0_43, %c0_44] : memref<1x8x256xbf16, #tpu.memory_space<vmem>>, vector<1x8x256xbf16>
    %63 = vector.shape_cast %62 : vector<1x8x256xbf16> to vector<8x256xbf16>
    %64 = vector.shape_cast %61 : vector<8x256xbf16> to vector<1x8x256xbf16>
    tpu.vector_store %arg10[%c0_42, %c0_43, %c0_44], %64 {strides = array<i32>} : memref<1x8x256xbf16, #tpu.memory_space<vmem>>, vector<1x8x256xbf16>,
    return
  }
  func.func @transform_0(%arg0: i32) -> (i32, i32, i32) {
    %c0_i32 = arith.constant 0 : i32
    %c0_i32_0 = arith.constant 0 : i32
    %c0_i32_1 = arith.constant 0 : i32
    return %arg0, %c0_i32, %c0_i32_0 : i32, i32, i32
  }
  func.func @transform_1(%arg0: i32) -> (i32, i32, i32) {
    %c0_i32 = arith.constant 0 : i32
    %c0_i32_0 = arith.constant 0 : i32
    %c0_i32_1 = arith.constant 0 : i32
    return %arg0, %c0_i32, %c0_i32_0 : i32, i32, i32
  }
  func.func @transform_2(%arg0: i32) -> (i32, i32) {
    %c0_i32 = arith.constant 0 : i32
    %c0_i32_0 = arith.constant 0 : i32
    %c0_i32_1 = arith.constant 0 : i32
    return %c0_i32, %c0_i32_0 : i32, i32
  }
  func.func @transform_3(%arg0: i32) -> (i32, i32) {
    %c0_i32 = arith.constant 0 : i32
    %c0_i32_0 = arith.constant 0 : i32
    %c0_i32_1 = arith.constant 0 : i32
    return %c0_i32, %c0_i32_0 : i32, i32
  }
  func.func @transform_4(%arg0: i32) -> (i32, i32) {
    %c0_i32 = arith.constant 0 : i32
    %c0_i32_0 = arith.constant 0 : i32
    %c0_i32_1 = arith.constant 0 : i32
    return %c0_i32, %c0_i32_0 : i32, i32
  }
  func.func @transform_5(%arg0: i32) -> (i32, i32) {
    %c0_i32 = arith.constant 0 : i32
    %c0_i32_0 = arith.constant 0 : i32
    %c0_i32_1 = arith.constant 0 : i32
    return %c0_i32, %c0_i32_0 : i32, i32
  }
  func.func @transform_6(%arg0: i32) -> (i32, i32) {
    %c0_i32 = arith.constant 0 : i32
    %c0_i32_0 = arith.constant 0 : i32
    %c0_i32_1 = arith.constant 0 : i32
    return %c0_i32, %c0_i32_0 : i32, i32
  }
  func.func @transform_7(%arg0: i32) -> (i32, i32) {
    %c0_i32 = arith.constant 0 : i32
    %c0_i32_0 = arith.constant 0 : i32
    %c0_i32_1 = arith.constant 0 : i32
    return %c0_i32, %c0_i32_0 : i32, i32
  }
  func.func @transform_8(%arg0: i32) -> (i32, i32, i32) {
    %c0_i32 = arith.constant 0 : i32
    %c0_i32_0 = arith.constant 0 : i32
    %c0_i32_1 = arith.constant 0 : i32
    return %arg0, %c0_i32, %c0_i32_0 : i32, i32, i32
  }
  func.func @transform_9(%arg0: i32) -> (i32, i32, i32) {
    %c0_i32 = arith.constant 0 : i32
    %c0_i32_0 = arith.constant 0 : i32
    %c0_i32_1 = arith.constant 0 : i32
    return %arg0, %c0_i32, %c0_i32_0 : i32, i32, i32
  }
}

module attributes {stable_mosaic.version = 11 : i64} {
  func.func @_deconv_kernel(%arg0: i32, %arg1: memref<1x72x256xbf16, #tpu.memory_space<vmem>>, %arg2: memref<32x72xbf16, #tpu.memory_space<vmem>>, %arg3: memref<32x1xf32, #tpu.memory_space<vmem>>, %arg4: memref<1x8x1024xbf16, #tpu.memory_space<vmem>>) attributes {dimension_semantics = [#tpu.dimension_semantics<parallel>], iteration_bounds = array<i64: 2>, scalar_prefetch = 0 : i64, scratch_operands = 0 : i64, tpu.core_type = #tpu.core_type<tc>, window_params = [{transform_indices = @transform_0, window_bounds = array<i64: 1, 72, 256>}, {pipeline_mode = #tpu.pipeline_mode<synchronous>, transform_indices = @transform_1, window_bounds = array<i64: 32, 72>}, {pipeline_mode = #tpu.pipeline_mode<synchronous>, transform_indices = @transform_2, window_bounds = array<i64: 32, 1>}, {transform_indices = @transform_3, window_bounds = array<i64: 1, 8, 1024>}]} {
    %c0 = arith.constant 0 : index
    %c0_0 = arith.constant 0 : index
    %c0_1 = arith.constant 0 : index
    %0 = vector.load %arg1[%c0, %c0_0, %c0_1] : memref<1x72x256xbf16, #tpu.memory_space<vmem>>, vector<1x72x256xbf16>
    %1 = vector.shape_cast %0 : vector<1x72x256xbf16> to vector<72x256xbf16>
    %c0_2 = arith.constant 0 : index
    %c0_3 = arith.constant 0 : index
    %2 = vector.load %arg2[%c0_2, %c0_3] : memref<32x72xbf16, #tpu.memory_space<vmem>>, vector<32x72xbf16>
    %cst = arith.constant dense<0.000000e+00> : vector<32x256xf32>
    %3 = tpu.matmul %2, %1, %cst {dimension_numbers = #tpu.dot_dimension_numbers<[1], [0], [0], [1], [0, 0, 1, 1], [], []>} : vector<32x72xbf16>, vector<72x256xbf16>, vector<32x256xf32> -> vector<32x256xf32>
    %c0_4 = arith.constant 0 : index
    %c0_5 = arith.constant 0 : index
    %4 = vector.load %arg3[%c0_4, %c0_5] : memref<32x1xf32, #tpu.memory_space<vmem>>, vector<32x1xf32>
    %5 = vector.broadcast %4 : vector<32x1xf32> to vector<32x256xf32>
    %6 = arith.addf %3, %5 : vector<32x256xf32>
    %cst_6 = arith.constant 0.000000e+00 : f32
    %7 = vector.broadcast %cst_6 : f32 to vector<32x256xf32>
    %8 = arith.cmpf oge, %6, %7 : vector<32x256xf32>
    %cst_7 = arith.constant 2.000000e-01 : f32
    %9 = vector.broadcast %cst_7 : f32 to vector<32x256xf32>
    %10 = arith.mulf %9, %6 : vector<32x256xf32>
    %11 = arith.select %8, %6, %10 : vector<32x256xi1>, vector<32x256xf32>
    %12 = vector.extract_strided_slice %11 {offsets = [0, 0], sizes = [8, 256], strides = [1, 1]} : vector<32x256xf32> to vector<8x256xf32>
    %13 = arith.truncf %12 : vector<8x256xf32> to vector<8x256xbf16>
    %c0_8 = arith.constant 0 : index
    %c0_9 = arith.constant 0 : index
    %c0_10 = arith.constant 0 : index
    %14 = vector.load %arg4[%c0_8, %c0_9, %c0_10] : memref<1x8x1024xbf16, #tpu.memory_space<vmem>>, vector<1x8x256xbf16>
    %15 = vector.shape_cast %14 : vector<1x8x256xbf16> to vector<8x256xbf16>
    %16 = vector.shape_cast %13 : vector<8x256xbf16> to vector<1x8x256xbf16>
    tpu.vector_store %arg4[%c0_8, %c0_9, %c0_10], %16 {strides = array<i32>} : memref<1x8x1024xbf16, #tpu.memory_space<vmem>>, vector<1x8x256xbf16>,
    %17 = vector.extract_strided_slice %11 {offsets = [8, 0], sizes = [8, 256], strides = [1, 1]} : vector<32x256xf32> to vector<8x256xf32>
    %18 = arith.truncf %17 : vector<8x256xf32> to vector<8x256xbf16>
    %c0_11 = arith.constant 0 : index
    %c0_12 = arith.constant 0 : index
    %c256 = arith.constant 256 : index
    %19 = vector.load %arg4[%c0_11, %c0_12, %c256] : memref<1x8x1024xbf16, #tpu.memory_space<vmem>>, vector<1x8x256xbf16>
    %20 = vector.shape_cast %19 : vector<1x8x256xbf16> to vector<8x256xbf16>
    %21 = vector.shape_cast %18 : vector<8x256xbf16> to vector<1x8x256xbf16>
    tpu.vector_store %arg4[%c0_11, %c0_12, %c256], %21 {strides = array<i32>} : memref<1x8x1024xbf16, #tpu.memory_space<vmem>>, vector<1x8x256xbf16>,
    %22 = vector.extract_strided_slice %11 {offsets = [16, 0], sizes = [8, 256], strides = [1, 1]} : vector<32x256xf32> to vector<8x256xf32>
    %23 = arith.truncf %22 : vector<8x256xf32> to vector<8x256xbf16>
    %c0_13 = arith.constant 0 : index
    %c0_14 = arith.constant 0 : index
    %c512 = arith.constant 512 : index
    %24 = vector.load %arg4[%c0_13, %c0_14, %c512] : memref<1x8x1024xbf16, #tpu.memory_space<vmem>>, vector<1x8x256xbf16>
    %25 = vector.shape_cast %24 : vector<1x8x256xbf16> to vector<8x256xbf16>
    %26 = vector.shape_cast %23 : vector<8x256xbf16> to vector<1x8x256xbf16>
    tpu.vector_store %arg4[%c0_13, %c0_14, %c512], %26 {strides = array<i32>} : memref<1x8x1024xbf16, #tpu.memory_space<vmem>>, vector<1x8x256xbf16>,
    %27 = vector.extract_strided_slice %11 {offsets = [24, 0], sizes = [8, 256], strides = [1, 1]} : vector<32x256xf32> to vector<8x256xf32>
    %28 = arith.truncf %27 : vector<8x256xf32> to vector<8x256xbf16>
    %c0_15 = arith.constant 0 : index
    %c0_16 = arith.constant 0 : index
    %c768 = arith.constant 768 : index
    %29 = vector.load %arg4[%c0_15, %c0_16, %c768] : memref<1x8x1024xbf16, #tpu.memory_space<vmem>>, vector<1x8x256xbf16>
    %30 = vector.shape_cast %29 : vector<1x8x256xbf16> to vector<8x256xbf16>
    %31 = vector.shape_cast %28 : vector<8x256xbf16> to vector<1x8x256xbf16>
    tpu.vector_store %arg4[%c0_15, %c0_16, %c768], %31 {strides = array<i32>} : memref<1x8x1024xbf16, #tpu.memory_space<vmem>>, vector<1x8x256xbf16>,
    return
  }
  func.func @transform_0(%arg0: i32) -> (i32, i32, i32) {
    %c0_i32 = arith.constant 0 : i32
    %c0_i32_0 = arith.constant 0 : i32
    %c0_i32_1 = arith.constant 0 : i32
    return %arg0, %c0_i32, %c0_i32_0 : i32, i32, i32
  }
  func.func @transform_1(%arg0: i32) -> (i32, i32) {
    %c0_i32 = arith.constant 0 : i32
    %c0_i32_0 = arith.constant 0 : i32
    %c0_i32_1 = arith.constant 0 : i32
    return %c0_i32, %c0_i32_0 : i32, i32
  }
  func.func @transform_2(%arg0: i32) -> (i32, i32) {
    %c0_i32 = arith.constant 0 : i32
    %c0_i32_0 = arith.constant 0 : i32
    %c0_i32_1 = arith.constant 0 : i32
    return %c0_i32, %c0_i32_0 : i32, i32
  }
  func.func @transform_3(%arg0: i32) -> (i32, i32, i32) {
    %c0_i32 = arith.constant 0 : i32
    %c0_i32_0 = arith.constant 0 : i32
    %c0_i32_1 = arith.constant 0 : i32
    return %arg0, %c0_i32, %c0_i32_0 : i32, i32, i32
  }
}

module attributes {stable_mosaic.version = 11 : i64} {
  func.func @_deconv_dtr_kernel(%arg0: i32, %arg1: memref<1x72x256xbf16, #tpu.memory_space<vmem>>, %arg2: memref<1x8x1024xbf16, #tpu.memory_space<vmem>>, %arg3: memref<32x72xbf16, #tpu.memory_space<vmem>>, %arg4: memref<32x1xf32, #tpu.memory_space<vmem>>, %arg5: memref<8x8xbf16, #tpu.memory_space<vmem>>, %arg6: memref<8x8xbf16, #tpu.memory_space<vmem>>, %arg7: memref<8x1xf32, #tpu.memory_space<vmem>>, %arg8: memref<1x8x1024xbf16, #tpu.memory_space<vmem>>) attributes {dimension_semantics = [#tpu.dimension_semantics<parallel>], iteration_bounds = array<i64: 2>, scalar_prefetch = 0 : i64, scratch_operands = 0 : i64, tpu.core_type = #tpu.core_type<tc>, window_params = [{transform_indices = @transform_0, window_bounds = array<i64: 1, 72, 256>}, {transform_indices = @transform_1, window_bounds = array<i64: 1, 8, 1024>}, {pipeline_mode = #tpu.pipeline_mode<synchronous>, transform_indices = @transform_2, window_bounds = array<i64: 32, 72>}, {pipeline_mode = #tpu.pipeline_mode<synchronous>, transform_indices = @transform_3, window_bounds = array<i64: 32, 1>}, {pipeline_mode = #tpu.pipeline_mode<synchronous>, transform_indices = @transform_4, window_bounds = array<i64: 8, 8>}, {pipeline_mode = #tpu.pipeline_mode<synchronous>, transform_indices = @transform_5, window_bounds = array<i64: 8, 8>}, {pipeline_mode = #tpu.pipeline_mode<synchronous>, transform_indices = @transform_6, window_bounds = array<i64: 8, 1>}, {transform_indices = @transform_7, window_bounds = array<i64: 1, 8, 1024>}]} {
    %c0 = arith.constant 0 : index
    %c0_0 = arith.constant 0 : index
    %c0_1 = arith.constant 0 : index
    %0 = vector.load %arg1[%c0, %c0_0, %c0_1] : memref<1x72x256xbf16, #tpu.memory_space<vmem>>, vector<1x72x256xbf16>
    %1 = vector.shape_cast %0 : vector<1x72x256xbf16> to vector<72x256xbf16>
    %c0_2 = arith.constant 0 : index
    %c0_3 = arith.constant 0 : index
    %2 = vector.load %arg3[%c0_2, %c0_3] : memref<32x72xbf16, #tpu.memory_space<vmem>>, vector<32x72xbf16>
    %cst = arith.constant dense<0.000000e+00> : vector<32x256xf32>
    %3 = tpu.matmul %2, %1, %cst {dimension_numbers = #tpu.dot_dimension_numbers<[1], [0], [0], [1], [0, 0, 1, 1], [], []>} : vector<32x72xbf16>, vector<72x256xbf16>, vector<32x256xf32> -> vector<32x256xf32>
    %c0_4 = arith.constant 0 : index
    %c0_5 = arith.constant 0 : index
    %4 = vector.load %arg4[%c0_4, %c0_5] : memref<32x1xf32, #tpu.memory_space<vmem>>, vector<32x1xf32>
    %5 = vector.broadcast %4 : vector<32x1xf32> to vector<32x256xf32>
    %6 = arith.addf %3, %5 : vector<32x256xf32>
    %cst_6 = arith.constant 0.000000e+00 : f32
    %7 = vector.broadcast %cst_6 : f32 to vector<32x256xf32>
    %8 = arith.cmpf oge, %6, %7 : vector<32x256xf32>
    %cst_7 = arith.constant 2.000000e-01 : f32
    %9 = vector.broadcast %cst_7 : f32 to vector<32x256xf32>
    %10 = arith.mulf %9, %6 : vector<32x256xf32>
    %11 = arith.select %8, %6, %10 : vector<32x256xi1>, vector<32x256xf32>
    %12 = vector.extract_strided_slice %11 {offsets = [0, 0], sizes = [8, 256], strides = [1, 1]} : vector<32x256xf32> to vector<8x256xf32>
    %13 = arith.truncf %12 : vector<8x256xf32> to vector<8x256xbf16>
    %c0_8 = arith.constant 0 : index
    %c0_9 = arith.constant 0 : index
    %14 = vector.load %arg6[%c0_8, %c0_9] : memref<8x8xbf16, #tpu.memory_space<vmem>>, vector<8x8xbf16>
    %cst_10 = arith.constant dense<0.000000e+00> : vector<8x256xf32>
    %15 = tpu.matmul %14, %13, %cst_10 {dimension_numbers = #tpu.dot_dimension_numbers<[1], [0], [0], [1], [0, 0, 1, 1], [], []>} : vector<8x8xbf16>, vector<8x256xbf16>, vector<8x256xf32> -> vector<8x256xf32>
    %c0_11 = arith.constant 0 : index
    %c0_12 = arith.constant 0 : index
    %16 = vector.load %arg7[%c0_11, %c0_12] : memref<8x1xf32, #tpu.memory_space<vmem>>, vector<8x1xf32>
    %17 = vector.broadcast %16 : vector<8x1xf32> to vector<8x256xf32>
    %18 = arith.addf %15, %17 : vector<8x256xf32>
    %c0_13 = arith.constant 0 : index
    %c0_14 = arith.constant 0 : index
    %19 = vector.load %arg5[%c0_13, %c0_14] : memref<8x8xbf16, #tpu.memory_space<vmem>>, vector<8x8xbf16>
    %c0_15 = arith.constant 0 : index
    %c0_16 = arith.constant 0 : index
    %c0_17 = arith.constant 0 : index
    %20 = vector.load %arg2[%c0_15, %c0_16, %c0_17] : memref<1x8x1024xbf16, #tpu.memory_space<vmem>>, vector<1x8x256xbf16>
    %21 = vector.shape_cast %20 : vector<1x8x256xbf16> to vector<8x256xbf16>
    %cst_18 = arith.constant dense<0.000000e+00> : vector<8x256xf32>
    %22 = tpu.matmul %19, %21, %cst_18 {dimension_numbers = #tpu.dot_dimension_numbers<[1], [0], [0], [1], [0, 0, 1, 1], [], []>} : vector<8x8xbf16>, vector<8x256xbf16>, vector<8x256xf32> -> vector<8x256xf32>
    %23 = arith.addf %18, %22 : vector<8x256xf32>
    %cst_19 = arith.constant 0.000000e+00 : f32
    %24 = vector.broadcast %cst_19 : f32 to vector<8x256xf32>
    %25 = arith.cmpf oge, %23, %24 : vector<8x256xf32>
    %cst_20 = arith.constant 2.000000e-01 : f32
    %26 = vector.broadcast %cst_20 : f32 to vector<8x256xf32>
    %27 = arith.mulf %26, %23 : vector<8x256xf32>
    %28 = arith.select %25, %23, %27 : vector<8x256xi1>, vector<8x256xf32>
    %29 = arith.truncf %28 : vector<8x256xf32> to vector<8x256xbf16>
    %c0_21 = arith.constant 0 : index
    %c0_22 = arith.constant 0 : index
    %c0_23 = arith.constant 0 : index
    %30 = vector.load %arg8[%c0_21, %c0_22, %c0_23] : memref<1x8x1024xbf16, #tpu.memory_space<vmem>>, vector<1x8x256xbf16>
    %31 = vector.shape_cast %30 : vector<1x8x256xbf16> to vector<8x256xbf16>
    %32 = vector.shape_cast %29 : vector<8x256xbf16> to vector<1x8x256xbf16>
    tpu.vector_store %arg8[%c0_21, %c0_22, %c0_23], %32 {strides = array<i32>} : memref<1x8x1024xbf16, #tpu.memory_space<vmem>>, vector<1x8x256xbf16>,
    %33 = vector.extract_strided_slice %11 {offsets = [8, 0], sizes = [8, 256], strides = [1, 1]} : vector<32x256xf32> to vector<8x256xf32>
    %34 = arith.truncf %33 : vector<8x256xf32> to vector<8x256xbf16>
    %c0_24 = arith.constant 0 : index
    %c0_25 = arith.constant 0 : index
    %35 = vector.load %arg6[%c0_24, %c0_25] : memref<8x8xbf16, #tpu.memory_space<vmem>>, vector<8x8xbf16>
    %cst_26 = arith.constant dense<0.000000e+00> : vector<8x256xf32>
    %36 = tpu.matmul %35, %34, %cst_26 {dimension_numbers = #tpu.dot_dimension_numbers<[1], [0], [0], [1], [0, 0, 1, 1], [], []>} : vector<8x8xbf16>, vector<8x256xbf16>, vector<8x256xf32> -> vector<8x256xf32>
    %c0_27 = arith.constant 0 : index
    %c0_28 = arith.constant 0 : index
    %37 = vector.load %arg7[%c0_27, %c0_28] : memref<8x1xf32, #tpu.memory_space<vmem>>, vector<8x1xf32>
    %38 = vector.broadcast %37 : vector<8x1xf32> to vector<8x256xf32>
    %39 = arith.addf %36, %38 : vector<8x256xf32>
    %c0_29 = arith.constant 0 : index
    %c0_30 = arith.constant 0 : index
    %40 = vector.load %arg5[%c0_29, %c0_30] : memref<8x8xbf16, #tpu.memory_space<vmem>>, vector<8x8xbf16>
    %c0_31 = arith.constant 0 : index
    %c0_32 = arith.constant 0 : index
    %c256 = arith.constant 256 : index
    %41 = vector.load %arg2[%c0_31, %c0_32, %c256] : memref<1x8x1024xbf16, #tpu.memory_space<vmem>>, vector<1x8x256xbf16>
    %42 = vector.shape_cast %41 : vector<1x8x256xbf16> to vector<8x256xbf16>
    %cst_33 = arith.constant dense<0.000000e+00> : vector<8x256xf32>
    %43 = tpu.matmul %40, %42, %cst_33 {dimension_numbers = #tpu.dot_dimension_numbers<[1], [0], [0], [1], [0, 0, 1, 1], [], []>} : vector<8x8xbf16>, vector<8x256xbf16>, vector<8x256xf32> -> vector<8x256xf32>
    %44 = arith.addf %39, %43 : vector<8x256xf32>
    %cst_34 = arith.constant 0.000000e+00 : f32
    %45 = vector.broadcast %cst_34 : f32 to vector<8x256xf32>
    %46 = arith.cmpf oge, %44, %45 : vector<8x256xf32>
    %cst_35 = arith.constant 2.000000e-01 : f32
    %47 = vector.broadcast %cst_35 : f32 to vector<8x256xf32>
    %48 = arith.mulf %47, %44 : vector<8x256xf32>
    %49 = arith.select %46, %44, %48 : vector<8x256xi1>, vector<8x256xf32>
    %50 = arith.truncf %49 : vector<8x256xf32> to vector<8x256xbf16>
    %c0_36 = arith.constant 0 : index
    %c0_37 = arith.constant 0 : index
    %c256_38 = arith.constant 256 : index
    %51 = vector.load %arg8[%c0_36, %c0_37, %c256_38] : memref<1x8x1024xbf16, #tpu.memory_space<vmem>>, vector<1x8x256xbf16>
    %52 = vector.shape_cast %51 : vector<1x8x256xbf16> to vector<8x256xbf16>
    %53 = vector.shape_cast %50 : vector<8x256xbf16> to vector<1x8x256xbf16>
    tpu.vector_store %arg8[%c0_36, %c0_37, %c256_38], %53 {strides = array<i32>} : memref<1x8x1024xbf16, #tpu.memory_space<vmem>>, vector<1x8x256xbf16>,
    %54 = vector.extract_strided_slice %11 {offsets = [16, 0], sizes = [8, 256], strides = [1, 1]} : vector<32x256xf32> to vector<8x256xf32>
    %55 = arith.truncf %54 : vector<8x256xf32> to vector<8x256xbf16>
    %c0_39 = arith.constant 0 : index
    %c0_40 = arith.constant 0 : index
    %56 = vector.load %arg6[%c0_39, %c0_40] : memref<8x8xbf16, #tpu.memory_space<vmem>>, vector<8x8xbf16>
    %cst_41 = arith.constant dense<0.000000e+00> : vector<8x256xf32>
    %57 = tpu.matmul %56, %55, %cst_41 {dimension_numbers = #tpu.dot_dimension_numbers<[1], [0], [0], [1], [0, 0, 1, 1], [], []>} : vector<8x8xbf16>, vector<8x256xbf16>, vector<8x256xf32> -> vector<8x256xf32>
    %c0_42 = arith.constant 0 : index
    %c0_43 = arith.constant 0 : index
    %58 = vector.load %arg7[%c0_42, %c0_43] : memref<8x1xf32, #tpu.memory_space<vmem>>, vector<8x1xf32>
    %59 = vector.broadcast %58 : vector<8x1xf32> to vector<8x256xf32>
    %60 = arith.addf %57, %59 : vector<8x256xf32>
    %c0_44 = arith.constant 0 : index
    %c0_45 = arith.constant 0 : index
    %61 = vector.load %arg5[%c0_44, %c0_45] : memref<8x8xbf16, #tpu.memory_space<vmem>>, vector<8x8xbf16>
    %c0_46 = arith.constant 0 : index
    %c0_47 = arith.constant 0 : index
    %c512 = arith.constant 512 : index
    %62 = vector.load %arg2[%c0_46, %c0_47, %c512] : memref<1x8x1024xbf16, #tpu.memory_space<vmem>>, vector<1x8x256xbf16>
    %63 = vector.shape_cast %62 : vector<1x8x256xbf16> to vector<8x256xbf16>
    %cst_48 = arith.constant dense<0.000000e+00> : vector<8x256xf32>
    %64 = tpu.matmul %61, %63, %cst_48 {dimension_numbers = #tpu.dot_dimension_numbers<[1], [0], [0], [1], [0, 0, 1, 1], [], []>} : vector<8x8xbf16>, vector<8x256xbf16>, vector<8x256xf32> -> vector<8x256xf32>
    %65 = arith.addf %60, %64 : vector<8x256xf32>
    %cst_49 = arith.constant 0.000000e+00 : f32
    %66 = vector.broadcast %cst_49 : f32 to vector<8x256xf32>
    %67 = arith.cmpf oge, %65, %66 : vector<8x256xf32>
    %cst_50 = arith.constant 2.000000e-01 : f32
    %68 = vector.broadcast %cst_50 : f32 to vector<8x256xf32>
    %69 = arith.mulf %68, %65 : vector<8x256xf32>
    %70 = arith.select %67, %65, %69 : vector<8x256xi1>, vector<8x256xf32>
    %71 = arith.truncf %70 : vector<8x256xf32> to vector<8x256xbf16>
    %c0_51 = arith.constant 0 : index
    %c0_52 = arith.constant 0 : index
    %c512_53 = arith.constant 512 : index
    %72 = vector.load %arg8[%c0_51, %c0_52, %c512_53] : memref<1x8x1024xbf16, #tpu.memory_space<vmem>>, vector<1x8x256xbf16>
    %73 = vector.shape_cast %72 : vector<1x8x256xbf16> to vector<8x256xbf16>
    %74 = vector.shape_cast %71 : vector<8x256xbf16> to vector<1x8x256xbf16>
    tpu.vector_store %arg8[%c0_51, %c0_52, %c512_53], %74 {strides = array<i32>} : memref<1x8x1024xbf16, #tpu.memory_space<vmem>>, vector<1x8x256xbf16>,
    %75 = vector.extract_strided_slice %11 {offsets = [24, 0], sizes = [8, 256], strides = [1, 1]} : vector<32x256xf32> to vector<8x256xf32>
    %76 = arith.truncf %75 : vector<8x256xf32> to vector<8x256xbf16>
    %c0_54 = arith.constant 0 : index
    %c0_55 = arith.constant 0 : index
    %77 = vector.load %arg6[%c0_54, %c0_55] : memref<8x8xbf16, #tpu.memory_space<vmem>>, vector<8x8xbf16>
    %cst_56 = arith.constant dense<0.000000e+00> : vector<8x256xf32>
    %78 = tpu.matmul %77, %76, %cst_56 {dimension_numbers = #tpu.dot_dimension_numbers<[1], [0], [0], [1], [0, 0, 1, 1], [], []>} : vector<8x8xbf16>, vector<8x256xbf16>, vector<8x256xf32> -> vector<8x256xf32>
    %c0_57 = arith.constant 0 : index
    %c0_58 = arith.constant 0 : index
    %79 = vector.load %arg7[%c0_57, %c0_58] : memref<8x1xf32, #tpu.memory_space<vmem>>, vector<8x1xf32>
    %80 = vector.broadcast %79 : vector<8x1xf32> to vector<8x256xf32>
    %81 = arith.addf %78, %80 : vector<8x256xf32>
    %c0_59 = arith.constant 0 : index
    %c0_60 = arith.constant 0 : index
    %82 = vector.load %arg5[%c0_59, %c0_60] : memref<8x8xbf16, #tpu.memory_space<vmem>>, vector<8x8xbf16>
    %c0_61 = arith.constant 0 : index
    %c0_62 = arith.constant 0 : index
    %c768 = arith.constant 768 : index
    %83 = vector.load %arg2[%c0_61, %c0_62, %c768] : memref<1x8x1024xbf16, #tpu.memory_space<vmem>>, vector<1x8x256xbf16>
    %84 = vector.shape_cast %83 : vector<1x8x256xbf16> to vector<8x256xbf16>
    %cst_63 = arith.constant dense<0.000000e+00> : vector<8x256xf32>
    %85 = tpu.matmul %82, %84, %cst_63 {dimension_numbers = #tpu.dot_dimension_numbers<[1], [0], [0], [1], [0, 0, 1, 1], [], []>} : vector<8x8xbf16>, vector<8x256xbf16>, vector<8x256xf32> -> vector<8x256xf32>
    %86 = arith.addf %81, %85 : vector<8x256xf32>
    %cst_64 = arith.constant 0.000000e+00 : f32
    %87 = vector.broadcast %cst_64 : f32 to vector<8x256xf32>
    %88 = arith.cmpf oge, %86, %87 : vector<8x256xf32>
    %cst_65 = arith.constant 2.000000e-01 : f32
    %89 = vector.broadcast %cst_65 : f32 to vector<8x256xf32>
    %90 = arith.mulf %89, %86 : vector<8x256xf32>
    %91 = arith.select %88, %86, %90 : vector<8x256xi1>, vector<8x256xf32>
    %92 = arith.truncf %91 : vector<8x256xf32> to vector<8x256xbf16>
    %c0_66 = arith.constant 0 : index
    %c0_67 = arith.constant 0 : index
    %c768_68 = arith.constant 768 : index
    %93 = vector.load %arg8[%c0_66, %c0_67, %c768_68] : memref<1x8x1024xbf16, #tpu.memory_space<vmem>>, vector<1x8x256xbf16>
    %94 = vector.shape_cast %93 : vector<1x8x256xbf16> to vector<8x256xbf16>
    %95 = vector.shape_cast %92 : vector<8x256xbf16> to vector<1x8x256xbf16>
    tpu.vector_store %arg8[%c0_66, %c0_67, %c768_68], %95 {strides = array<i32>} : memref<1x8x1024xbf16, #tpu.memory_space<vmem>>, vector<1x8x256xbf16>,
    return
  }
  func.func @transform_0(%arg0: i32) -> (i32, i32, i32) {
    %c0_i32 = arith.constant 0 : i32
    %c0_i32_0 = arith.constant 0 : i32
    %c0_i32_1 = arith.constant 0 : i32
    return %arg0, %c0_i32, %c0_i32_0 : i32, i32, i32
  }
  func.func @transform_1(%arg0: i32) -> (i32, i32, i32) {
    %c0_i32 = arith.constant 0 : i32
    %c0_i32_0 = arith.constant 0 : i32
    %c0_i32_1 = arith.constant 0 : i32
    return %arg0, %c0_i32, %c0_i32_0 : i32, i32, i32
  }
  func.func @transform_2(%arg0: i32) -> (i32, i32) {
    %c0_i32 = arith.constant 0 : i32
    %c0_i32_0 = arith.constant 0 : i32
    %c0_i32_1 = arith.constant 0 : i32
    return %c0_i32, %c0_i32_0 : i32, i32
  }
  func.func @transform_3(%arg0: i32) -> (i32, i32) {
    %c0_i32 = arith.constant 0 : i32
    %c0_i32_0 = arith.constant 0 : i32
    %c0_i32_1 = arith.constant 0 : i32
    return %c0_i32, %c0_i32_0 : i32, i32
  }
  func.func @transform_4(%arg0: i32) -> (i32, i32) {
    %c0_i32 = arith.constant 0 : i32
    %c0_i32_0 = arith.constant 0 : i32
    %c0_i32_1 = arith.constant 0 : i32
    return %c0_i32, %c0_i32_0 : i32, i32
  }
  func.func @transform_5(%arg0: i32) -> (i32, i32) {
    %c0_i32 = arith.constant 0 : i32
    %c0_i32_0 = arith.constant 0 : i32
    %c0_i32_1 = arith.constant 0 : i32
    return %c0_i32, %c0_i32_0 : i32, i32
  }
  func.func @transform_6(%arg0: i32) -> (i32, i32) {
    %c0_i32 = arith.constant 0 : i32
    %c0_i32_0 = arith.constant 0 : i32
    %c0_i32_1 = arith.constant 0 : i32
    return %c0_i32, %c0_i32_0 : i32, i32
  }
  func.func @transform_7(%arg0: i32) -> (i32, i32, i32) {
    %c0_i32 = arith.constant 0 : i32
    %c0_i32_0 = arith.constant 0 : i32
    %c0_i32_1 = arith.constant 0 : i32
    return %arg0, %c0_i32, %c0_i32_0 : i32, i32, i32
  }
}

module attributes {stable_mosaic.version = 11 : i64} {
  func.func @_down_uptran_kernel(%arg0: i32, %arg1: memref<1x288x256xbf16, #tpu.memory_space<vmem>>, %arg2: memref<1x8x256xbf16, #tpu.memory_space<vmem>>, %arg3: memref<8x288xbf16, #tpu.memory_space<vmem>>, %arg4: memref<8x1xf32, #tpu.memory_space<vmem>>, %arg5: memref<8x8xbf16, #tpu.memory_space<vmem>>, %arg6: memref<8x8xbf16, #tpu.memory_space<vmem>>, %arg7: memref<8x1xf32, #tpu.memory_space<vmem>>, %arg8: memref<1x8x256xbf16, #tpu.memory_space<vmem>>, %arg9: memref<1x8x256xbf16, #tpu.memory_space<vmem>>) attributes {dimension_semantics = [#tpu.dimension_semantics<parallel>], iteration_bounds = array<i64: 2>, scalar_prefetch = 0 : i64, scratch_operands = 0 : i64, tpu.core_type = #tpu.core_type<tc>, window_params = [{transform_indices = @transform_0, window_bounds = array<i64: 1, 288, 256>}, {transform_indices = @transform_1, window_bounds = array<i64: 1, 8, 256>}, {pipeline_mode = #tpu.pipeline_mode<synchronous>, transform_indices = @transform_2, window_bounds = array<i64: 8, 288>}, {pipeline_mode = #tpu.pipeline_mode<synchronous>, transform_indices = @transform_3, window_bounds = array<i64: 8, 1>}, {pipeline_mode = #tpu.pipeline_mode<synchronous>, transform_indices = @transform_4, window_bounds = array<i64: 8, 8>}, {pipeline_mode = #tpu.pipeline_mode<synchronous>, transform_indices = @transform_5, window_bounds = array<i64: 8, 8>}, {pipeline_mode = #tpu.pipeline_mode<synchronous>, transform_indices = @transform_6, window_bounds = array<i64: 8, 1>}, {transform_indices = @transform_7, window_bounds = array<i64: 1, 8, 256>}, {transform_indices = @transform_8, window_bounds = array<i64: 1, 8, 256>}]} {
    %c0 = arith.constant 0 : index
    %c0_0 = arith.constant 0 : index
    %c0_1 = arith.constant 0 : index
    %0 = vector.load %arg1[%c0, %c0_0, %c0_1] : memref<1x288x256xbf16, #tpu.memory_space<vmem>>, vector<1x288x256xbf16>
    %1 = vector.shape_cast %0 : vector<1x288x256xbf16> to vector<288x256xbf16>
    %c0_2 = arith.constant 0 : index
    %c0_3 = arith.constant 0 : index
    %2 = vector.load %arg3[%c0_2, %c0_3] : memref<8x288xbf16, #tpu.memory_space<vmem>>, vector<8x288xbf16>
    %cst = arith.constant dense<0.000000e+00> : vector<8x256xf32>
    %3 = tpu.matmul %2, %1, %cst {dimension_numbers = #tpu.dot_dimension_numbers<[1], [0], [0], [1], [0, 0, 1, 1], [], []>} : vector<8x288xbf16>, vector<288x256xbf16>, vector<8x256xf32> -> vector<8x256xf32>
    %c0_4 = arith.constant 0 : index
    %c0_5 = arith.constant 0 : index
    %4 = vector.load %arg4[%c0_4, %c0_5] : memref<8x1xf32, #tpu.memory_space<vmem>>, vector<8x1xf32>
    %5 = vector.broadcast %4 : vector<8x1xf32> to vector<8x256xf32>
    %6 = arith.addf %3, %5 : vector<8x256xf32>
    %cst_6 = arith.constant 0.000000e+00 : f32
    %7 = vector.broadcast %cst_6 : f32 to vector<8x256xf32>
    %8 = arith.cmpf oge, %6, %7 : vector<8x256xf32>
    %cst_7 = arith.constant 2.000000e-01 : f32
    %9 = vector.broadcast %cst_7 : f32 to vector<8x256xf32>
    %10 = arith.mulf %9, %6 : vector<8x256xf32>
    %11 = arith.select %8, %6, %10 : vector<8x256xi1>, vector<8x256xf32>
    %12 = arith.truncf %11 : vector<8x256xf32> to vector<8x256xbf16>
    %c0_8 = arith.constant 0 : index
    %c0_9 = arith.constant 0 : index
    %c0_10 = arith.constant 0 : index
    %13 = vector.load %arg8[%c0_8, %c0_9, %c0_10] : memref<1x8x256xbf16, #tpu.memory_space<vmem>>, vector<1x8x256xbf16>
    %14 = vector.shape_cast %13 : vector<1x8x256xbf16> to vector<8x256xbf16>
    %15 = vector.shape_cast %12 : vector<8x256xbf16> to vector<1x8x256xbf16>
    tpu.vector_store %arg8[%c0_8, %c0_9, %c0_10], %15 {strides = array<i32>} : memref<1x8x256xbf16, #tpu.memory_space<vmem>>, vector<1x8x256xbf16>,
    %c0_11 = arith.constant 0 : index
    %c0_12 = arith.constant 0 : index
    %16 = vector.load %arg6[%c0_11, %c0_12] : memref<8x8xbf16, #tpu.memory_space<vmem>>, vector<8x8xbf16>
    %cst_13 = arith.constant dense<0.000000e+00> : vector<8x256xf32>
    %17 = tpu.matmul %16, %12, %cst_13 {dimension_numbers = #tpu.dot_dimension_numbers<[1], [0], [0], [1], [0, 0, 1, 1], [], []>} : vector<8x8xbf16>, vector<8x256xbf16>, vector<8x256xf32> -> vector<8x256xf32>
    %c0_14 = arith.constant 0 : index
    %c0_15 = arith.constant 0 : index
    %18 = vector.load %arg7[%c0_14, %c0_15] : memref<8x1xf32, #tpu.memory_space<vmem>>, vector<8x1xf32>
    %19 = vector.broadcast %18 : vector<8x1xf32> to vector<8x256xf32>
    %20 = arith.addf %17, %19 : vector<8x256xf32>
    %c0_16 = arith.constant 0 : index
    %c0_17 = arith.constant 0 : index
    %21 = vector.load %arg5[%c0_16, %c0_17] : memref<8x8xbf16, #tpu.memory_space<vmem>>, vector<8x8xbf16>
    %c0_18 = arith.constant 0 : index
    %c0_19 = arith.constant 0 : index
    %c0_20 = arith.constant 0 : index
    %22 = vector.load %arg2[%c0_18, %c0_19, %c0_20] : memref<1x8x256xbf16, #tpu.memory_space<vmem>>, vector<1x8x256xbf16>
    %23 = vector.shape_cast %22 : vector<1x8x256xbf16> to vector<8x256xbf16>
    %cst_21 = arith.constant dense<0.000000e+00> : vector<8x256xf32>
    %24 = tpu.matmul %21, %23, %cst_21 {dimension_numbers = #tpu.dot_dimension_numbers<[1], [0], [0], [1], [0, 0, 1, 1], [], []>} : vector<8x8xbf16>, vector<8x256xbf16>, vector<8x256xf32> -> vector<8x256xf32>
    %25 = arith.addf %20, %24 : vector<8x256xf32>
    %cst_22 = arith.constant 0.000000e+00 : f32
    %26 = vector.broadcast %cst_22 : f32 to vector<8x256xf32>
    %27 = arith.cmpf oge, %25, %26 : vector<8x256xf32>
    %cst_23 = arith.constant 2.000000e-01 : f32
    %28 = vector.broadcast %cst_23 : f32 to vector<8x256xf32>
    %29 = arith.mulf %28, %25 : vector<8x256xf32>
    %30 = arith.select %27, %25, %29 : vector<8x256xi1>, vector<8x256xf32>
    %31 = arith.truncf %30 : vector<8x256xf32> to vector<8x256xbf16>
    %c0_24 = arith.constant 0 : index
    %c0_25 = arith.constant 0 : index
    %c0_26 = arith.constant 0 : index
    %32 = vector.load %arg9[%c0_24, %c0_25, %c0_26] : memref<1x8x256xbf16, #tpu.memory_space<vmem>>, vector<1x8x256xbf16>
    %33 = vector.shape_cast %32 : vector<1x8x256xbf16> to vector<8x256xbf16>
    %34 = vector.shape_cast %31 : vector<8x256xbf16> to vector<1x8x256xbf16>
    tpu.vector_store %arg9[%c0_24, %c0_25, %c0_26], %34 {strides = array<i32>} : memref<1x8x256xbf16, #tpu.memory_space<vmem>>, vector<1x8x256xbf16>,
    return
  }
  func.func @transform_0(%arg0: i32) -> (i32, i32, i32) {
    %c0_i32 = arith.constant 0 : i32
    %c0_i32_0 = arith.constant 0 : i32
    %c0_i32_1 = arith.constant 0 : i32
    return %arg0, %c0_i32, %c0_i32_0 : i32, i32, i32
  }
  func.func @transform_1(%arg0: i32) -> (i32, i32, i32) {
    %c0_i32 = arith.constant 0 : i32
    %c0_i32_0 = arith.constant 0 : i32
    %c0_i32_1 = arith.constant 0 : i32
    return %arg0, %c0_i32, %c0_i32_0 : i32, i32, i32
  }
  func.func @transform_2(%arg0: i32) -> (i32, i32) {
    %c0_i32 = arith.constant 0 : i32
    %c0_i32_0 = arith.constant 0 : i32
    %c0_i32_1 = arith.constant 0 : i32
    return %c0_i32, %c0_i32_0 : i32, i32
  }
  func.func @transform_3(%arg0: i32) -> (i32, i32) {
    %c0_i32 = arith.constant 0 : i32
    %c0_i32_0 = arith.constant 0 : i32
    %c0_i32_1 = arith.constant 0 : i32
    return %c0_i32, %c0_i32_0 : i32, i32
  }
  func.func @transform_4(%arg0: i32) -> (i32, i32) {
    %c0_i32 = arith.constant 0 : i32
    %c0_i32_0 = arith.constant 0 : i32
    %c0_i32_1 = arith.constant 0 : i32
    return %c0_i32, %c0_i32_0 : i32, i32
  }
  func.func @transform_5(%arg0: i32) -> (i32, i32) {
    %c0_i32 = arith.constant 0 : i32
    %c0_i32_0 = arith.constant 0 : i32
    %c0_i32_1 = arith.constant 0 : i32
    return %c0_i32, %c0_i32_0 : i32, i32
  }
  func.func @transform_6(%arg0: i32) -> (i32, i32) {
    %c0_i32 = arith.constant 0 : i32
    %c0_i32_0 = arith.constant 0 : i32
    %c0_i32_1 = arith.constant 0 : i32
    return %c0_i32, %c0_i32_0 : i32, i32
  }
  func.func @transform_7(%arg0: i32) -> (i32, i32, i32) {
    %c0_i32 = arith.constant 0 : i32
    %c0_i32_0 = arith.constant 0 : i32
    %c0_i32_1 = arith.constant 0 : i32
    return %arg0, %c0_i32, %c0_i32_0 : i32, i32, i32
  }
  func.func @transform_8(%arg0: i32) -> (i32, i32, i32) {
    %c0_i32 = arith.constant 0 : i32
    %c0_i32_0 = arith.constant 0 : i32
    %c0_i32_1 = arith.constant 0 : i32
    return %arg0, %c0_i32, %c0_i32_0 : i32, i32, i32
  }
}

module attributes {stable_mosaic.version = 11 : i64} {
  func.func @_down_final_kernel(%arg0: i32, %arg1: memref<1x288x256xbf16, #tpu.memory_space<vmem>>, %arg2: memref<1x8x256xbf16, #tpu.memory_space<vmem>>, %arg3: memref<1x8x256xbf16, #tpu.memory_space<vmem>>, %arg4: memref<8x288xbf16, #tpu.memory_space<vmem>>, %arg5: memref<8x1xf32, #tpu.memory_space<vmem>>, %arg6: memref<8x8xbf16, #tpu.memory_space<vmem>>, %arg7: memref<8x8xbf16, #tpu.memory_space<vmem>>, %arg8: memref<8x1xf32, #tpu.memory_space<vmem>>, %arg9: memref<8x8xbf16, #tpu.memory_space<vmem>>, %arg10: memref<8x8xbf16, #tpu.memory_space<vmem>>, %arg11: memref<8x1xf32, #tpu.memory_space<vmem>>, %arg12: memref<1x8x256xbf16, #tpu.memory_space<vmem>>, %arg13: memref<1x8x256xbf16, #tpu.memory_space<vmem>>) attributes {dimension_semantics = [#tpu.dimension_semantics<parallel>], iteration_bounds = array<i64: 2>, scalar_prefetch = 0 : i64, scratch_operands = 0 : i64, tpu.core_type = #tpu.core_type<tc>, window_params = [{transform_indices = @transform_0, window_bounds = array<i64: 1, 288, 256>}, {transform_indices = @transform_1, window_bounds = array<i64: 1, 8, 256>}, {transform_indices = @transform_2, window_bounds = array<i64: 1, 8, 256>}, {pipeline_mode = #tpu.pipeline_mode<synchronous>, transform_indices = @transform_3, window_bounds = array<i64: 8, 288>}, {pipeline_mode = #tpu.pipeline_mode<synchronous>, transform_indices = @transform_4, window_bounds = array<i64: 8, 1>}, {pipeline_mode = #tpu.pipeline_mode<synchronous>, transform_indices = @transform_5, window_bounds = array<i64: 8, 8>}, {pipeline_mode = #tpu.pipeline_mode<synchronous>, transform_indices = @transform_6, window_bounds = array<i64: 8, 8>}, {pipeline_mode = #tpu.pipeline_mode<synchronous>, transform_indices = @transform_7, window_bounds = array<i64: 8, 1>}, {pipeline_mode = #tpu.pipeline_mode<synchronous>, transform_indices = @transform_8, window_bounds = array<i64: 8, 8>}, {pipeline_mode = #tpu.pipeline_mode<synchronous>, transform_indices = @transform_9, window_bounds = array<i64: 8, 8>}, {pipeline_mode = #tpu.pipeline_mode<synchronous>, transform_indices = @transform_10, window_bounds = array<i64: 8, 1>}, {transform_indices = @transform_11, window_bounds = array<i64: 1, 8, 256>}, {transform_indices = @transform_12, window_bounds = array<i64: 1, 8, 256>}]} {
    %c0 = arith.constant 0 : index
    %c0_0 = arith.constant 0 : index
    %c0_1 = arith.constant 0 : index
    %0 = vector.load %arg1[%c0, %c0_0, %c0_1] : memref<1x288x256xbf16, #tpu.memory_space<vmem>>, vector<1x288x256xbf16>
    %1 = vector.shape_cast %0 : vector<1x288x256xbf16> to vector<288x256xbf16>
    %c0_2 = arith.constant 0 : index
    %c0_3 = arith.constant 0 : index
    %2 = vector.load %arg4[%c0_2, %c0_3] : memref<8x288xbf16, #tpu.memory_space<vmem>>, vector<8x288xbf16>
    %cst = arith.constant dense<0.000000e+00> : vector<8x256xf32>
    %3 = tpu.matmul %2, %1, %cst {dimension_numbers = #tpu.dot_dimension_numbers<[1], [0], [0], [1], [0, 0, 1, 1], [], []>} : vector<8x288xbf16>, vector<288x256xbf16>, vector<8x256xf32> -> vector<8x256xf32>
    %c0_4 = arith.constant 0 : index
    %c0_5 = arith.constant 0 : index
    %4 = vector.load %arg5[%c0_4, %c0_5] : memref<8x1xf32, #tpu.memory_space<vmem>>, vector<8x1xf32>
    %5 = vector.broadcast %4 : vector<8x1xf32> to vector<8x256xf32>
    %6 = arith.addf %3, %5 : vector<8x256xf32>
    %cst_6 = arith.constant 0.000000e+00 : f32
    %7 = vector.broadcast %cst_6 : f32 to vector<8x256xf32>
    %8 = arith.cmpf oge, %6, %7 : vector<8x256xf32>
    %cst_7 = arith.constant 2.000000e-01 : f32
    %9 = vector.broadcast %cst_7 : f32 to vector<8x256xf32>
    %10 = arith.mulf %9, %6 : vector<8x256xf32>
    %11 = arith.select %8, %6, %10 : vector<8x256xi1>, vector<8x256xf32>
    %12 = arith.truncf %11 : vector<8x256xf32> to vector<8x256xbf16>
    %c0_8 = arith.constant 0 : index
    %c0_9 = arith.constant 0 : index
    %13 = vector.load %arg7[%c0_8, %c0_9] : memref<8x8xbf16, #tpu.memory_space<vmem>>, vector<8x8xbf16>
    %cst_10 = arith.constant dense<0.000000e+00> : vector<8x256xf32>
    %14 = tpu.matmul %13, %12, %cst_10 {dimension_numbers = #tpu.dot_dimension_numbers<[1], [0], [0], [1], [0, 0, 1, 1], [], []>} : vector<8x8xbf16>, vector<8x256xbf16>, vector<8x256xf32> -> vector<8x256xf32>
    %c0_11 = arith.constant 0 : index
    %c0_12 = arith.constant 0 : index
    %15 = vector.load %arg8[%c0_11, %c0_12] : memref<8x1xf32, #tpu.memory_space<vmem>>, vector<8x1xf32>
    %16 = vector.broadcast %15 : vector<8x1xf32> to vector<8x256xf32>
    %17 = arith.addf %14, %16 : vector<8x256xf32>
    %c0_13 = arith.constant 0 : index
    %c0_14 = arith.constant 0 : index
    %18 = vector.load %arg6[%c0_13, %c0_14] : memref<8x8xbf16, #tpu.memory_space<vmem>>, vector<8x8xbf16>
    %c0_15 = arith.constant 0 : index
    %c0_16 = arith.constant 0 : index
    %c0_17 = arith.constant 0 : index
    %19 = vector.load %arg2[%c0_15, %c0_16, %c0_17] : memref<1x8x256xbf16, #tpu.memory_space<vmem>>, vector<1x8x256xbf16>
    %20 = vector.shape_cast %19 : vector<1x8x256xbf16> to vector<8x256xbf16>
    %cst_18 = arith.constant dense<0.000000e+00> : vector<8x256xf32>
    %21 = tpu.matmul %18, %20, %cst_18 {dimension_numbers = #tpu.dot_dimension_numbers<[1], [0], [0], [1], [0, 0, 1, 1], [], []>} : vector<8x8xbf16>, vector<8x256xbf16>, vector<8x256xf32> -> vector<8x256xf32>
    %22 = arith.addf %17, %21 : vector<8x256xf32>
    %cst_19 = arith.constant 0.000000e+00 : f32
    %23 = vector.broadcast %cst_19 : f32 to vector<8x256xf32>
    %24 = arith.cmpf oge, %22, %23 : vector<8x256xf32>
    %cst_20 = arith.constant 2.000000e-01 : f32
    %25 = vector.broadcast %cst_20 : f32 to vector<8x256xf32>
    %26 = arith.mulf %25, %22 : vector<8x256xf32>
    %27 = arith.select %24, %22, %26 : vector<8x256xi1>, vector<8x256xf32>
    %28 = arith.truncf %27 : vector<8x256xf32> to vector<8x256xbf16>
    %c0_21 = arith.constant 0 : index
    %c0_22 = arith.constant 0 : index
    %c0_23 = arith.constant 0 : index
    %29 = vector.load %arg12[%c0_21, %c0_22, %c0_23] : memref<1x8x256xbf16, #tpu.memory_space<vmem>>, vector<1x8x256xbf16>
    %30 = vector.shape_cast %29 : vector<1x8x256xbf16> to vector<8x256xbf16>
    %31 = vector.shape_cast %28 : vector<8x256xbf16> to vector<1x8x256xbf16>
    tpu.vector_store %arg12[%c0_21, %c0_22, %c0_23], %31 {strides = array<i32>} : memref<1x8x256xbf16, #tpu.memory_space<vmem>>, vector<1x8x256xbf16>,
    %c0_24 = arith.constant 0 : index
    %c0_25 = arith.constant 0 : index
    %32 = vector.load %arg9[%c0_24, %c0_25] : memref<8x8xbf16, #tpu.memory_space<vmem>>, vector<8x8xbf16>
    %c0_26 = arith.constant 0 : index
    %c0_27 = arith.constant 0 : index
    %c0_28 = arith.constant 0 : index
    %33 = vector.load %arg3[%c0_26, %c0_27, %c0_28] : memref<1x8x256xbf16, #tpu.memory_space<vmem>>, vector<1x8x256xbf16>
    %34 = vector.shape_cast %33 : vector<1x8x256xbf16> to vector<8x256xbf16>
    %cst_29 = arith.constant dense<0.000000e+00> : vector<8x256xf32>
    %35 = tpu.matmul %32, %34, %cst_29 {dimension_numbers = #tpu.dot_dimension_numbers<[1], [0], [0], [1], [0, 0, 1, 1], [], []>} : vector<8x8xbf16>, vector<8x256xbf16>, vector<8x256xf32> -> vector<8x256xf32>
    %c0_30 = arith.constant 0 : index
    %c0_31 = arith.constant 0 : index
    %36 = vector.load %arg10[%c0_30, %c0_31] : memref<8x8xbf16, #tpu.memory_space<vmem>>, vector<8x8xbf16>
    %cst_32 = arith.constant dense<0.000000e+00> : vector<8x256xf32>
    %37 = tpu.matmul %36, %28, %cst_32 {dimension_numbers = #tpu.dot_dimension_numbers<[1], [0], [0], [1], [0, 0, 1, 1], [], []>} : vector<8x8xbf16>, vector<8x256xbf16>, vector<8x256xf32> -> vector<8x256xf32>
    %38 = arith.addf %35, %37 : vector<8x256xf32>
    %c0_33 = arith.constant 0 : index
    %c0_34 = arith.constant 0 : index
    %39 = vector.load %arg11[%c0_33, %c0_34] : memref<8x1xf32, #tpu.memory_space<vmem>>, vector<8x1xf32>
    %40 = vector.broadcast %39 : vector<8x1xf32> to vector<8x256xf32>
    %41 = arith.addf %38, %40 : vector<8x256xf32>
    %cst_35 = arith.constant 0.000000e+00 : f32
    %42 = vector.broadcast %cst_35 : f32 to vector<8x256xf32>
    %43 = arith.cmpf oge, %41, %42 : vector<8x256xf32>
    %cst_36 = arith.constant 2.000000e-01 : f32
    %44 = vector.broadcast %cst_36 : f32 to vector<8x256xf32>
    %45 = arith.mulf %44, %41 : vector<8x256xf32>
    %46 = arith.select %43, %41, %45 : vector<8x256xi1>, vector<8x256xf32>
    %47 = arith.truncf %46 : vector<8x256xf32> to vector<8x256xbf16>
    %c0_37 = arith.constant 0 : index
    %c0_38 = arith.constant 0 : index
    %c0_39 = arith.constant 0 : index
    %48 = vector.load %arg13[%c0_37, %c0_38, %c0_39] : memref<1x8x256xbf16, #tpu.memory_space<vmem>>, vector<1x8x256xbf16>
    %49 = vector.shape_cast %48 : vector<1x8x256xbf16> to vector<8x256xbf16>
    %50 = vector.shape_cast %47 : vector<8x256xbf16> to vector<1x8x256xbf16>
    tpu.vector_store %arg13[%c0_37, %c0_38, %c0_39], %50 {strides = array<i32>} : memref<1x8x256xbf16, #tpu.memory_space<vmem>>, vector<1x8x256xbf16>,
    return
  }
  func.func @transform_0(%arg0: i32) -> (i32, i32, i32) {
    %c0_i32 = arith.constant 0 : i32
    %c0_i32_0 = arith.constant 0 : i32
    %c0_i32_1 = arith.constant 0 : i32
    return %arg0, %c0_i32, %c0_i32_0 : i32, i32, i32
  }
  func.func @transform_1(%arg0: i32) -> (i32, i32, i32) {
    %c0_i32 = arith.constant 0 : i32
    %c0_i32_0 = arith.constant 0 : i32
    %c0_i32_1 = arith.constant 0 : i32
    return %arg0, %c0_i32, %c0_i32_0 : i32, i32, i32
  }
  func.func @transform_2(%arg0: i32) -> (i32, i32, i32) {
    %c0_i32 = arith.constant 0 : i32
    %c0_i32_0 = arith.constant 0 : i32
    %c0_i32_1 = arith.constant 0 : i32
    return %arg0, %c0_i32, %c0_i32_0 : i32, i32, i32
  }
  func.func @transform_3(%arg0: i32) -> (i32, i32) {
    %c0_i32 = arith.constant 0 : i32
    %c0_i32_0 = arith.constant 0 : i32
    %c0_i32_1 = arith.constant 0 : i32
    return %c0_i32, %c0_i32_0 : i32, i32
  }
  func.func @transform_4(%arg0: i32) -> (i32, i32) {
    %c0_i32 = arith.constant 0 : i32
    %c0_i32_0 = arith.constant 0 : i32
    %c0_i32_1 = arith.constant 0 : i32
    return %c0_i32, %c0_i32_0 : i32, i32
  }
  func.func @transform_5(%arg0: i32) -> (i32, i32) {
    %c0_i32 = arith.constant 0 : i32
    %c0_i32_0 = arith.constant 0 : i32
    %c0_i32_1 = arith.constant 0 : i32
    return %c0_i32, %c0_i32_0 : i32, i32
  }
  func.func @transform_6(%arg0: i32) -> (i32, i32) {
    %c0_i32 = arith.constant 0 : i32
    %c0_i32_0 = arith.constant 0 : i32
    %c0_i32_1 = arith.constant 0 : i32
    return %c0_i32, %c0_i32_0 : i32, i32
  }
  func.func @transform_7(%arg0: i32) -> (i32, i32) {
    %c0_i32 = arith.constant 0 : i32
    %c0_i32_0 = arith.constant 0 : i32
    %c0_i32_1 = arith.constant 0 : i32
    return %c0_i32, %c0_i32_0 : i32, i32
  }
  func.func @transform_8(%arg0: i32) -> (i32, i32) {
    %c0_i32 = arith.constant 0 : i32
    %c0_i32_0 = arith.constant 0 : i32
    %c0_i32_1 = arith.constant 0 : i32
    return %c0_i32, %c0_i32_0 : i32, i32
  }
  func.func @transform_9(%arg0: i32) -> (i32, i32) {
    %c0_i32 = arith.constant 0 : i32
    %c0_i32_0 = arith.constant 0 : i32
    %c0_i32_1 = arith.constant 0 : i32
    return %c0_i32, %c0_i32_0 : i32, i32
  }
  func.func @transform_10(%arg0: i32) -> (i32, i32) {
    %c0_i32 = arith.constant 0 : i32
    %c0_i32_0 = arith.constant 0 : i32
    %c0_i32_1 = arith.constant 0 : i32
    return %c0_i32, %c0_i32_0 : i32, i32
  }
  func.func @transform_11(%arg0: i32) -> (i32, i32, i32) {
    %c0_i32 = arith.constant 0 : i32
    %c0_i32_0 = arith.constant 0 : i32
    %c0_i32_1 = arith.constant 0 : i32
    return %arg0, %c0_i32, %c0_i32_0 : i32, i32, i32
  }
  func.func @transform_12(%arg0: i32) -> (i32, i32, i32) {
    %c0_i32 = arith.constant 0 : i32
    %c0_i32_0 = arith.constant 0 : i32
    %c0_i32_1 = arith.constant 0 : i32
    return %arg0, %c0_i32, %c0_i32_0 : i32, i32, i32
  }
}

module attributes {stable_mosaic.version = 11 : i64} {
  func.func @_down_final_kernel(%arg0: i32, %arg1: memref<1x288x256xbf16, #tpu.memory_space<vmem>>, %arg2: memref<1x8x256xbf16, #tpu.memory_space<vmem>>, %arg3: memref<1x8x256xbf16, #tpu.memory_space<vmem>>, %arg4: memref<8x288xbf16, #tpu.memory_space<vmem>>, %arg5: memref<8x1xf32, #tpu.memory_space<vmem>>, %arg6: memref<8x8xbf16, #tpu.memory_space<vmem>>, %arg7: memref<8x8xbf16, #tpu.memory_space<vmem>>, %arg8: memref<8x1xf32, #tpu.memory_space<vmem>>, %arg9: memref<8x8xbf16, #tpu.memory_space<vmem>>, %arg10: memref<8x8xbf16, #tpu.memory_space<vmem>>, %arg11: memref<8x1xf32, #tpu.memory_space<vmem>>, %arg12: memref<1x8x256xbf16, #tpu.memory_space<vmem>>, %arg13: memref<1x8x256xbf16, #tpu.memory_space<vmem>>) attributes {dimension_semantics = [#tpu.dimension_semantics<parallel>], iteration_bounds = array<i64: 2>, scalar_prefetch = 0 : i64, scratch_operands = 0 : i64, tpu.core_type = #tpu.core_type<tc>, window_params = [{transform_indices = @transform_0, window_bounds = array<i64: 1, 288, 256>}, {transform_indices = @transform_1, window_bounds = array<i64: 1, 8, 256>}, {transform_indices = @transform_2, window_bounds = array<i64: 1, 8, 256>}, {pipeline_mode = #tpu.pipeline_mode<synchronous>, transform_indices = @transform_3, window_bounds = array<i64: 8, 288>}, {pipeline_mode = #tpu.pipeline_mode<synchronous>, transform_indices = @transform_4, window_bounds = array<i64: 8, 1>}, {pipeline_mode = #tpu.pipeline_mode<synchronous>, transform_indices = @transform_5, window_bounds = array<i64: 8, 8>}, {pipeline_mode = #tpu.pipeline_mode<synchronous>, transform_indices = @transform_6, window_bounds = array<i64: 8, 8>}, {pipeline_mode = #tpu.pipeline_mode<synchronous>, transform_indices = @transform_7, window_bounds = array<i64: 8, 1>}, {pipeline_mode = #tpu.pipeline_mode<synchronous>, transform_indices = @transform_8, window_bounds = array<i64: 8, 8>}, {pipeline_mode = #tpu.pipeline_mode<synchronous>, transform_indices = @transform_9, window_bounds = array<i64: 8, 8>}, {pipeline_mode = #tpu.pipeline_mode<synchronous>, transform_indices = @transform_10, window_bounds = array<i64: 8, 1>}, {transform_indices = @transform_11, window_bounds = array<i64: 1, 8, 256>}, {transform_indices = @transform_12, window_bounds = array<i64: 1, 8, 256>}]} {
    %c0 = arith.constant 0 : index
    %c0_0 = arith.constant 0 : index
    %c0_1 = arith.constant 0 : index
    %0 = vector.load %arg1[%c0, %c0_0, %c0_1] : memref<1x288x256xbf16, #tpu.memory_space<vmem>>, vector<1x288x256xbf16>
    %1 = vector.shape_cast %0 : vector<1x288x256xbf16> to vector<288x256xbf16>
    %c0_2 = arith.constant 0 : index
    %c0_3 = arith.constant 0 : index
    %2 = vector.load %arg4[%c0_2, %c0_3] : memref<8x288xbf16, #tpu.memory_space<vmem>>, vector<8x288xbf16>
    %cst = arith.constant dense<0.000000e+00> : vector<8x256xf32>
    %3 = tpu.matmul %2, %1, %cst {dimension_numbers = #tpu.dot_dimension_numbers<[1], [0], [0], [1], [0, 0, 1, 1], [], []>} : vector<8x288xbf16>, vector<288x256xbf16>, vector<8x256xf32> -> vector<8x256xf32>
    %c0_4 = arith.constant 0 : index
    %c0_5 = arith.constant 0 : index
    %4 = vector.load %arg5[%c0_4, %c0_5] : memref<8x1xf32, #tpu.memory_space<vmem>>, vector<8x1xf32>
    %5 = vector.broadcast %4 : vector<8x1xf32> to vector<8x256xf32>
    %6 = arith.addf %3, %5 : vector<8x256xf32>
    %cst_6 = arith.constant 0.000000e+00 : f32
    %7 = vector.broadcast %cst_6 : f32 to vector<8x256xf32>
    %8 = arith.cmpf oge, %6, %7 : vector<8x256xf32>
    %cst_7 = arith.constant 2.000000e-01 : f32
    %9 = vector.broadcast %cst_7 : f32 to vector<8x256xf32>
    %10 = arith.mulf %9, %6 : vector<8x256xf32>
    %11 = arith.select %8, %6, %10 : vector<8x256xi1>, vector<8x256xf32>
    %12 = arith.truncf %11 : vector<8x256xf32> to vector<8x256xbf16>
    %c0_8 = arith.constant 0 : index
    %c0_9 = arith.constant 0 : index
    %13 = vector.load %arg7[%c0_8, %c0_9] : memref<8x8xbf16, #tpu.memory_space<vmem>>, vector<8x8xbf16>
    %cst_10 = arith.constant dense<0.000000e+00> : vector<8x256xf32>
    %14 = tpu.matmul %13, %12, %cst_10 {dimension_numbers = #tpu.dot_dimension_numbers<[1], [0], [0], [1], [0, 0, 1, 1], [], []>} : vector<8x8xbf16>, vector<8x256xbf16>, vector<8x256xf32> -> vector<8x256xf32>
    %c0_11 = arith.constant 0 : index
    %c0_12 = arith.constant 0 : index
    %15 = vector.load %arg8[%c0_11, %c0_12] : memref<8x1xf32, #tpu.memory_space<vmem>>, vector<8x1xf32>
    %16 = vector.broadcast %15 : vector<8x1xf32> to vector<8x256xf32>
    %17 = arith.addf %14, %16 : vector<8x256xf32>
    %c0_13 = arith.constant 0 : index
    %c0_14 = arith.constant 0 : index
    %18 = vector.load %arg6[%c0_13, %c0_14] : memref<8x8xbf16, #tpu.memory_space<vmem>>, vector<8x8xbf16>
    %c0_15 = arith.constant 0 : index
    %c0_16 = arith.constant 0 : index
    %c0_17 = arith.constant 0 : index
    %19 = vector.load %arg2[%c0_15, %c0_16, %c0_17] : memref<1x8x256xbf16, #tpu.memory_space<vmem>>, vector<1x8x256xbf16>
    %20 = vector.shape_cast %19 : vector<1x8x256xbf16> to vector<8x256xbf16>
    %cst_18 = arith.constant dense<0.000000e+00> : vector<8x256xf32>
    %21 = tpu.matmul %18, %20, %cst_18 {dimension_numbers = #tpu.dot_dimension_numbers<[1], [0], [0], [1], [0, 0, 1, 1], [], []>} : vector<8x8xbf16>, vector<8x256xbf16>, vector<8x256xf32> -> vector<8x256xf32>
    %22 = arith.addf %17, %21 : vector<8x256xf32>
    %cst_19 = arith.constant 0.000000e+00 : f32
    %23 = vector.broadcast %cst_19 : f32 to vector<8x256xf32>
    %24 = arith.cmpf oge, %22, %23 : vector<8x256xf32>
    %cst_20 = arith.constant 2.000000e-01 : f32
    %25 = vector.broadcast %cst_20 : f32 to vector<8x256xf32>
    %26 = arith.mulf %25, %22 : vector<8x256xf32>
    %27 = arith.select %24, %22, %26 : vector<8x256xi1>, vector<8x256xf32>
    %28 = arith.truncf %27 : vector<8x256xf32> to vector<8x256xbf16>
    %c0_21 = arith.constant 0 : index
    %c0_22 = arith.constant 0 : index
    %c0_23 = arith.constant 0 : index
    %29 = vector.load %arg12[%c0_21, %c0_22, %c0_23] : memref<1x8x256xbf16, #tpu.memory_space<vmem>>, vector<1x8x256xbf16>
    %30 = vector.shape_cast %29 : vector<1x8x256xbf16> to vector<8x256xbf16>
    %31 = vector.shape_cast %28 : vector<8x256xbf16> to vector<1x8x256xbf16>
    tpu.vector_store %arg12[%c0_21, %c0_22, %c0_23], %31 {strides = array<i32>} : memref<1x8x256xbf16, #tpu.memory_space<vmem>>, vector<1x8x256xbf16>,
    %c0_24 = arith.constant 0 : index
    %c0_25 = arith.constant 0 : index
    %32 = vector.load %arg9[%c0_24, %c0_25] : memref<8x8xbf16, #tpu.memory_space<vmem>>, vector<8x8xbf16>
    %c0_26 = arith.constant 0 : index
    %c0_27 = arith.constant 0 : index
    %c0_28 = arith.constant 0 : index
    %33 = vector.load %arg3[%c0_26, %c0_27, %c0_28] : memref<1x8x256xbf16, #tpu.memory_space<vmem>>, vector<1x8x256xbf16>
    %34 = vector.shape_cast %33 : vector<1x8x256xbf16> to vector<8x256xbf16>
    %cst_29 = arith.constant dense<0.000000e+00> : vector<8x256xf32>
    %35 = tpu.matmul %32, %34, %cst_29 {dimension_numbers = #tpu.dot_dimension_numbers<[1], [0], [0], [1], [0, 0, 1, 1], [], []>} : vector<8x8xbf16>, vector<8x256xbf16>, vector<8x256xf32> -> vector<8x256xf32>
    %c0_30 = arith.constant 0 : index
    %c0_31 = arith.constant 0 : index
    %36 = vector.load %arg10[%c0_30, %c0_31] : memref<8x8xbf16, #tpu.memory_space<vmem>>, vector<8x8xbf16>
    %cst_32 = arith.constant dense<0.000000e+00> : vector<8x256xf32>
    %37 = tpu.matmul %36, %28, %cst_32 {dimension_numbers = #tpu.dot_dimension_numbers<[1], [0], [0], [1], [0, 0, 1, 1], [], []>} : vector<8x8xbf16>, vector<8x256xbf16>, vector<8x256xf32> -> vector<8x256xf32>
    %38 = arith.addf %35, %37 : vector<8x256xf32>
    %c0_33 = arith.constant 0 : index
    %c0_34 = arith.constant 0 : index
    %39 = vector.load %arg11[%c0_33, %c0_34] : memref<8x1xf32, #tpu.memory_space<vmem>>, vector<8x1xf32>
    %40 = vector.broadcast %39 : vector<8x1xf32> to vector<8x256xf32>
    %41 = arith.addf %38, %40 : vector<8x256xf32>
    %cst_35 = arith.constant 0.000000e+00 : f32
    %42 = vector.broadcast %cst_35 : f32 to vector<8x256xf32>
    %43 = arith.cmpf oge, %41, %42 : vector<8x256xf32>
    %cst_36 = arith.constant 2.000000e-01 : f32
    %44 = vector.broadcast %cst_36 : f32 to vector<8x256xf32>
    %45 = arith.mulf %44, %41 : vector<8x256xf32>
    %46 = arith.select %43, %41, %45 : vector<8x256xi1>, vector<8x256xf32>
    %47 = arith.truncf %46 : vector<8x256xf32> to vector<8x256xbf16>
    %c0_37 = arith.constant 0 : index
    %c0_38 = arith.constant 0 : index
    %c0_39 = arith.constant 0 : index
    %48 = vector.load %arg13[%c0_37, %c0_38, %c0_39] : memref<1x8x256xbf16, #tpu.memory_space<vmem>>, vector<1x8x256xbf16>
    %49 = vector.shape_cast %48 : vector<1x8x256xbf16> to vector<8x256xbf16>
    %50 = vector.shape_cast %47 : vector<8x256xbf16> to vector<1x8x256xbf16>
    tpu.vector_store %arg13[%c0_37, %c0_38, %c0_39], %50 {strides = array<i32>} : memref<1x8x256xbf16, #tpu.memory_space<vmem>>, vector<1x8x256xbf16>,
    return
  }
  func.func @transform_0(%arg0: i32) -> (i32, i32, i32) {
    %c0_i32 = arith.constant 0 : i32
    %c0_i32_0 = arith.constant 0 : i32
    %c0_i32_1 = arith.constant 0 : i32
    return %arg0, %c0_i32, %c0_i32_0 : i32, i32, i32
  }
  func.func @transform_1(%arg0: i32) -> (i32, i32, i32) {
    %c0_i32 = arith.constant 0 : i32
    %c0_i32_0 = arith.constant 0 : i32
    %c0_i32_1 = arith.constant 0 : i32
    return %arg0, %c0_i32, %c0_i32_0 : i32, i32, i32
  }
  func.func @transform_2(%arg0: i32) -> (i32, i32, i32) {
    %c0_i32 = arith.constant 0 : i32
    %c0_i32_0 = arith.constant 0 : i32
    %c0_i32_1 = arith.constant 0 : i32
    return %arg0, %c0_i32, %c0_i32_0 : i32, i32, i32
  }
  func.func @transform_3(%arg0: i32) -> (i32, i32) {
    %c0_i32 = arith.constant 0 : i32
    %c0_i32_0 = arith.constant 0 : i32
    %c0_i32_1 = arith.constant 0 : i32
    return %c0_i32, %c0_i32_0 : i32, i32
  }
  func.func @transform_4(%arg0: i32) -> (i32, i32) {
    %c0_i32 = arith.constant 0 : i32
    %c0_i32_0 = arith.constant 0 : i32
    %c0_i32_1 = arith.constant 0 : i32
    return %c0_i32, %c0_i32_0 : i32, i32
  }
  func.func @transform_5(%arg0: i32) -> (i32, i32) {
    %c0_i32 = arith.constant 0 : i32
    %c0_i32_0 = arith.constant 0 : i32
    %c0_i32_1 = arith.constant 0 : i32
    return %c0_i32, %c0_i32_0 : i32, i32
  }
  func.func @transform_6(%arg0: i32) -> (i32, i32) {
    %c0_i32 = arith.constant 0 : i32
    %c0_i32_0 = arith.constant 0 : i32
    %c0_i32_1 = arith.constant 0 : i32
    return %c0_i32, %c0_i32_0 : i32, i32
  }
  func.func @transform_7(%arg0: i32) -> (i32, i32) {
    %c0_i32 = arith.constant 0 : i32
    %c0_i32_0 = arith.constant 0 : i32
    %c0_i32_1 = arith.constant 0 : i32
    return %c0_i32, %c0_i32_0 : i32, i32
  }
  func.func @transform_8(%arg0: i32) -> (i32, i32) {
    %c0_i32 = arith.constant 0 : i32
    %c0_i32_0 = arith.constant 0 : i32
    %c0_i32_1 = arith.constant 0 : i32
    return %c0_i32, %c0_i32_0 : i32, i32
  }
  func.func @transform_9(%arg0: i32) -> (i32, i32) {
    %c0_i32 = arith.constant 0 : i32
    %c0_i32_0 = arith.constant 0 : i32
    %c0_i32_1 = arith.constant 0 : i32
    return %c0_i32, %c0_i32_0 : i32, i32
  }
  func.func @transform_10(%arg0: i32) -> (i32, i32) {
    %c0_i32 = arith.constant 0 : i32
    %c0_i32_0 = arith.constant 0 : i32
    %c0_i32_1 = arith.constant 0 : i32
    return %c0_i32, %c0_i32_0 : i32, i32
  }
  func.func @transform_11(%arg0: i32) -> (i32, i32, i32) {
    %c0_i32 = arith.constant 0 : i32
    %c0_i32_0 = arith.constant 0 : i32
    %c0_i32_1 = arith.constant 0 : i32
    return %arg0, %c0_i32, %c0_i32_0 : i32, i32, i32
  }
  func.func @transform_12(%arg0: i32) -> (i32, i32, i32) {
    %c0_i32 = arith.constant 0 : i32
    %c0_i32_0 = arith.constant 0 : i32
    %c0_i32_1 = arith.constant 0 : i32
    return %arg0, %c0_i32, %c0_i32_0 : i32, i32, i32
  }
}

module attributes {stable_mosaic.version = 11 : i64} {
  func.func @_convout_kernel(%arg0: i32, %arg1: memref<1x72x1024xbf16, #tpu.memory_space<vmem>>, %arg2: memref<1x3x1024xf32, #tpu.memory_space<vmem>>, %arg3: memref<3x72xbf16, #tpu.memory_space<vmem>>, %arg4: memref<3x1xf32, #tpu.memory_space<vmem>>, %arg5: memref<1x3x1024xf32, #tpu.memory_space<vmem>>) attributes {dimension_semantics = [#tpu.dimension_semantics<parallel>], iteration_bounds = array<i64: 2>, scalar_prefetch = 0 : i64, scratch_operands = 0 : i64, tpu.core_type = #tpu.core_type<tc>, window_params = [{transform_indices = @transform_0, window_bounds = array<i64: 1, 72, 1024>}, {transform_indices = @transform_1, window_bounds = array<i64: 1, 3, 1024>}, {pipeline_mode = #tpu.pipeline_mode<synchronous>, transform_indices = @transform_2, window_bounds = array<i64: 3, 72>}, {pipeline_mode = #tpu.pipeline_mode<synchronous>, transform_indices = @transform_3, window_bounds = array<i64: 3, 1>}, {transform_indices = @transform_4, window_bounds = array<i64: 1, 3, 1024>}]} {
    %c0 = arith.constant 0 : index
    %c0_0 = arith.constant 0 : index
    %0 = vector.load %arg3[%c0, %c0_0] : memref<3x72xbf16, #tpu.memory_space<vmem>>, vector<3x72xbf16>
    %c0_1 = arith.constant 0 : index
    %c0_2 = arith.constant 0 : index
    %c0_3 = arith.constant 0 : index
    %1 = vector.load %arg1[%c0_1, %c0_2, %c0_3] : memref<1x72x1024xbf16, #tpu.memory_space<vmem>>, vector<1x72x1024xbf16>
    %2 = vector.shape_cast %1 : vector<1x72x1024xbf16> to vector<72x1024xbf16>
    %cst = arith.constant dense<0.000000e+00> : vector<3x1024xf32>
    %3 = tpu.matmul %0, %2, %cst {dimension_numbers = #tpu.dot_dimension_numbers<[1], [0], [0], [1], [0, 0, 1, 1], [], []>} : vector<3x72xbf16>, vector<72x1024xbf16>, vector<3x1024xf32> -> vector<3x1024xf32>
    %c0_4 = arith.constant 0 : index
    %c0_5 = arith.constant 0 : index
    %4 = vector.load %arg4[%c0_4, %c0_5] : memref<3x1xf32, #tpu.memory_space<vmem>>, vector<3x1xf32>
    %5 = vector.broadcast %4 : vector<3x1xf32> to vector<3x1024xf32>
    %6 = arith.addf %3, %5 : vector<3x1024xf32>
    %c0_6 = arith.constant 0 : index
    %c0_7 = arith.constant 0 : index
    %c0_8 = arith.constant 0 : index
    %7 = vector.load %arg2[%c0_6, %c0_7, %c0_8] : memref<1x3x1024xf32, #tpu.memory_space<vmem>>, vector<1x3x1024xf32>
    %8 = vector.shape_cast %7 : vector<1x3x1024xf32> to vector<3x1024xf32>
    %9 = arith.addf %6, %8 : vector<3x1024xf32>
    %c0_9 = arith.constant 0 : index
    %c0_10 = arith.constant 0 : index
    %c0_11 = arith.constant 0 : index
    %10 = vector.load %arg5[%c0_9, %c0_10, %c0_11] : memref<1x3x1024xf32, #tpu.memory_space<vmem>>, vector<1x3x1024xf32>
    %11 = vector.shape_cast %10 : vector<1x3x1024xf32> to vector<3x1024xf32>
    %12 = vector.shape_cast %9 : vector<3x1024xf32> to vector<1x3x1024xf32>
    tpu.vector_store %arg5[%c0_9, %c0_10, %c0_11], %12 {strides = array<i32>} : memref<1x3x1024xf32, #tpu.memory_space<vmem>>, vector<1x3x1024xf32>,
    return
  }
  func.func @transform_0(%arg0: i32) -> (i32, i32, i32) {
    %c0_i32 = arith.constant 0 : i32
    %c0_i32_0 = arith.constant 0 : i32
    %c0_i32_1 = arith.constant 0 : i32
    return %arg0, %c0_i32, %c0_i32_0 : i32, i32, i32
  }
  func.func @transform_1(%arg0: i32) -> (i32, i32, i32) {
    %c0_i32 = arith.constant 0 : i32
    %c0_i32_0 = arith.constant 0 : i32
    %c0_i32_1 = arith.constant 0 : i32
    return %arg0, %c0_i32, %c0_i32_0 : i32, i32, i32
  }
  func.func @transform_2(%arg0: i32) -> (i32, i32) {
    %c0_i32 = arith.constant 0 : i32
    %c0_i32_0 = arith.constant 0 : i32
    %c0_i32_1 = arith.constant 0 : i32
    return %c0_i32, %c0_i32_0 : i32, i32
  }
  func.func @transform_3(%arg0: i32) -> (i32, i32) {
    %c0_i32 = arith.constant 0 : i32
    %c0_i32_0 = arith.constant 0 : i32
    %c0_i32_1 = arith.constant 0 : i32
    return %c0_i32, %c0_i32_0 : i32, i32
  }
  func.func @transform_4(%arg0: i32) -> (i32, i32, i32) {
    %c0_i32 = arith.constant 0 : i32
    %c0_i32_0 = arith.constant 0 : i32
    %c0_i32_1 = arith.constant 0 : i32
    return %arg0, %c0_i32, %c0_i32_0 : i32, i32, i32
  }
}

</mosaic_0001>

<bundles_post_ra>
// kernel: _lambda_.14
= control target key start
LH: loop header
LB: loop body
LE: loop exit
PB: predicated region body
PF: predicated region fallthrough
CT: control target
= control target key end

     0   :  { %12 = vsyncpa [#allocation3], 0  ;;  %s1756_s0 = inlined_call_operand.hbm [shape: f32[2,48,16], index: 0, kind: input, shape index: {}]   ;;  %s1757_s1 = inlined_call_operand.vmem [shape: f32[48,48], index: 1, kind: input, shape index: {}]   ;;  %s1758_s2 = inlined_call_operand.hbm [shape: f32[16,16], index: 2, kind: input, shape index: {}]   ;;  %s1759_s3 = inlined_call_operand.hbm [shape: f32[96,48], index: 3, kind: input, shape index: {}]   ;;  %s1760_s4 = inlined_call_operand.hbm [shape: f32[16,32], index: 4, kind: input, shape index: {}]   ;;  %s1761_s5 = inlined_call_operand.vmem [shape: f32[2,48,16], index: 5, kind: output, shape index: {0}]   ;;  %s1762_s6 = inlined_call_operand.vmem [shape: f32[2,96,32], index: 6, kind: output, shape index: {1}]  }
   0x1   :  { %14 = vsyncpa [#allocation3 + $0x1], 0 }
   0x2   :  { %15 = vsyncpa [#allocation5], 0 }
   0x3   :  { %16 = vsyncpa [#allocation8], 0  ;;  %s1516_s21 = smov 0   ;;  %s1518_s22 = smov 0  }
   0x4   :  { %s1520_s23 = smov 0   ;;  %s1522_s24 = smov 0  }
   0x5 LB: > { %s1535_s25 = sadd.s32 4294967295, %s1473_s24   ;;  %p42_p0 = scmp.ne.s32.totalorder %s1465_s22, %s1461_s21  ;;  %s1473_s24 = sphi %s1522_s24, %s1779_s24   ;;  %s1469_s23 = sphi %s1520_s23, %s1778_s23   ;;  %s1465_s22 = sphi %s1518_s22, %s1777_s22   ;;  %s1461_s21 = sphi %s1516_s21, %s1776_s21  }
   0x6   : > { %p1763_p1 = scmp.eq.s32.totalorder %s1535_s25, 0  ;;  %p1056_p2 = scmp.ge.s32.totalorder %s1473_s24, 1 }
   0x7   : > { %p189_p3 = scmp.lt.s32.totalorder %s1473_s24, 3  ;;  %s1475_s28 = smov [#allocation4]  }
   0x8   : > { %p1543_p4 = por %p1763_p1, %p42_p0  ;;  %s204_s29 = sshll.u32 %s1475_s28, 4  ;;  %s205_s29 = int_to_ptr.vmem [resolvable:$true] %s204_s29 }
   0x9   : > { %p1547_p5 = pnand %p1056_p2, %p189_p3  ;;  %s1476_s7 = smov [#allocation6]  }
   0xa   : > { %s1766_s26 = scalar_select %p1543_p4, 1, 0 }
   0xb   : > { %s1767_s27 = scalar_select %p1547_p5, 1, 0 }
   0xc   : > { %p1267_p6 = pneg %p1547_p5  ;;  %s217_s8 = sshll.u32 %s1476_s7, 4  ;;  %s218_s8 = int_to_ptr.vmem [resolvable:$true] %s217_s8 }
   0xd   : > { %s1477_s9 = smov [#allocation7]   ;;  %s1336_s11 = scalar_lea.vmem %s205_s29, 256 }
   0xe   : > { %p1555_p7 = pnand %p1267_p6, %p1763_p1  ;;  %s230_s10 = sshll.u32 %s1477_s9, 4  ;;  %s231_s10 = int_to_ptr.vmem [resolvable:$true] %s230_s10 }
   0xf   : > { %p1337_p9 = scmp.ne.s32.totalorder %s205_s29, %s1336_s11  ;;  %p1344_p12 = scmp.lt.s32.totalorder %s205_s29, %s205_s29 }
  0x10   : > { %p1327_p8 = pneg %p1555_p7  ;;  %p1345_p13 = scmp.lt.s32.totalorder %s1336_s11, %s1336_s11 }
  0x12   : > { %p1339_p10 = pnand %p1337_p9, %p1327_p8  ;;  %p1346_p0 = por %p1345_p13, %p1344_p12 }
  0x14   : > { %p1340_p11 = pneg %p1339_p10 }
  0x16   : > { %p1347_p2 = pnand %p1346_p0, %p1340_p11 }
  0x18   : > { %1350 = shalt.err (!%p1347_p2)
}
  0x19   : > { %s1478_s12 = smov 128   ;;  %s1479_s13 = smov 8  }
  0x1a   : > { %1270 = dma.hbm_to_vmem [thread:$0]  (!%p1555_p7), %s1758_s2, 256, %s205_s29, [#allocation5], %s1478_s12, %s1478_s12, %s1479_s13  }
  0x1b   : > { %s1362_s16 = scalar_lea.vmem %s218_s8, 1536  ;;  %p1370_p10 = scmp.lt.s32.totalorder %s218_s8, %s218_s8 }
  0x1c   : > { %p1363_p3 = scmp.ne.s32.totalorder %s218_s8, %s1362_s16  ;;  %p1371_p11 = scmp.lt.s32.totalorder %s1362_s16, %s1362_s16 }
  0x1e   : > { %p1365_p6 = pnand %p1363_p3, %p1327_p8  ;;  %p1372_p12 = por %p1371_p11, %p1370_p10 }
  0x20   : > { %p1366_p9 = pneg %p1365_p6 }
  0x22   : > { %p1373_p13 = pnand %p1372_p12, %p1366_p9 }
  0x24   : > { %1376 = shalt.err (!%p1373_p13)
}
  0x25   : > { %1273 = dma.hbm_to_vmem [thread:$0]  (!%p1555_p7), %s1759_s3, 1536, %s218_s8, [#allocation5], %s1478_s12, %s1478_s12, %s1479_s13  }
  0x26   : > { %s1388_s19 = scalar_lea.vmem %s231_s10, 256  ;;  %p1396_p6 = scmp.lt.s32.totalorder %s231_s10, %s231_s10 }
  0x27   : > { %p1389_p0 = scmp.ne.s32.totalorder %s231_s10, %s1388_s19  ;;  %p1397_p9 = scmp.lt.s32.totalorder %s1388_s19, %s1388_s19 }
  0x29   : > { %p1391_p2 = pnand %p1389_p0, %p1327_p8  ;;  %p1398_p10 = por %p1397_p9, %p1396_p6 }
  0x2b   : > { %p1392_p3 = pneg %p1391_p2 }
  0x2d   : > { %p1399_p11 = pnand %p1398_p10, %p1392_p3 }
  0x2f   : > { %1402 = shalt.err (!%p1399_p11)
}
  0x30   : > { %1276 = dma.hbm_to_vmem [thread:$0]  (!%p1555_p7), %s1760_s4, 256, %s231_s10, [#allocation8], %s1478_s12, %s1478_s12, %s1479_s13  }
  0x31   : > { %s1595_s28 = sadd.s32 1, %s1473_s24   ;;  %s29_s30 = sadd.s32 1, %s1469_s23 }
  0x32   : > { %s26_s29 = ssub.s32 %s1473_s24, %s1595_s28  ;;  %p36_p12 = scmp.ne.s32.totalorder %s1469_s23, %s1465_s22 }
  0x33   : > { %p27_p8 = scmp.eq.s32.totalorder %s26_s29, 0  ;;  %p37_p13 = scmp.eq.s32.totalorder %s1473_s24, 0 }
  0x34   : > { %p1284_p0 = scmp.lt.s32.totalorder %s1473_s24, 2  ;;  %s244_s8 = sand.u32 1, %s1469_s23  }
  0x35   : > { %s1605_s7 = scalar_select %p27_p8, %s1469_s23, %s29_s30  }
  0x36   : > { %p38_p2 = por %p37_p13, %p36_p12  ;;  %s1248_s9 = smul.u32 48, %s244_s8 }
  0x37   : > { %s1249_s11 = smul.u32 768, %s1473_s24  ;;  %s1620_s19 = scalar_lea.sflag [#allocation3], %s244_s8 }
  0x38   : > { %p1609_p3 = pnand %p1284_p0, %p38_p2  ;;  %s248_s17 = scalar_lea.vmem [#allocation2], %s1248_s9 }
  0x39   : > { %s1616_s16 = scalar_lea.hbm %s1756_s0, %s1249_s11  ;;  %s255_s18 = sshll.u32 %s248_s17, 4  ;;  %s1618_s18 = int_to_ptr.vmem [resolvable:$true] %s255_s18 }
  0x3a   : > { %s1403_s24 = scalar_lea.hbm %s1616_s16, 768  ;;  %p1405_p6 = pneg %p1609_p3 }
  0x3b   : > { %p1404_p7 = scmp.ne.s32.totalorder %s1616_s16, %s1403_s24  ;;  %s1408_s29 = scalar_lea.hbm %s1756_s0, 1536 }
  0x3c   : > { %p1409_p11 = scmp.lt.s32.totalorder %s1616_s16, %s1756_s0  ;;  %p1410_p8 = scmp.lt.s32.totalorder %s1408_s29, %s1403_s24 }
  0x3d   : > { %p1406_p9 = pnand %p1405_p6, %p1404_p7 }
  0x3e   : > { %p1411_p12 = por %p1410_p8, %p1409_p11 }
  0x3f   : > { %p1407_p10 = pneg %p1406_p9 }
  0x41   : > { %p1412_p13 = pnand %p1411_p12, %p1407_p10 }
  0x43   : > { %1415 = shalt.err (!%p1412_p13)
}
  0x44   : > { %s1416_s8 = scalar_lea.vmem %s1618_s18, 768  ;;  %s1480_s9 = smov [#allocation2]  }
  0x45   : > { %p1417_p0 = scmp.ne.s32.totalorder %s1618_s18, %s1416_s8  ;;  %s1421_s10 = sshll.u32 %s1480_s9, 4  ;;  %s1422_s10 = int_to_ptr.vmem [resolvable:$false] %s1421_s10 }
  0x46   : > { %s1423_s15 = scalar_lea.vmem %s1422_s10, 1536  ;;  %p1424_p9 = scmp.lt.s32.totalorder %s1618_s18, %s1422_s10 }
  0x47   : > { %p1419_p2 = pnand %p1417_p0, %p1405_p6  ;;  %p1425_p1 = scmp.lt.s32.totalorder %s1423_s15, %s1416_s8 }
  0x49   : > { %p1420_p7 = pneg %p1419_p2  ;;  %p1426_p4 = por %p1425_p1, %p1424_p9 }
  0x4b   : > { %p1427_p5 = pnand %p1426_p4, %p1420_p7 }
  0x4d   : > { %1430 = shalt.err (!%p1427_p5)
}
  0x4e   : > { %1280 = dma.hbm_to_vmem [thread:$0]  (!%p1609_p3), %s1616_s16, 768, %s1618_s18, %s1620_s19, %s1478_s12, %s1478_s12, %s1479_s13  }
  0x4f   : > { %p1770_p6 = scmp.ne.s32.totalorder %s1767_s27, 0 }
  0x50   : > { %s269_s17 = sand.u32 (!%p1770_p6), 1, %s1465_s22   ;;  %p1771_p1 = scmp.ne.s32.totalorder (!%p1770_p6), %s1766_s26, 0 }
  0x51   : > { %267 = sbr.rel (%p1770_p6) target bundleno = 726 (0x2d6), region = 40  ;;  %s270_s20 = scalar_lea.sflag (!%p1770_p6), [#allocation3], %s269_s17 }
  0x52   : > { %s1250_s24 = smul.u32 (!%p1770_p6), 48, %s269_s17 }
  0x54   : > { %s273_s21 = scalar_lea.vmem (!%p1770_p6), [#allocation2], %s1250_s24 }
  0x56   : > { %1448 = dma.done.wait (%p1771_p1), %s270_s20, 768  }
  0x57   : > { %1450 = vsyncadd (%p1771_p1), %s270_s20, 4294966528  ;;  %p1772_p4 = scmp.eq.s32.totalorder %s1535_s25, 0 }
  0x59   : > { %1452 = dma.done.wait (%p1772_p4), [#allocation5], 1792   ;;  %p1773_p5 = pmov %p1772_p4 }
  0x5a   : > { %p1774_p3 = pmov %p1772_p4 }
  0x5b   : > { %1454 = vsyncadd (%p1773_p5), [#allocation5], 4294965504 }
  0x5c   : > { %1456 = dma.done.wait (%p1774_p3), [#allocation8], 256   ;;  %p1775_p10 = pmov %p1774_p3 }
  0x5d   : > { %v334_v0 = vld [vmem:[%s273_s21 + $0x28] sm:$0xff]  ;;  %v333_v1 = vld [vmem:[%s273_s21 + $0x20] sm:$0xff]  ;;  %vm341_vm0 = vcmask 392192   ;;  %v332_v2 = vld [vmem:[%s273_s21 + $0x18] sm:$0xff]  ;;  %vm457_vm1 = vcmask 130048   ;;  %p319_p11 = scmp.lt.s32.totalorder %s1535_s25, 1 }
  0x5e   : > { %1458 = vsyncadd (%p1775_p10), [#allocation8], 4294967040  ;;  %1158 = vmatprep.subr.mxu0 %v334_v0  ;;  %v335_v3 = vld [vmem:[%s1757_s1] sm:$0xff]  ;;  %v456_v5 = vld [vmem:[#allocation4 + $0x8] sm:$0xff]  ;;  %vm913_vm2 = vcmask 261120  }
  0x5f   : > { %1159 = vmatpush3.msra.mxu0 %v334_v0  ;;  %1170 = vmatprep.mubr.msk.f32.mxu0 %vm341_vm0, %v335_v3  ;;  %v331_v4 = vld [vmem:[%s273_s21 + $0x10] sm:$0xff]  ;;  %v330_v6 = vld [vmem:[%s273_s21 + $0x8] sm:$0xff]  ;;  %v329_v7 = vld [vmem:[%s273_s21] sm:$0xff]  ;;  %s1781_s25 = smov (!%p319_p11, %s1535_s25), 1 }
  0x60   : > { %1160 = vmatprep.subr.mxu0 %v333_v1  ;;  %1179 = vmatprep.subr.mxu1 %v456_v5  ;;  %v336_v8 = vld [vmem:[%s1757_s1 + $0x8] sm:$0xff]  ;;  %v337_v9 = vld [vmem:[%s1757_s1 + $0x10] sm:$0xff]  ;;  %v338_v10 = vld [vmem:[%s1757_s1 + $0x18] sm:$0xff]  ;;  %s1251_s9 = smul.u32 48, %s1781_s25 }
  0x61   : > { %1161 = vmatpush3.msra.mxu0 %v333_v1  ;;  %1180 = vmatpush3.msra.mxu1 %v456_v5  ;;  %v339_v11 = vld [vmem:[%s1757_s1 + $0x20] sm:$0xff]  ;;  %v340_v12 = vld [vmem:[%s1757_s1 + $0x28] sm:$0xff]  ;;  %v577_v20 = vld [vmem:[#allocation6] sm:$0xff]  ;;  %s1252_s24 = smul.u32 96, %s1781_s25 }
  0x62   : > { %1162 = vmatprep.subr.mxu0 %v332_v2  ;;  %v455_v13 = vld [vmem:[#allocation4] sm:$0xff]  ;;  %v578_v21 = vld [vmem:[#allocation6 + $0x8] sm:$0xff]  ;;  %v580_v23 = vld [vmem:[#allocation6 + $0x18] sm:$0xff]  ;;  %s323_s17 = scalar_lea.vmem %s1761_s5, %s1251_s9 }
  0x63   : > { %1163 = vmatpush3.msra.mxu0 %v332_v2  ;;  %1181 = vmatprep.subr.mxu1 %v455_v13  ;;  %v579_v22 = vld [vmem:[#allocation6 + $0x10] sm:$0xff]  ;;  %v581_v24 = vld [vmem:[#allocation6 + $0x20] sm:$0xff]  ;;  %v582_v25 = vld [vmem:[#allocation6 + $0x28] sm:$0xff]  ;;  %s328_s26 = scalar_lea.vmem %s1762_s6, %s1252_s24 }
  0x64   : > { %1164 = vmatprep.subr.mxu0 %v331_v4  ;;  %1182 = vmatpush3.msra.mxu1 %v455_v13  ;;  %v583_v26 = vld [vmem:[#allocation6 + $0x30] sm:$0xff]  ;;  %v584_v27 = vld [vmem:[#allocation6 + $0x38] sm:$0xff]  ;;  %v585_v28 = vld [vmem:[#allocation6 + $0x40] sm:$0xff] }
  0x65   : > { %1165 = vmatpush3.msra.mxu0 %v331_v4  ;;  %1192 = vmatprep.subr.mxu1 %v334_v0  ;;  %v586_v29 = vld [vmem:[#allocation6 + $0x48] sm:$0xff]  ;;  %v587_v30 = vld [vmem:[#allocation6 + $0x50] sm:$0xff]  ;;  %v588_v31 = vld [vmem:[#allocation6 + $0x58] sm:$0xff] }
  0x66   : > { %1166 = vmatprep.subr.mxu0 %v330_v6  ;;  %v751_v32 = vld [vmem:[#allocation7 + $0x8] sm:$0xff]  ;;  %v750_v33 = vld [vmem:[#allocation7] sm:$0xff] }
  0x67   : > { %1167 = vmatpush3.msra.mxu0 %v330_v6 }
  0x68   : > { %1168 = vmatprep.subr.mxu0 %v329_v7 }
  0x69   : > { %1169 = vmatpush3.msra.mxu0 %v329_v7 }
  0x6a   : > { %1171 = vmatmul.mubr.msk.f32.vlgmr.msra.gmra.mxu0 %vm341_vm0, %v336_v8  ;;  %1222 = vmatprep.subr.mxu0 %v751_v32 }
  0x6b   : > { %1173 = vmatprep.mubr.msk.f32.mxu0 %vm341_vm0, %v337_v9  ;;  %1223 = vmatpush3.msra.mxu0 %v751_v32 }
  0x6c   : > { %1224 = vmatprep.subr.mxu0 %v750_v33 }
  0x6d   : > { %1225 = vmatpush3.msra.mxu0 %v750_v33 }
  0x6e   : > { %1174 = vmatmul.mubr.msk.f32.gmra.mxu0 %vm341_vm0, %v338_v10 }
  0x6f   : > { %1176 = vmatprep.mubr.msk.f32.mxu0 %vm341_vm0, %v339_v11 }
  0x72   : > { %1177 = vmatmul.mubr.msk.f32.gmra.mxu0 %vm341_vm0, %v340_v12 }
 0x12a   : > { %v1172_v14 = vpop.f32.mrf.mxu0 }
 0x12c   : > { %v426_v15 = vpop.f32.mrf.mxu0 }
 0x12d   : > { %1183 = vmatprep.mubr.msk.f32.mxu1 %vm457_vm1, %v426_v15 }
 0x12e   : > { %v1175_v16 = vpop.f32.mrf.mxu0  ;;  %1184 = vmatmul.mubr.msk.f32.vlgmr.msra.gmra.mxu1 %vm457_vm1, %v1172_v14 }
 0x12f   : > { %1193 = vmatpush3.msra.mxu1 %v334_v0 }
 0x130   : > { %1194 = vmatprep.subr.mxu1 %v333_v1  ;;  %v436_v17 = vpop.f32.mrf.mxu0 }
 0x131   : > { %1195 = vmatpush3.msra.mxu1 %v333_v1  ;;  %1186 = vmatprep.mubr.msk.f32.mxu1 %vm457_vm1, %v436_v17 }
 0x132   : > { %1196 = vmatprep.subr.mxu1 %v332_v2  ;;  %v1178_v18 = vpop.f32.mrf.mxu0  ;;  %1187 = vmatmul.mubr.msk.f32.gmra.mxu1 %vm457_vm1, %v1175_v16 }
 0x133   : > { %1197 = vmatpush3.msra.mxu1 %v332_v2 }
 0x134   : > { %1198 = vmatprep.subr.mxu1 %v331_v4  ;;  %v446_v19 = vpop.f32.mrf.mxu0 }
 0x135   : > { %1199 = vmatpush3.msra.mxu1 %v331_v4  ;;  %1189 = vmatprep.mubr.msk.f32.mxu1 %vm457_vm1, %v446_v19 }
 0x136   : > { %1200 = vmatprep.subr.mxu1 %v330_v6  ;;  %1190 = vmatmul.mubr.msk.f32.gmra.mxu1 %vm457_vm1, %v1178_v18 }
 0x137   : > { %1201 = vmatpush3.msra.mxu1 %v330_v6  ;;  %1204 = vmatprep.mubr.msk.f32.mxu1 %vm341_vm0, %v577_v20 }
 0x138   : > { %1202 = vmatprep.subr.mxu1 %v329_v7 }
 0x139   : > { %1203 = vmatpush3.msra.mxu1 %v329_v7 }
 0x13a   : > { %1205 = vmatmul.mubr.msk.f32.vlgmr.msra.gmra.mxu1 %vm341_vm0, %v578_v21  ;;  %1244 = vmatprep.subr.mxu1 %v751_v32 }
 0x13b   : > { %1207 = vmatprep.mubr.msk.f32.mxu1 %vm341_vm0, %v579_v22  ;;  %1246 = vmatpush3.msra.mxu1 %v751_v32 }
 0x13c   : > { %1245 = vmatprep.subr.mxu1 %v750_v33 }
 0x13d   : > { %1247 = vmatpush3.msra.mxu1 %v750_v33 }
 0x13e   : > { %1208 = vmatmul.mubr.msk.f32.gmra.mxu1 %vm341_vm0, %v580_v23 }
 0x13f   : > { %1210 = vmatprep.mubr.msk.f32.mxu1 %vm341_vm0, %v581_v24 }
 0x142   : > { %1211 = vmatmul.mubr.msk.f32.gmra.mxu1 %vm341_vm0, %v582_v25 }
 0x143   : > { %1213 = vmatprep.mubr.msk.f32.mxu1 %vm341_vm0, %v583_v26 }
 0x146   : > { %1214 = vmatmul.mubr.msk.f32.gmra.mxu1 %vm341_vm0, %v584_v27 }
 0x147   : > { %1216 = vmatprep.mubr.msk.f32.mxu1 %vm341_vm0, %v585_v28 }
 0x14a   : > { %1217 = vmatmul.mubr.msk.f32.gmra.mxu1 %vm341_vm0, %v586_v29 }
 0x14b   : > { %1219 = vmatprep.mubr.msk.f32.mxu1 %vm341_vm0, %v587_v30 }
 0x14e   : > { %1220 = vmatmul.mubr.msk.f32.gmra.mxu1 %vm341_vm0, %v588_v31 }
 0x1ee   : > { %v1185_v34 = vpop.f32.mrf.mxu1 }
 0x1ef   : > { %572 = vst.msk [vmem:[%s323_s17 + $0x8] sm:$0xff] %vm457_vm1, %v1185_v34 }
 0x1f0   : > { %v542_v35 = vpop.f32.mrf.mxu1 }
 0x1f1   : > { %571 = vst.msk [vmem:[%s323_s17] sm:$0xff] %vm457_vm1, %v542_v35 }
 0x1f2   : > { %v1188_v36 = vpop.f32.mrf.mxu1 }
 0x1f3   : > { %574 = vst.msk [vmem:[%s323_s17 + $0x18] sm:$0xff] %vm457_vm1, %v1188_v36 }
 0x1f4   : > { %v552_v37 = vpop.f32.mrf.mxu1 }
 0x1f5   : > { %573 = vst.msk [vmem:[%s323_s17 + $0x10] sm:$0xff] %vm457_vm1, %v552_v37 }
 0x1f6   : > { %v1191_v38 = vpop.f32.mrf.mxu1 }
 0x1f7   : > { %576 = vst.msk [vmem:[%s323_s17 + $0x28] sm:$0xff] %vm457_vm1, %v1191_v38 }
 0x1f8   : > { %v562_v39 = vpop.f32.mrf.mxu1 }
 0x1f9   : > { %575 = vst.msk [vmem:[%s323_s17 + $0x20] sm:$0xff] %vm457_vm1, %v562_v39 }
 0x1fa   : > { %v1206_v40 = vpop.f32.mrf.mxu1 }
 0x1fc   : > { %v691_v41 = vpop.f32.mrf.mxu1 }
 0x1fd   : > { %1226 = vmatprep.mubr.msk.f32.mxu0 %vm457_vm1, %v691_v41 }
 0x1fe   : > { %v1209_v42 = vpop.f32.mrf.mxu1  ;;  %1227 = vmatmul.mubr.msk.f32.vlgmr.msra.gmra.mxu0 %vm457_vm1, %v1206_v40 }
 0x200   : > { %v701_v43 = vpop.f32.mrf.mxu1 }
 0x201   : > { %1229 = vmatprep.mubr.msk.f32.mxu0 %vm457_vm1, %v701_v43 }
 0x202   : > { %v1212_v44 = vpop.f32.mrf.mxu1  ;;  %1230 = vmatmul.mubr.msk.f32.gmra.mxu0 %vm457_vm1, %v1209_v42 }
 0x204   : > { %v711_v45 = vpop.f32.mrf.mxu1 }
 0x205   : > { %1232 = vmatprep.mubr.msk.f32.mxu0 %vm457_vm1, %v711_v45 }
 0x206   : > { %v1215_v46 = vpop.f32.mrf.mxu1  ;;  %1233 = vmatmul.mubr.msk.f32.gmra.mxu0 %vm457_vm1, %v1212_v44 }
 0x208   : > { %v721_v47 = vpop.f32.mrf.mxu1 }
 0x209   : > { %1235 = vmatprep.mubr.msk.f32.mxu0 %vm457_vm1, %v721_v47 }
 0x20a   : > { %v1218_v48 = vpop.f32.mrf.mxu1  ;;  %1236 = vmatmul.mubr.msk.f32.gmra.mxu0 %vm457_vm1, %v1215_v46 }
 0x20c   : > { %v731_v49 = vpop.f32.mrf.mxu1 }
 0x20d   : > { %1238 = vmatprep.mubr.msk.f32.mxu0 %vm457_vm1, %v731_v49 }
 0x20e   : > { %v1221_v50 = vpop.f32.mrf.mxu1  ;;  %1239 = vmatmul.mubr.msk.f32.gmra.mxu0 %vm457_vm1, %v1218_v48 }
 0x210   : > { %v741_v51 = vpop.f32.mrf.mxu1 }
 0x211   : > { %1241 = vmatprep.mubr.msk.f32.mxu1 %vm457_vm1, %v741_v51 }
 0x212   : > { %1242 = vmatmul.mubr.msk.f32.vlgmr.msra.gmra.mxu1 %vm457_vm1, %v1221_v50 }
 0x2be   : > { %v1228_v52 = vpop.f32.mrf.mxu0 }
 0x2bf   : > { %915 = vst.msk [vmem:[%s328_s26 + $0x8] sm:$0xff] %vm913_vm2, %v1228_v52 }
 0x2c0   : > { %v854_v53 = vpop.f32.mrf.mxu0 }
 0x2c1   : > { %914 = vst.msk [vmem:[%s328_s26] sm:$0xff] %vm913_vm2, %v854_v53 }
 0x2c2   : > { %v1231_v54 = vpop.f32.mrf.mxu0 }
 0x2c3   : > { %917 = vst.msk [vmem:[%s328_s26 + $0x18] sm:$0xff] %vm913_vm2, %v1231_v54 }
 0x2c4   : > { %v864_v55 = vpop.f32.mrf.mxu0 }
 0x2c5   : > { %916 = vst.msk [vmem:[%s328_s26 + $0x10] sm:$0xff] %vm913_vm2, %v864_v55 }
 0x2c6   : > { %v1234_v56 = vpop.f32.mrf.mxu0 }
 0x2c7   : > { %919 = vst.msk [vmem:[%s328_s26 + $0x28] sm:$0xff] %vm913_vm2, %v1234_v56 }
 0x2c8   : > { %v874_v57 = vpop.f32.mrf.mxu0 }
 0x2c9   : > { %918 = vst.msk [vmem:[%s328_s26 + $0x20] sm:$0xff] %vm913_vm2, %v874_v57 }
 0x2ca   : > { %v1237_v58 = vpop.f32.mrf.mxu0 }
 0x2cb   : > { %921 = vst.msk [vmem:[%s328_s26 + $0x38] sm:$0xff] %vm913_vm2, %v1237_v58 }
 0x2cc   : > { %v884_v59 = vpop.f32.mrf.mxu0 }
 0x2cd   : > { %920 = vst.msk [vmem:[%s328_s26 + $0x30] sm:$0xff] %vm913_vm2, %v884_v59 }
 0x2ce   : > { %v1240_v60 = vpop.f32.mrf.mxu0 }
 0x2cf   : > { %923 = vst.msk [vmem:[%s328_s26 + $0x48] sm:$0xff] %vm913_vm2, %v1240_v60 }
 0x2d0   : > { %v894_v61 = vpop.f32.mrf.mxu0 }
 0x2d1   : > { %922 = vst.msk [vmem:[%s328_s26 + $0x40] sm:$0xff] %vm913_vm2, %v894_v61 }
 0x2d2   : > { %v1243_v62 = vpop.f32.mrf.mxu1 }
 0x2d3   : > { %925 = vst.msk [vmem:[%s328_s26 + $0x58] sm:$0xff] %vm913_vm2, %v1243_v62 }
 0x2d4   : > { %v904_v63 = vpop.f32.mrf.mxu1 }
 0x2d5   : > { %924 = vst.msk [vmem:[%s328_s26 + $0x50] sm:$0xff] %vm913_vm2, %v904_v63 }
 0x2d6 PF: > { %p19_p8 = scmp.ge.s32.totalorder %s1595_s28, 4   ;;  %s1776_s21 = smov %s1465_s22 }
 0x2d7   : > { %s1777_s22 = smov %s1469_s23  ;;  %s1778_s23 = smov %s1605_s7 }
 0x2d8   : > { %s1779_s24 = smov %s1595_s28  ;;  %21 = sbr.rel (!%p19_p8) target bundleno = 5 (0x5), region = 104 }
 0x2dd   :  { %963 = vsyncpa [#allocation3], 1 }
 0x2de   :  { %965 = vsyncpa [#allocation3 + $0x1], 1 }
 0x2df   :  { %966 = vsyncpa [#allocation5], 1 }
 0x2e0   :  { %967 = vsyncpa [#allocation8], 1 }

// kernel: _lambda_.15
= control target key start
LH: loop header
LB: loop body
LE: loop exit
PB: predicated region body
PF: predicated region fallthrough
CT: control target
= control target key end

     0   :  { %s1051_s30 = smov 0   ;;  %s1169_s0 = inlined_call_operand.vmem [shape: bf16[2,27,256], index: 0, kind: input, shape index: {}]   ;;  %s1170_s1 = inlined_call_operand.vmem [shape: bf16[2,27,256], index: 1, kind: input, shape index: {}]   ;;  %s1171_s2 = inlined_call_operand.vmem [shape: bf16[32,27], index: 2, kind: input, shape index: {}]   ;;  %s1172_s3 = inlined_call_operand.vmem [shape: f32[32,1], index: 3, kind: input, shape index: {}]   ;;  %s1173_s4 = inlined_call_operand.vmem [shape: bf16[8,32], index: 4, kind: input, shape index: {}]   ;;  %s1174_s5 = inlined_call_operand.vmem [shape: f32[8,1], index: 5, kind: input, shape index: {}]   ;;  %s1175_s6 = inlined_call_operand.vmem [shape: bf16[8,8], index: 6, kind: input, shape index: {}]   ;;  %s1176_s7 = inlined_call_operand.vmem [shape: f32[8,1], index: 7, kind: input, shape index: {}]   ;;  %s1177_s8 = inlined_call_operand.vmem [shape: bf16[2,8,256], index: 8, kind: output, shape index: {0}]   ;;  %s1178_s9 = inlined_call_operand.vmem [shape: bf16[2,8,256], index: 9, kind: output, shape index: {1}]  }
   0x1 LB: > { %s924_s10 = sadd.s32 4294967295, %s997_s30   ;;  %p928_p0 = scmp.ge.s32.totalorder %s997_s30, 1  ;;  %s997_s30 = sphi %s1051_s30, %s20_s30  }
   0x2   : > { %p300_p1 = scmp.lt.s32.totalorder %s997_s30, 3 }
   0x4   : > { %p301_p2 = pnand %p928_p0, %p300_p1 }
   0x5   : > { %p346_p3 = scmp.lt.s32.totalorder (!%p301_p2), %s924_s10, 1 }
   0x6   : > { %304 = sbr.rel (%p301_p2) target bundleno = 660 (0x294), region = 52 }
   0xb   : > { %vm434_vm0 = vcmask 1044480   ;;  %vm435_vm1 = vcmask 1045504   ;;  %v999_v0 = vmov 0   ;;  %s1180_s10 = smov (!%p346_p3, %s924_s10), 1  ;;  %v1000_v1 = vmov 65535   ;;  %v375_v3 = vld [vmem:[%s1172_s3] sm:$0xff] }
   0xc   : > { %476 = vmatprep.mubr.bf16.mxu0 %v999_v0  ;;  %585 = vmatprep.mubr.bf16.mxu1 %v999_v0  ;;  %v436_v2 = vsel %vm434_vm0, 4294967295, %v1000_v1  ;;  %v377_v4 = vld [vmem:[%s1172_s3 + $0x10] sm:$0xff]  ;;  %s959_s15 = sshll.u32 %s1180_s10, 5  ;;  %v376_v6 = vld [vmem:[%s1172_s3 + $0x8] sm:$0xff]  ;;  %v378_v7 = vld [vmem:[%s1172_s3 + $0x18] sm:$0xff]  ;;  %vm427_vm2 = vcmask 220160  }
   0xd   : > { %976 = vset.pattern.permute.xlu1 %v999_v0  ;;  %975 = vset.pattern.permute.xlu0 %v999_v0  ;;  %s350_s18 = scalar_lea.vmem %s1169_s0, %s959_s15  ;;  %v437_v5 = vsel %vm435_vm1, %v436_v2, 0  ;;  %s355_s21 = scalar_lea.vmem %s1170_s1, %s959_s15  ;;  %v635_v18 = vld [vmem:[%s1174_s5] sm:$0xff]  ;;  %v990_v23 = vld [vmem:[%s1171_s2 + $0x8] sm:$0xff]  }
   0xe   : > { %381 = vperm.xlu1 %976, %v375_v3   ;;  %391 = vperm.xlu0 %975, %v377_v4   ;;  %v977_v8 = vld [vmem:[%s350_s18 + $0x14] ss:$8 sps:$4 sm:$0x3f]   ;;  %v981_v11 = vld [vmem:[%s350_s18 + $0x10] ss:$8 sps:$4 sm:$0x3f]  }
   0xf   : > { %v979_v9 = vld [vmem:[%s355_s21 + $0x14] ss:$8 sps:$4 sm:$0x3f]   ;;  %v442_v10 = vand.u32 %v977_v8, %v437_v5  ;;  %v982_v12 = vld [vmem:[%s355_s21 + $0x10] ss:$8 sps:$4 sm:$0x3f]   ;;  %v439_v15 = vand.u32 %v981_v11, %v437_v5 }
  0x10   : > { %v551_v13 = vand.u32 %v979_v9, %v437_v5  ;;  %v983_v14 = vld [vmem:[%s350_s18 + $0x4] ss:$8 sps:$4 sm:$0xff]   ;;  %v548_v16 = vand.u32 %v982_v12, %v437_v5  ;;  %v987_v20 = vld [vmem:[%s350_s18] ss:$8 sps:$4 sm:$0xff]   ;;  %s961_s17 = sshll.u32 %s1180_s10, 3 }
  0x11   : > { %456 = vmatprep.subr.bf16.mxu0 %v442_v10  ;;  %v985_v17 = vld [vmem:[%s355_s21 + $0x4] ss:$8 sps:$4 sm:$0xff]   ;;  %v988_v21 = vld [vmem:[%s355_s21] ss:$8 sps:$4 sm:$0xff]   ;;  %s360_s20 = scalar_lea.vmem %s1177_s8, %s961_s17  ;;  %s365_s24 = scalar_lea.vmem %s1178_s9, %s961_s17 }
  0x12   : > { %386 = vperm.xlu1 %976, %v376_v6   ;;  %396 = vperm.xlu0 %975, %v378_v7   ;;  %v751_v19 = vld [vmem:[%s1176_s7] sm:$0xff] }
  0x13   : > { %565 = vmatprep.subr.bf16.mxu1 %v551_v13  ;;  %457 = vmatpush1.bf16.msra.mxu0 %v439_v15  ;;  %v989_v22 = vld [vmem:[%s1171_s2] sm:$0xff]  }
  0x14   : > { %566 = vmatpush1.bf16.msra.mxu1 %v548_v16  ;;  %458 = vmatprep.subr.bf16.mxu0 %v983_v14 }
  0x15   : > { %567 = vmatprep.subr.bf16.mxu1 %v985_v17 }
  0x16   : > { %638 = vperm.xlu0 %975, %v635_v18   ;;  %754 = vperm.xlu1 %976, %v751_v19  }
  0x17   : > { %459 = vmatpush1.bf16.msra.mxu0 %v987_v20 }
  0x18   : > { %568 = vmatpush1.bf16.msra.mxu1 %v988_v21 }
  0x1a   : > { %943 = vmatmul.mubr.msk.bf16.vlgmr.msra.gmra.mxu0 %vm427_vm2, %v989_v22 }
  0x1b   : > { %949 = vmatmul.mubr.msk.bf16.vlgmr.msra.gmra.mxu1 %vm427_vm2, %v989_v22  ;;  %486 = vmatprep.mubr.bf16.mxu0 %v999_v0 }
  0x1c   : > { %595 = vmatprep.mubr.bf16.mxu1 %v999_v0 }
  0x22   : > { %944 = vmatmul.mubr.msk.bf16.gmra.mxu0 %vm427_vm2, %v990_v23 }
  0x23   : > { %950 = vmatmul.mubr.msk.bf16.gmra.mxu1 %vm427_vm2, %v990_v23  ;;  %677 = vmatprep.mubr.bf16.mxu0 %v999_v0 }
  0x24   : > { %724 = vmatprep.mubr.bf16.mxu1 %v999_v0 }
  0x89   : > { %v382_v24 = vpop.permute.xlu1 %381  ;;  %v392_v31 = vpop.permute.xlu0 %391 }
  0x8d   : > { %v387_v32 = vpop.permute.xlu1 %386  ;;  %v397_v52 = vpop.permute.xlu0 %396 }
  0xda   : > { %v478_v25 = vpop.f32.mrf.mxu0 }
  0xdb   : > { %v587_v26 = vpop.f32.mrf.mxu1  ;;  %v1100_v33 = vadd.f32 %v478_v25, %v382_v24 }
  0xdc   : > { %v480_v27 = vpop.f32.mrf.mxu0  ;;  %v1102_v34 = vadd.f32 %v587_v26, %v382_v24 }
  0xdd   : > { %v589_v28 = vpop.f32.mrf.mxu1  ;;  %v1104_v37 = vadd.f32 %v480_v27, %v382_v24  ;;  %v1113_v44 = vmul.f32 0.2, %v1100_v33  ;;  %vm497_vm8 = vcmp.ge.f32.partialorder %v1100_v33, 0.0 }
  0xde   : > { %v482_v29 = vpop.f32.mrf.mxu0  ;;  %v1106_v38 = vadd.f32 %v589_v28, %v382_v24  ;;  %v1116_v45 = vmul.f32 0.2, %v1102_v34  ;;  %vm606_vm11 = vcmp.ge.f32.partialorder %v1102_v34, 0.0 }
  0xdf   : > { %v591_v30 = vpop.f32.mrf.mxu1  ;;  %v1108_v39 = vadd.f32 %v482_v29, %v387_v32  ;;  %vm498_vm3 = vcmp.ge.f32.partialorder %v1104_v37, 0.0  ;;  %v506_v50 = vmul.f32 0.2, %v1104_v37 }
  0xe0   : > { %v484_v35 = vpop.f32.mrf.mxu0  ;;  %v1110_v40 = vadd.f32 %v591_v30, %v387_v32  ;;  %v615_v51 = vmul.f32 0.2, %v1106_v38  ;;  %vm607_vm4 = vcmp.ge.f32.partialorder %v1106_v38, 0.0 }
  0xe1   : > { %v593_v36 = vpop.f32.mrf.mxu1  ;;  %v485_v43 = vadd.f32 %v484_v35, %v387_v32  ;;  %vm499_vm5 = vcmp.ge.f32.partialorder %v1108_v39, 0.0  ;;  %v507_v53 = vmul.f32 0.2, %v1108_v39  ;;  %v514_v26 = vsel %vm498_vm3, %v1104_v37, %v506_v50 }
  0xe2   : > { %v488_v41 = vpop.f32.mrf.mxu0  ;;  %v594_v46 = vadd.f32 %v593_v36, %v387_v32  ;;  %v616_v54 = vmul.f32 0.2, %v1110_v40  ;;  %vm608_vm6 = vcmp.ge.f32.partialorder %v1110_v40, 0.0  ;;  %v623_v30 = vsel %vm607_vm4, %v1106_v38, %v615_v51 }
  0xe3   : > { %v597_v42 = vpop.f32.mrf.mxu1  ;;  %v489_v47 = vadd.f32 %v488_v41, %v392_v31  ;;  %vm500_vm7 = vcmp.ge.f32.partialorder %v485_v43, 0.0  ;;  %v508_v62 = vmul.f32 0.2, %v485_v43  ;;  %v515_v27 = vsel %vm499_vm5, %v1108_v39, %v507_v53  ;;  %v634_v39 = vld [vmem:[%s1173_s4] sm:$0xf] }
  0xe4   : > { %v490_v48 = vpop.f32.mrf.mxu0  ;;  %v598_v55 = vadd.f32 %v597_v42, %v392_v31  ;;  %vm609_vm9 = vcmp.ge.f32.partialorder %v594_v46, 0.0  ;;  %v617_v63 = vmul.f32 0.2, %v594_v46  ;;  %v513_v35 = vsel %vm497_vm8, %v1100_v33, %v1113_v44  ;;  %v639_v33 = vpop.permute.xlu0 %638 }
  0xe5   : > { %v599_v49 = vpop.f32.mrf.mxu1  ;;  %v491_v56 = vadd.f32 %v490_v48, %v392_v31  ;;  %vm501_vm10 = vcmp.ge.f32.partialorder %v489_v47, 0.0  ;;  %v509_v3 = vmul.f32 0.2, %v489_v47  ;;  %v516_v18 = vsel %vm500_vm7, %v485_v43, %v508_v62 }
  0xe6   : > { %v492_v57 = vpop.f32.mrf.mxu0  ;;  %v600_v59 = vadd.f32 %v599_v49, %v392_v31  ;;  %vm610_vm13 = vcmp.ge.f32.partialorder %v598_v55, 0.0  ;;  %v618_v10 = vmul.f32 0.2, %v598_v55  ;;  %v625_v22 = vsel %vm609_vm9, %v594_v46, %v617_v63 }
  0xe7   : > { %v601_v58 = vpop.f32.mrf.mxu1  ;;  %v493_v60 = vadd.f32 %v492_v57, %v397_v52  ;;  %v510_v4 = vmul.f32 0.2, %v491_v56  ;;  %vm502_vm14 = vcmp.ge.f32.partialorder %v491_v56, 0.0  ;;  %v517_v12 = vsel %vm501_vm10, %v489_v47, %v509_v3 }
  0xe8   : > { %v602_v61 = vadd.f32 %v601_v58, %v397_v52  ;;  %v494_v1 = vpop.f32.mrf.mxu0  ;;  %v619_v9 = vmul.f32 0.2, %v600_v59  ;;  %vm611_vm0 = vcmp.ge.f32.partialorder %v600_v59, 0.0  ;;  %v626_v23 = vsel %vm610_vm13, %v598_v55, %v618_v10 }
  0xe9   : > { %v603_v2 = vpop.f32.mrf.mxu1  ;;  %v511_v5 = vmul.f32 0.2, %v493_v60  ;;  %vm503_vm12 = vcmp.ge.f32.partialorder %v493_v60, 0.0  ;;  %v495_v7 = vadd.f32 %v494_v1, %v397_v52  ;;  %v518_v16 = vsel %vm502_vm14, %v491_v56, %v510_v4  ;;  %v750_v1 = vld [vmem:[%s1175_s6] sm:$0xf] }
  0xea   : > { %v620_v6 = vmul.f32 0.2, %v602_v61  ;;  %v604_v8 = vadd.f32 %v603_v2, %v397_v52  ;;  %vm612_vm15 = vcmp.ge.f32.partialorder %v602_v61, 0.0  ;;  %v627_v20 = vsel %vm611_vm0, %v600_v59, %v619_v9  ;;  %v755_v2 = vpop.permute.xlu1 %754 }
  0xeb   : > { %vm504_vm1 = vcmp.ge.f32.partialorder %v495_v7, 0.0  ;;  %v512_v11 = vmul.f32 0.2, %v495_v7  ;;  %v519_v13 = vsel %vm503_vm12, %v493_v60, %v511_v5  ;;  %v522_v29 = vpack.c.bf16 %v516_v18, %v514_v26 }
  0xec   : > { %vm613_vm2 = vcmp.ge.f32.partialorder %v604_v8, 0.0  ;;  %v621_v14 = vmul.f32 0.2, %v604_v8  ;;  %v628_v15 = vsel %vm612_vm15, %v602_v61, %v620_v6  ;;  %v523_v24 = vpack.c.bf16 %v519_v13, %v517_v12 }
  0xed   : > { %v520_v17 = vsel %vm504_vm1, %v495_v7, %v512_v11  ;;  %v632_v28 = vpack.c.bf16 %v628_v15, %v626_v23  ;;  %v624_v31 = vsel %vm608_vm6, %v1110_v40, %v616_v54  ;;  %v631_v32 = vpack.c.bf16 %v625_v22, %v623_v30 }
  0xee   : > { %v524_v19 = vpack.c.bf16 %v520_v17, %v518_v16  ;;  %v629_v21 = vsel %vm613_vm2, %v604_v8, %v621_v14  ;;  %v622_v36 = vsel %vm606_vm11, %v1102_v34, %v1116_v45  ;;  %v521_v37 = vpack.c.bf16 %v515_v27, %v513_v35 }
  0xef   : > { %v633_v25 = vpack.c.bf16 %v629_v21, %v627_v20  ;;  %v630_v38 = vpack.c.bf16 %v624_v31, %v622_v36  ;;  %vm641_vm3 = vcmask 261120   ;;  %vm761_vm8 = vcmask 1043456  }
  0xf0   : > { %657 = vmatprep.subr.bf16.mxu0 %v524_v19  ;;  %vm757_vm9 = vcmask 64512  }
  0xf1   : > { %704 = vmatprep.subr.bf16.mxu1 %v633_v25  ;;  %658 = vmatpush1.bf16.msra.mxu0 %v523_v24 }
  0xf2   : > { %705 = vmatpush1.bf16.msra.mxu1 %v632_v28  ;;  %659 = vmatprep.subr.bf16.mxu0 %v522_v29 }
  0xf3   : > { %706 = vmatprep.subr.bf16.mxu1 %v631_v32 }
  0xf5   : > { %660 = vmatpush1.bf16.msra.mxu0 %v521_v37 }
  0xf6   : > { %707 = vmatpush1.bf16.msra.mxu1 %v630_v38 }
  0xf8   : > { %951 = vmatmul.mubr.msk.bf16.vlgmr.msra.gmra.mxu0 %vm641_vm3, %v634_v39 }
  0xf9   : > { %952 = vmatmul.mubr.msk.bf16.vlgmr.msra.gmra.mxu1 %vm641_vm3, %v634_v39  ;;  %800 = vmatprep.mubr.bf16.mxu0 %v999_v0 }
 0x1b8   : > { %v679_v40 = vpop.f32.mrf.mxu0 }
 0x1b9   : > { %v680_v41 = vadd.f32 %v679_v40, %v639_v33  ;;  %v726_v42 = vpop.f32.mrf.mxu1 }
 0x1ba   : > { %v727_v43 = vadd.f32 %v726_v42, %v639_v33  ;;  %v681_v34 = vpop.f32.mrf.mxu0 }
 0x1bb   : > { %vm686_vm4 = vcmp.ge.f32.partialorder %v680_v41, 0.0  ;;  %v688_v44 = vmul.f32 0.2, %v680_v41  ;;  %v682_v45 = vadd.f32 %v681_v34, %v639_v33  ;;  %v728_v46 = vpop.f32.mrf.mxu1 }
 0x1bc   : > { %vm733_vm5 = vcmp.ge.f32.partialorder %v727_v43, 0.0  ;;  %v735_v47 = vmul.f32 0.2, %v727_v43  ;;  %v729_v48 = vadd.f32 %v728_v46, %v639_v33  ;;  %v683_v49 = vpop.f32.mrf.mxu0 }
 0x1bd   : > { %v690_v50 = vsel %vm686_vm4, %v680_v41, %v688_v44  ;;  %vm687_vm6 = vcmp.ge.f32.partialorder %v682_v45, 0.0  ;;  %v689_v51 = vmul.f32 0.2, %v682_v45  ;;  %v730_v52 = vpop.f32.mrf.mxu1 }
 0x1be   : > { %v737_v0 = vsel %vm733_vm5, %v727_v43, %v735_v47  ;;  %vm734_vm7 = vcmp.ge.f32.partialorder %v729_v48, 0.0  ;;  %v736_v53 = vmul.f32 0.2, %v729_v48  ;;  %v684_v54 = vpop.f32.mrf.mxu0 }
 0x1bf   : > { %v739_v55 = vadd.f32 %v737_v0, %v690_v50  ;;  %v691_v56 = vsel %vm687_vm6, %v682_v45, %v689_v51  ;;  %v731_v57 = vpop.f32.mrf.mxu1 }
 0x1c0   : > { %v738_v58 = vsel %vm734_vm7, %v729_v48, %v736_v53 }
 0x1c1   : > { %v740_v59 = vadd.f32 %v738_v58, %v691_v56  ;;  %v741_v60 = vpack.c.bf16 %v739_v55, %v739_v55 }
 0x1c3   : > { %v963_v61 = vpack.c.bf16 %v740_v59, %v739_v55  ;;  %v742_v62 = vpack.c.bf16 %v740_v59, %v740_v59  ;;  %v763_v63 = vsel %vm761_vm8, %v741_v60, 0 }
 0x1c5   : > { %749 = vst [vmem:[%s360_s20] sm:$0xff] %v963_v61  ;;  %954 = vmatprep.subr.msk.bf16.mxu0 %vm761_vm8, %v742_v62 }
 0x1c6   : > { %783 = vmatpush1.bf16.msra.mxu0 %v763_v63 }
 0x1c9   : > { %955 = vmatmul.mubr.msk.bf16.vlgmr.msra.gmra.mxu0 %vm757_vm9, %v750_v1 }
 0x289   : > { %v802_v3 = vpop.f32.mrf.mxu0 }
 0x28a   : > { %v803_v4 = vadd.f32 %v802_v3, %v755_v2 }
 0x28b   : > { %v804_v5 = vpop.f32.mrf.mxu0 }
 0x28c   : > { %v811_v6 = vmul.f32 0.2, %v803_v4  ;;  %v805_v7 = vadd.f32 %v804_v5, %v755_v2  ;;  %vm809_vm10 = vcmp.ge.f32.partialorder %v803_v4, 0.0 }
 0x28d   : > { %v806_v8 = vpop.f32.mrf.mxu0 }
 0x28e   : > { %vm810_vm11 = vcmp.ge.f32.partialorder %v805_v7, 0.0  ;;  %v812_v9 = vmul.f32 0.2, %v805_v7  ;;  %v813_v11 = vsel %vm809_vm10, %v803_v4, %v811_v6 }
 0x28f   : > { %v807_v10 = vpop.f32.mrf.mxu0 }
 0x290   : > { %v814_v12 = vsel %vm810_vm11, %v805_v7, %v812_v9 }
 0x291   : > { %v964_v13 = vpack.c.bf16 %v814_v12, %v813_v11 }
 0x293   : > { %823 = vst [vmem:[%s365_s24] sm:$0xff] %v964_v13 }
 0x294 PF: > { %s20_s30 = sadd.s32 1, %s997_s30  }
 0x295   : > { %p17_p4 = scmp.ge.s32.totalorder %s20_s30, 4  }
 0x297   :  { %19 = sbr.rel (!%p17_p4) target bundleno = 1 (0x1), region = 97 }

// kernel: squeeze.144
= control target key start
LH: loop header
LB: loop body
LE: loop exit
PB: predicated region body
PF: predicated region fallthrough
CT: control target
= control target key end

     0   :  { %s1509_s18 = smov 3  ;;  %s1511_s19 = smov 12  ;;  %vm516_vm0 = vcmask 1047556   ;;  %vm518_vm1 = vcmask 130048   ;;  %vm577_vm2 = vcmask 1043458   ;;  %vm582_vm3 = vcmask 1045508   ;;  %s1719_s0 = inlined_call_operand.vmem [shape: bf16[2,8,1,1,16,16], index: 0, kind: input, shape index: {}]   ;;  %s1720_s1 = inlined_call_operand.vmem [shape: bf16[2,8,256], index: 1, kind: output, shape index: {}]  }
   0x1   :  { %v1389_v0 = vld [vmem:[%s1719_s0 + $0x38] sm:$0xff]   ;;  %v1390_v1 = vld [vmem:[%s1719_s0 + $0x30] sm:$0xff]   ;;  %v1391_v2 = vld [vmem:[%s1719_s0 + $0x28] sm:$0xff]   ;;  %s1519_s24 = smov 48  ;;  %s1521_s25 = smov 192  ;;  %vm587_vm4 = vcmask 1047558  }
   0x2   :  { %v1341_v3 = vunpack.c.l.bf16 %v1389_v0  ;;  %v1342_v4 = vunpack.c.h.bf16 %v1389_v0  ;;  %v1345_v5 = vunpack.c.l.bf16 %v1390_v1  ;;  %v1346_v6 = vunpack.c.h.bf16 %v1390_v1  ;;  %v1392_v7 = vld [vmem:[%s1719_s0 + $0x20] sm:$0xff]   ;;  %v1393_v8 = vld [vmem:[%s1719_s0 + $0x18] sm:$0xff]   ;;  %v1394_v9 = vld [vmem:[%s1719_s0 + $0x10] sm:$0xff]   ;;  %s1526_s28 = smov 3  ;;  %s1537_s6 = smov 12 }
   0x3   :  { %v1349_v10 = vunpack.c.l.bf16 %v1391_v2  ;;  %v1350_v11 = vunpack.c.h.bf16 %v1391_v2  ;;  %v1353_v12 = vunpack.c.l.bf16 %v1392_v7  ;;  %v1354_v13 = vunpack.c.h.bf16 %v1392_v7  ;;  %v1395_v14 = vld [vmem:[%s1719_s0 + $0x8] sm:$0xff]   ;;  %v1368_v15 = vld [vmem:[%s1719_s0] sm:$0xff]   ;;  %v1381_v16 = vld [vmem:[%s1719_s0 + $0x78] sm:$0xff]   ;;  %s1539_s7 = smov 48  ;;  %s1547_s12 = smov 192 }
   0x4   :  { %277 = vst [vmem:[#allocation1 + $0x78] sm:$0xff] %v1342_v4  ;;  %293 = vst [vmem:[#allocation1 + $0x70] sm:$0xff] %v1341_v3  ;;  %v1357_v17 = vunpack.c.l.bf16 %v1393_v8  ;;  %v1358_v18 = vunpack.c.h.bf16 %v1393_v8  ;;  %v1361_v19 = vunpack.c.l.bf16 %v1394_v9  ;;  %v1362_v20 = vunpack.c.h.bf16 %v1394_v9  ;;  %v1382_v21 = vld [vmem:[%s1719_s0 + $0x70] sm:$0xff]   ;;  %v1383_v22 = vld [vmem:[%s1719_s0 + $0x68] sm:$0xff]   ;;  %s1549_s13 = smov 3  ;;  %s1559_s20 = smov 48 }
   0x5   :  { %309 = vst [vmem:[#allocation1 + $0x68] sm:$0xff] %v1346_v6  ;;  %325 = vst [vmem:[#allocation1 + $0x60] sm:$0xff] %v1345_v5  ;;  %v1384_v23 = vld [vmem:[%s1719_s0 + $0x60] sm:$0xff]   ;;  %v1365_v24 = vunpack.c.l.bf16 %v1395_v14  ;;  %v1366_v25 = vunpack.c.h.bf16 %v1395_v14  ;;  %v1369_v26 = vunpack.c.l.bf16 %v1368_v15  ;;  %v1370_v27 = vunpack.c.h.bf16 %v1368_v15  ;;  %v1385_v28 = vld [vmem:[%s1719_s0 + $0x58] sm:$0xff]   ;;  %s1561_s21 = smov 192  ;;  %s1563_s22 = smov 3 }
   0x6   :  { %341 = vst [vmem:[#allocation1 + $0x58] sm:$0xff] %v1350_v11  ;;  %357 = vst [vmem:[#allocation1 + $0x50] sm:$0xff] %v1349_v10  ;;  %v1386_v29 = vld [vmem:[%s1719_s0 + $0x50] sm:$0xff]   ;;  %v1309_v30 = vunpack.c.l.bf16 %v1381_v16  ;;  %v1310_v31 = vunpack.c.h.bf16 %v1381_v16  ;;  %v1313_v32 = vunpack.c.l.bf16 %v1382_v21  ;;  %v1314_v33 = vunpack.c.h.bf16 %v1382_v21  ;;  %v1387_v34 = vld [vmem:[%s1719_s0 + $0x48] sm:$0xff]   ;;  %s1565_s23 = smov 12  ;;  %s1567_s26 = smov 48 }
   0x7   :  { %373 = vst [vmem:[#allocation1 + $0x48] sm:$0xff] %v1354_v13  ;;  %389 = vst [vmem:[#allocation1 + $0x40] sm:$0xff] %v1353_v12  ;;  %v1388_v35 = vld [vmem:[%s1719_s0 + $0x40] sm:$0xff]   ;;  %s1557_s0 = smov 12  ;;  %v1317_v36 = vunpack.c.l.bf16 %v1383_v22  ;;  %v1318_v37 = vunpack.c.h.bf16 %v1383_v22  ;;  %v1321_v38 = vunpack.c.l.bf16 %v1384_v23  ;;  %v1322_v39 = vunpack.c.h.bf16 %v1384_v23  ;;  %s1569_s27 = smov 192 }
   0x8   :  { %405 = vst [vmem:[#allocation1 + $0x38] sm:$0xff] %v1358_v18  ;;  %421 = vst [vmem:[#allocation1 + $0x30] sm:$0xff] %v1357_v17  ;;  %v1325_v40 = vunpack.c.l.bf16 %v1385_v28  ;;  %v1326_v41 = vunpack.c.h.bf16 %v1385_v28  ;;  %v1329_v42 = vunpack.c.l.bf16 %v1386_v29  ;;  %v1330_v43 = vunpack.c.h.bf16 %v1386_v29  ;;  %s1571_s29 = smov 3  ;;  %s1573_s30 = smov 12 }
   0x9   :  { %437 = vst [vmem:[#allocation1 + $0x28] sm:$0xff] %v1362_v20  ;;  %453 = vst [vmem:[#allocation1 + $0x20] sm:$0xff] %v1361_v19  ;;  %v1333_v44 = vunpack.c.l.bf16 %v1387_v34  ;;  %v1334_v45 = vunpack.c.h.bf16 %v1387_v34  ;;  %v1337_v46 = vunpack.c.l.bf16 %v1388_v35  ;;  %v1338_v47 = vunpack.c.h.bf16 %v1388_v35  ;;  %s1575_s2 = smov 48  ;;  %s1577_s3 = smov 192 }
   0xa   :  { %469 = vst [vmem:[#allocation1 + $0x18] sm:$0xff] %v1366_v25  ;;  %485 = vst [vmem:[#allocation1 + $0x10] sm:$0xff] %v1365_v24  ;;  %s1579_s4 = smov 3  ;;  %s1581_s5 = smov 12  ;;  %vm591_vm5 = vcmask 1048448   ;;  %vm682_vm6 = vcmask 917248  }
   0xb   :  { %500 = vst [vmem:[#allocation1 + $0x8] sm:$0xff] %v1370_v27  ;;  %513 = vst [vmem:[#allocation1] sm:$0xff] %v1369_v26  ;;  %s1475_s8 = smov 112   ;;  %s640_s9 = smov 3  ;;  %vm773_vm7 = vcmask 786048   ;;  %vm864_vm8 = vcmask 654848  }
   0xc   :  { %21 = vst [vmem:[#allocation1 + $0xf8] sm:$0xff] %v1310_v31  ;;  %37 = vst [vmem:[#allocation1 + $0xf0] sm:$0xff] %v1309_v30  ;;  %v529_v48 = vld [vmem:[#allocation1 + $0x40] ss:$8 sm:$0xf0]   ;;  %s643_s10 = smov 12 }
   0xd   :  { %53 = vst [vmem:[#allocation1 + $0xe8] sm:$0xff] %v1314_v33  ;;  %69 = vst [vmem:[#allocation1 + $0xe0] sm:$0xff] %v1313_v32  ;;  %s648_s11 = smov 48  ;;  %s802_s14 = smov 12  ;;  %vm955_vm9 = vcmask 523648   ;;  %vm1046_vm10 = vcmask 392448  }
   0xe   :  { %85 = vst [vmem:[#allocation1 + $0xd8] sm:$0xff] %v1318_v37  ;;  %101 = vst [vmem:[#allocation1 + $0xd0] sm:$0xff] %v1317_v36  ;;  %v527_v49 = vld [vmem:[#allocation1 + $0x40] ss:$8 sm:$0xf]   ;;  %s807_s15 = smov 48 }
   0xf   :  { %117 = vst [vmem:[#allocation1 + $0xc8] sm:$0xff] %v1322_v39  ;;  %133 = vst [vmem:[#allocation1 + $0xc0] sm:$0xff] %v1321_v38  ;;  %v531_v50 = vsel %vm516_vm0, %v529_v48, %v527_v49  ;;  %s812_s16 = smov 192  ;;  %s822_s17 = smov 3  ;;  %vm1137_vm11 = vcmask 261248  }
  0x10   :  { %149 = vst [vmem:[#allocation1 + $0xb8] sm:$0xff] %v1326_v41  ;;  %165 = vst [vmem:[#allocation1 + $0xb0] sm:$0xff] %v1325_v40 }
  0x11   :  { %181 = vst [vmem:[#allocation1 + $0xa8] sm:$0xff] %v1330_v43  ;;  %197 = vst [vmem:[#allocation1 + $0xa0] sm:$0xff] %v1329_v42 }
  0x12   :  { %213 = vst [vmem:[#allocation1 + $0x98] sm:$0xff] %v1334_v45  ;;  %229 = vst [vmem:[#allocation1 + $0x90] sm:$0xff] %v1333_v44  ;;  %v664_v51 = vld [vmem:[#allocation1 + $0x6] ss:$16 sm:%s1509_s18]   ;;  %v686_v56 = vld [vmem:[#allocation1 + $0xe] ss:$16 sm:%s1526_s28]  }
  0x13   :  { %245 = vst [vmem:[#allocation1 + $0x88] sm:$0xff] %v1338_v47  ;;  %261 = vst [vmem:[#allocation1 + $0x80] sm:$0xff] %v1337_v46  ;;  %v667_v52 = vld [vmem:[#allocation1 + $0x6] ss:$16 sm:%s1511_s19]   ;;  %v689_v57 = vld [vmem:[#allocation1 + $0xe] ss:$16 sm:%s1537_s6]  }
  0x14   :  { %v672_v53 = vld [vmem:[#allocation1 + $0x6] ss:$16 sm:%s1519_s24]   ;;  %534 = vst.msk [vmem:[#allocation0 + $0x4] ss:$8 sm:$0x3] %vm518_vm1, %v531_v50   ;;  %v669_v54 = vsel %vm577_vm2, %v667_v52, %v664_v51  ;;  %v691_v59 = vsel %vm577_vm2, %v689_v57, %v686_v56  ;;  %s1474_s18 = smov 96  }
  0x15   :  { %536 = vst.msk [vmem:[#allocation0 - $0xb] ss:$8 sm:$0xc] %vm518_vm1, %v531_v50   ;;  %538 = vst.msk [vmem:[#allocation0 - $0x1a] ss:$8 sm:$0x30] %vm518_vm1, %v531_v50   ;;  %v674_v58 = vsel %vm582_vm3, %v672_v53, %v669_v54 }
  0x16   :  { %540 = vst.msk [vmem:[#allocation0 - $0x29] ss:$8 sm:$0xc0] %vm518_vm1, %v531_v50   ;;  %v677_v55 = vld [vmem:[#allocation1 + $0x6] ss:$16 sm:%s1521_s25]   ;;  %s739_s19 = smov 48 }
  0x17   :  { %v694_v60 = vld [vmem:[#allocation1 + $0xe] ss:$16 sm:%s1539_s7]   ;;  %v573_v62 = vld [vmem:[#allocation1 + $0x7] ss:$16 sm:%s1549_s13]   ;;  %v679_v63 = vsel %vm587_vm4, %v677_v55, %v674_v58  ;;  %v595_v6 = vld [vmem:[#allocation1 + $0xf] ss:$16 sm:%s1563_s22]  }
  0x18   :  { %v699_v61 = vld [vmem:[#allocation1 + $0xe] ss:$16 sm:%s1547_s12]   ;;  %v696_v0 = vsel %vm582_vm3, %v694_v60, %v691_v59  ;;  %v576_v1 = vld [vmem:[#allocation1 + $0x7] ss:$16 sm:%s1557_s0]   ;;  %v598_v7 = vld [vmem:[#allocation1 + $0xf] ss:$16 sm:%s1565_s23]  }
  0x19   :  { %v581_v2 = vld [vmem:[#allocation1 + $0x7] ss:$16 sm:%s1559_s20]   ;;  %v701_v4 = vsel %vm587_vm4, %v699_v61, %v696_v0  ;;  %v578_v5 = vsel %vm577_vm2, %v576_v1, %v573_v62  ;;  %v603_v8 = vld [vmem:[#allocation1 + $0xf] ss:$16 sm:%s1567_s26]   ;;  %v600_v11 = vsel %vm577_vm2, %v598_v7, %v595_v6  ;;  %s744_s24 = smov 192  ;;  %s617_s25 = smov 3 }
  0x1a   :  { %v586_v3 = vld [vmem:[#allocation1 + $0x7] ss:$16 sm:%s1561_s21]   ;;  %v1414_v9 = vpack.i.bf16 %v701_v4, %v679_v63  ;;  %v583_v10 = vsel %vm582_vm3, %v581_v2, %v578_v5  ;;  %v608_v12 = vld [vmem:[#allocation1 + $0xf] ss:$16 sm:%s1569_s27]   ;;  %v709_v13 = vld [vmem:[#allocation1 + $0x86] ss:$16 sm:%s1571_s29]   ;;  %v605_v16 = vsel %vm582_vm3, %v603_v8, %v600_v11 }
  0x1b   :  { %v712_v14 = vld [vmem:[#allocation1 + $0x86] ss:$16 sm:%s1573_s30]   ;;  %v588_v15 = vsel %vm587_vm4, %v586_v3, %v583_v10  ;;  %v732_v20 = vld [vmem:[#allocation1 + $0x8e] ss:$16 sm:%s1579_s4]   ;;  %v610_v21 = vsel %vm587_vm4, %v608_v12, %v605_v16  ;;  %s620_s28 = smov 12  ;;  %s625_s6 = smov 48 }
  0x1c   :  { %v714_v17 = vsel %vm577_vm2, %v712_v14, %v709_v13  ;;  %v717_v18 = vld [vmem:[#allocation1 + $0x86] ss:$16 sm:%s1575_s2]   ;;  %1415 = vrot.lane.b32.xlu1 %v1414_v9, %s1474_s18  ;;  %v735_v23 = vld [vmem:[#allocation1 + $0x8e] ss:$16 sm:%s1581_s5]   ;;  %v1404_v24 = vpack.i.bf16 %v610_v21, %v588_v15  ;;  %v618_v30 = vld [vmem:[#allocation1 + $0x87] ss:$16 sm:%s617_s25]  }
  0x1d   :  { %v722_v19 = vld [vmem:[#allocation1 + $0x86] ss:$16 sm:%s1577_s3]   ;;  %v719_v22 = vsel %vm582_vm3, %v717_v18, %v714_v17  ;;  %v737_v26 = vsel %vm577_vm2, %v735_v23, %v732_v20  ;;  %v740_v27 = vld [vmem:[#allocation1 + $0x8e] ss:$16 sm:%s739_s19]   ;;  %v621_v31 = vld [vmem:[#allocation1 + $0x87] ss:$16 sm:%s620_s28]  }
  0x1e   :  { %v724_v25 = vsel %vm587_vm4, %v722_v19, %v719_v22  ;;  %v745_v28 = vld [vmem:[#allocation1 + $0x8e] ss:$16 sm:%s744_s24]   ;;  %v742_v29 = vsel %vm582_vm3, %v740_v27, %v737_v26  ;;  %s630_s7 = smov 192  ;;  %1405 = vrot.lane.b32.xlu0 %v1404_v24, %s1475_s8  ;;  %v623_v33 = vsel %vm577_vm2, %v621_v31, %v618_v30  ;;  %v626_v34 = vld [vmem:[#allocation1 + $0x87] ss:$16 sm:%s625_s6]   ;;  %s653_s12 = smov 192 }
  0x1f   :  { %v747_v32 = vsel %vm587_vm4, %v745_v28, %v742_v29  ;;  %v631_v35 = vld [vmem:[#allocation1 + $0x87] ss:$16 sm:%s630_s7]   ;;  %v628_v37 = vsel %vm582_vm3, %v626_v34, %v623_v33  ;;  %v641_v38 = vld [vmem:[#allocation1 + $0x8f] ss:$16 sm:%s640_s9]   ;;  %s799_s13 = smov 3  ;;  %s825_s0 = smov 12 }
  0x20   :  { %v1419_v36 = vpack.i.bf16 %v747_v32, %v724_v25  ;;  %v644_v39 = vld [vmem:[#allocation1 + $0x8f] ss:$16 sm:%s643_s10]   ;;  %v633_v40 = vsel %vm587_vm4, %v631_v35, %v628_v37  ;;  %v800_v45 = vld [vmem:[#allocation1 + $0x85] ss:$16 sm:%s799_s13]   ;;  %v823_v52 = vld [vmem:[#allocation1 + $0x8d] ss:$16 sm:%s822_s17]  }
  0x21   :  { %v646_v41 = vsel %vm577_vm2, %v644_v39, %v641_v38  ;;  %v649_v42 = vld [vmem:[#allocation1 + $0x8f] ss:$16 sm:%s648_s11]   ;;  %v803_v47 = vld [vmem:[#allocation1 + $0x85] ss:$16 sm:%s802_s14]   ;;  %s830_s20 = smov 48  ;;  %s835_s21 = smov 192 }
  0x22   :  { %v654_v43 = vld [vmem:[#allocation1 + $0x8f] ss:$16 sm:%s653_s12]   ;;  %1420 = vrot.lane.b32.xlu1 %v1419_v36, %s1474_s18  ;;  %v651_v44 = vsel %vm582_vm3, %v649_v42, %v646_v41  ;;  %v808_v48 = vld [vmem:[#allocation1 + $0x85] ss:$16 sm:%s807_s15]   ;;  %v805_v50 = vsel %vm577_vm2, %v803_v47, %v800_v45  ;;  %v826_v54 = vld [vmem:[#allocation1 + $0x8d] ss:$16 sm:%s825_s0]  }
  0x23   :  { %v656_v46 = vsel %vm587_vm4, %v654_v43, %v651_v44  ;;  %v813_v51 = vld [vmem:[#allocation1 + $0x85] ss:$16 sm:%s812_s16]   ;;  %v810_v53 = vsel %vm582_vm3, %v808_v48, %v805_v50  ;;  %v831_v55 = vld [vmem:[#allocation1 + $0x8d] ss:$16 sm:%s830_s20]   ;;  %s754_s22 = smov 3  ;;  %v828_v57 = vsel %vm577_vm2, %v826_v54, %v823_v52  ;;  %s757_s23 = smov 12 }
  0x24   :  { %v1409_v49 = vpack.i.bf16 %v656_v46, %v633_v40  ;;  %v815_v56 = vsel %vm587_vm4, %v813_v51, %v810_v53  ;;  %v836_v58 = vld [vmem:[#allocation1 + $0x8d] ss:$16 sm:%s835_s21]   ;;  %v755_v59 = vld [vmem:[#allocation1 + $0x5] ss:$16 sm:%s754_s22]   ;;  %s762_s26 = smov 48  ;;  %v833_v60 = vsel %vm582_vm3, %v831_v55, %v828_v57  ;;  %s767_s27 = smov 192 }
  0x25   :  { %v758_v61 = vld [vmem:[#allocation1 + $0x5] ss:$16 sm:%s757_s23]   ;;  %s776_s29 = smov 3  ;;  %v838_v63 = vsel %vm587_vm4, %v836_v58, %v833_v60  ;;  %s779_s30 = smov 12 }
  0x26   :  { %1410 = vrot.lane.b32.xlu0 %v1409_v49, %s1475_s8  ;;  %v763_v62 = vld [vmem:[#allocation1 + $0x5] ss:$16 sm:%s762_s26]   ;;  %v760_v0 = vsel %vm577_vm2, %v758_v61, %v755_v59  ;;  %v777_v2 = vld [vmem:[#allocation1 + $0xd] ss:$16 sm:%s776_s29]   ;;  %s784_s2 = smov 48  ;;  %v1429_v3 = vpack.i.bf16 %v838_v63, %v815_v56  ;;  %s789_s3 = smov 192 }
  0x27   :  { %v768_v1 = vld [vmem:[#allocation1 + $0x5] ss:$16 sm:%s767_s27]   ;;  %v765_v4 = vsel %vm582_vm3, %v763_v62, %v760_v0  ;;  %v780_v5 = vld [vmem:[#allocation1 + $0xd] ss:$16 sm:%s779_s30]   ;;  %s890_s4 = smov 3  ;;  %s893_s5 = smov 12 }
  0x28   :  { %v785_v6 = vld [vmem:[#allocation1 + $0xd] ss:$16 sm:%s784_s2]   ;;  %v770_v7 = vsel %vm587_vm4, %v768_v1, %v765_v4  ;;  %v782_v8 = vsel %vm577_vm2, %v780_v5, %v777_v2  ;;  %s1476_s18 = smov 80   ;;  %v891_v11 = vld [vmem:[#allocation1 + $0x84] ss:$16 sm:%s890_s4]   ;;  %s898_s19 = smov 48 }
  0x29   :  { %v790_v9 = vld [vmem:[#allocation1 + $0xd] ss:$16 sm:%s789_s3]   ;;  %1430 = vrot.lane.b32.xlu1 %v1429_v3, %s1476_s18  ;;  %v787_v10 = vsel %vm582_vm3, %v785_v6, %v782_v8  ;;  %v894_v12 = vld [vmem:[#allocation1 + $0x84] ss:$16 sm:%s893_s5]   ;;  %s903_s24 = smov 192  ;;  %s913_s25 = smov 3 }
  0x2a   :  { %v792_v13 = vsel %vm587_vm4, %v790_v9, %v787_v10  ;;  %v896_v14 = vsel %vm577_vm2, %v894_v12, %v891_v11  ;;  %v899_v15 = vld [vmem:[#allocation1 + $0x84] ss:$16 sm:%s898_s19]   ;;  %s916_s28 = smov 12  ;;  %v914_v19 = vld [vmem:[#allocation1 + $0x8c] ss:$16 sm:%s913_s25]   ;;  %s921_s6 = smov 48 }
  0x2b   :  { %v904_v16 = vld [vmem:[#allocation1 + $0x84] ss:$16 sm:%s903_s24]   ;;  %v1424_v17 = vpack.i.bf16 %v792_v13, %v770_v7  ;;  %v901_v18 = vsel %vm582_vm3, %v899_v15, %v896_v14  ;;  %v917_v20 = vld [vmem:[#allocation1 + $0x8c] ss:$16 sm:%s916_s28]   ;;  %s926_s7 = smov 192  ;;  %s845_s8 = smov 3 }
  0x2c   :  { %v906_v21 = vsel %vm587_vm4, %v904_v16, %v901_v18  ;;  %v919_v22 = vsel %vm577_vm2, %v917_v20, %v914_v19  ;;  %v922_v23 = vld [vmem:[#allocation1 + $0x8c] ss:$16 sm:%s921_s6]   ;;  %s848_s9 = smov 12  ;;  %v846_v26 = vld [vmem:[#allocation1 + $0x4] ss:$16 sm:%s845_s8]   ;;  %s853_s10 = smov 48 }
  0x2d   :  { %v927_v24 = vld [vmem:[#allocation1 + $0x8c] ss:$16 sm:%s926_s7]   ;;  %1425 = vrot.lane.b32.xlu0 %v1424_v17, %s1476_s18  ;;  %v924_v25 = vsel %vm582_vm3, %v922_v23, %v919_v22  ;;  %v849_v27 = vld [vmem:[#allocation1 + $0x4] ss:$16 sm:%s848_s9]   ;;  %s858_s11 = smov 192  ;;  %s867_s12 = smov 3 }
  0x2e   :  { %v929_v28 = vsel %vm587_vm4, %v927_v24, %v924_v25  ;;  %v851_v29 = vsel %vm577_vm2, %v849_v27, %v846_v26  ;;  %v854_v30 = vld [vmem:[#allocation1 + $0x4] ss:$16 sm:%s853_s10]   ;;  %s870_s13 = smov 12  ;;  %v868_v34 = vld [vmem:[#allocation1 + $0xc] ss:$16 sm:%s867_s12]   ;;  %s875_s14 = smov 48 }
  0x2f   :  { %v859_v31 = vld [vmem:[#allocation1 + $0x4] ss:$16 sm:%s858_s11]   ;;  %v1439_v32 = vpack.i.bf16 %v929_v28, %v906_v21  ;;  %v856_v33 = vsel %vm582_vm3, %v854_v30, %v851_v29  ;;  %v871_v35 = vld [vmem:[#allocation1 + $0xc] ss:$16 sm:%s870_s13]   ;;  %s880_s15 = smov 192  ;;  %s981_s16 = smov 3 }
  0x30   :  { %v861_v36 = vsel %vm587_vm4, %v859_v31, %v856_v33  ;;  %v873_v37 = vsel %vm577_vm2, %v871_v35, %v868_v34  ;;  %v876_v38 = vld [vmem:[#allocation1 + $0xc] ss:$16 sm:%s875_s14]   ;;  %s1477_s17 = smov 64   ;;  %v982_v41 = vld [vmem:[#allocation1 + $0x83] ss:$16 sm:%s981_s16]   ;;  %s984_s0 = smov 12 }
  0x31   :  { %v881_v39 = vld [vmem:[#allocation1 + $0xc] ss:$16 sm:%s880_s15]   ;;  %1440 = vrot.lane.b32.xlu1 %v1439_v32, %s1477_s17  ;;  %v878_v40 = vsel %vm582_vm3, %v876_v38, %v873_v37  ;;  %s989_s20 = smov 48  ;;  %v985_v43 = vld [vmem:[#allocation1 + $0x83] ss:$16 sm:%s984_s0]   ;;  %s994_s21 = smov 192 }
  0x32   :  { %v883_v42 = vsel %vm587_vm4, %v881_v39, %v878_v40  ;;  %v990_v44 = vld [vmem:[#allocation1 + $0x83] ss:$16 sm:%s989_s20]   ;;  %s1004_s22 = smov 3  ;;  %v987_v46 = vsel %vm577_vm2, %v985_v43, %v982_v41  ;;  %s1007_s23 = smov 12 }
  0x33   :  { %v1434_v45 = vpack.i.bf16 %v883_v42, %v861_v36  ;;  %v995_v47 = vld [vmem:[#allocation1 + $0x83] ss:$16 sm:%s994_s21]   ;;  %v1005_v48 = vld [vmem:[#allocation1 + $0x8b] ss:$16 sm:%s1004_s22]   ;;  %s1012_s26 = smov 48  ;;  %v992_v49 = vsel %vm582_vm3, %v990_v44, %v987_v46  ;;  %s1017_s27 = smov 192 }
  0x34   :  { %v1008_v50 = vld [vmem:[#allocation1 + $0x8b] ss:$16 sm:%s1007_s23]   ;;  %s936_s29 = smov 3  ;;  %v997_v52 = vsel %vm587_vm4, %v995_v47, %v992_v49  ;;  %s939_s30 = smov 12 }
  0x35   :  { %v1013_v51 = vld [vmem:[#allocation1 + $0x8b] ss:$16 sm:%s1012_s26]   ;;  %1435 = vrot.lane.b32.xlu0 %v1434_v45, %s1477_s17  ;;  %v1010_v53 = vsel %vm577_vm2, %v1008_v50, %v1005_v48  ;;  %v937_v55 = vld [vmem:[#allocation1 + $0x3] ss:$16 sm:%s936_s29]   ;;  %s944_s2 = smov 48  ;;  %s949_s3 = smov 192 }
  0x36   :  { %v1018_v54 = vld [vmem:[#allocation1 + $0x8b] ss:$16 sm:%s1017_s27]   ;;  %v1015_v56 = vsel %vm582_vm3, %v1013_v51, %v1010_v53  ;;  %v940_v57 = vld [vmem:[#allocation1 + $0x3] ss:$16 sm:%s939_s30]   ;;  %s958_s4 = smov 3  ;;  %s961_s5 = smov 12 }
  0x37   :  { %v945_v58 = vld [vmem:[#allocation1 + $0x3] ss:$16 sm:%s944_s2]   ;;  %v1020_v59 = vsel %vm587_vm4, %v1018_v54, %v1015_v56  ;;  %v942_v60 = vsel %vm577_vm2, %v940_v57, %v937_v55  ;;  %v959_v62 = vld [vmem:[#allocation1 + $0xb] ss:$16 sm:%s958_s4]   ;;  %s966_s18 = smov 48  ;;  %s971_s19 = smov 192 }
  0x38   :  { %v950_v61 = vld [vmem:[#allocation1 + $0x3] ss:$16 sm:%s949_s3]   ;;  %v1449_v63 = vpack.i.bf16 %v1020_v59, %v997_v52  ;;  %v947_v0 = vsel %vm582_vm3, %v945_v58, %v942_v60  ;;  %v962_v1 = vld [vmem:[#allocation1 + $0xb] ss:$16 sm:%s961_s5]   ;;  %s1072_s24 = smov 3  ;;  %s1075_s25 = smov 12 }
  0x39   :  { %v967_v2 = vld [vmem:[#allocation1 + $0xb] ss:$16 sm:%s966_s18]   ;;  %v952_v3 = vsel %vm587_vm4, %v950_v61, %v947_v0  ;;  %v964_v4 = vsel %vm577_vm2, %v962_v1, %v959_v62  ;;  %s1478_s28 = smov 48   ;;  %v1073_v7 = vld [vmem:[#allocation1 + $0x82] ss:$16 sm:%s1072_s24]   ;;  %s1080_s6 = smov 48 }
  0x3a   :  { %v972_v5 = vld [vmem:[#allocation1 + $0xb] ss:$16 sm:%s971_s19]   ;;  %1450 = vrot.lane.b32.xlu1 %v1449_v63, %s1478_s28  ;;  %v969_v6 = vsel %vm582_vm3, %v967_v2, %v964_v4  ;;  %v1076_v8 = vld [vmem:[#allocation1 + $0x82] ss:$16 sm:%s1075_s25]   ;;  %s1085_s7 = smov 192  ;;  %s1095_s8 = smov 3 }
  0x3b   :  { %v974_v9 = vsel %vm587_vm4, %v972_v5, %v969_v6  ;;  %v1078_v10 = vsel %vm577_vm2, %v1076_v8, %v1073_v7  ;;  %v1081_v11 = vld [vmem:[#allocation1 + $0x82] ss:$16 sm:%s1080_s6]   ;;  %s1098_s9 = smov 12  ;;  %v1096_v15 = vld [vmem:[#allocation1 + $0x8a] ss:$16 sm:%s1095_s8]   ;;  %s1103_s10 = smov 48 }
  0x3c   :  { %v1086_v12 = vld [vmem:[#allocation1 + $0x82] ss:$16 sm:%s1085_s7]   ;;  %v1444_v13 = vpack.i.bf16 %v974_v9, %v952_v3  ;;  %v1083_v14 = vsel %vm582_vm3, %v1081_v11, %v1078_v10  ;;  %v1099_v16 = vld [vmem:[#allocation1 + $0x8a] ss:$16 sm:%s1098_s9]   ;;  %s1108_s11 = smov 192  ;;  %s1027_s12 = smov 3 }
  0x3d   :  { %v1088_v17 = vsel %vm587_vm4, %v1086_v12, %v1083_v14  ;;  %v1101_v18 = vsel %vm577_vm2, %v1099_v16, %v1096_v15  ;;  %v1104_v19 = vld [vmem:[#allocation1 + $0x8a] ss:$16 sm:%s1103_s10]   ;;  %s1030_s13 = smov 12  ;;  %v1028_v22 = vld [vmem:[#allocation1 + $0x2] ss:$16 sm:%s1027_s12]   ;;  %s1035_s14 = smov 48 }
  0x3e   :  { %v1109_v20 = vld [vmem:[#allocation1 + $0x8a] ss:$16 sm:%s1108_s11]   ;;  %1445 = vrot.lane.b32.xlu0 %v1444_v13, %s1478_s28  ;;  %v1106_v21 = vsel %vm582_vm3, %v1104_v19, %v1101_v18  ;;  %v1031_v23 = vld [vmem:[#allocation1 + $0x2] ss:$16 sm:%s1030_s13]   ;;  %s1040_s15 = smov 192  ;;  %s1049_s16 = smov 3 }
  0x3f   :  { %v1111_v24 = vsel %vm587_vm4, %v1109_v20, %v1106_v21  ;;  %v1033_v25 = vsel %vm577_vm2, %v1031_v23, %v1028_v22  ;;  %v1036_v26 = vld [vmem:[#allocation1 + $0x2] ss:$16 sm:%s1035_s14]   ;;  %s1052_s17 = smov 12  ;;  %v1050_v30 = vld [vmem:[#allocation1 + $0xa] ss:$16 sm:%s1049_s16]   ;;  %s1057_s0 = smov 48 }
  0x40   :  { %v1041_v27 = vld [vmem:[#allocation1 + $0x2] ss:$16 sm:%s1040_s15]   ;;  %v1459_v28 = vpack.i.bf16 %v1111_v24, %v1088_v17  ;;  %v1038_v29 = vsel %vm582_vm3, %v1036_v26, %v1033_v25  ;;  %v1053_v31 = vld [vmem:[#allocation1 + $0xa] ss:$16 sm:%s1052_s17]   ;;  %s1062_s20 = smov 192  ;;  %s1163_s21 = smov 3 }
  0x41   :  { %v1043_v32 = vsel %vm587_vm4, %v1041_v27, %v1038_v29  ;;  %v1055_v33 = vsel %vm577_vm2, %v1053_v31, %v1050_v30  ;;  %v1058_v34 = vld [vmem:[#allocation1 + $0xa] ss:$16 sm:%s1057_s0]   ;;  %s1479_s22 = smov 32   ;;  %v1164_v37 = vld [vmem:[#allocation1 + $0x81] ss:$16 sm:%s1163_s21]   ;;  %s1166_s23 = smov 12 }
  0x42   :  { %v1063_v35 = vld [vmem:[#allocation1 + $0xa] ss:$16 sm:%s1062_s20]   ;;  %1460 = vrot.lane.b32.xlu1 %v1459_v28, %s1479_s22  ;;  %v1060_v36 = vsel %vm582_vm3, %v1058_v34, %v1055_v33  ;;  %s1171_s26 = smov 48  ;;  %v1167_v39 = vld [vmem:[#allocation1 + $0x81] ss:$16 sm:%s1166_s23]   ;;  %s1176_s27 = smov 192 }
  0x43   :  { %v1065_v38 = vsel %vm587_vm4, %v1063_v35, %v1060_v36  ;;  %v1172_v40 = vld [vmem:[#allocation1 + $0x81] ss:$16 sm:%s1171_s26]   ;;  %s1186_s29 = smov 3  ;;  %v1169_v42 = vsel %vm577_vm2, %v1167_v39, %v1164_v37  ;;  %s1189_s30 = smov 12 }
  0x44   :  { %v1454_v41 = vpack.i.bf16 %v1065_v38, %v1043_v32  ;;  %v1177_v43 = vld [vmem:[#allocation1 + $0x81] ss:$16 sm:%s1176_s27]   ;;  %v1187_v44 = vld [vmem:[#allocation1 + $0x89] ss:$16 sm:%s1186_s29]   ;;  %s1194_s2 = smov 48  ;;  %v1174_v45 = vsel %vm582_vm3, %v1172_v40, %v1169_v42  ;;  %s1199_s3 = smov 192 }
  0x45   :  { %v1190_v46 = vld [vmem:[#allocation1 + $0x89] ss:$16 sm:%s1189_s30]   ;;  %s1118_s4 = smov 3  ;;  %v1179_v48 = vsel %vm587_vm4, %v1177_v43, %v1174_v45  ;;  %s1121_s5 = smov 12 }
  0x46   :  { %v1195_v47 = vld [vmem:[#allocation1 + $0x89] ss:$16 sm:%s1194_s2]   ;;  %1455 = vrot.lane.b32.xlu0 %v1454_v41, %s1479_s22  ;;  %v1192_v49 = vsel %vm577_vm2, %v1190_v46, %v1187_v44  ;;  %v1119_v51 = vld [vmem:[#allocation1 + $0x1] ss:$16 sm:%s1118_s4]   ;;  %s1126_s18 = smov 48  ;;  %s1131_s19 = smov 192 }
  0x47   :  { %v1200_v50 = vld [vmem:[#allocation1 + $0x89] ss:$16 sm:%s1199_s3]   ;;  %v515_v52 = vld [vmem:[#allocation1] ss:$8 sm:$0xf0]   ;;  %v1197_v53 = vsel %vm582_vm3, %v1195_v47, %v1192_v49  ;;  %s1140_s24 = smov 3 }
  0x48   :  { %v1122_v54 = vld [vmem:[#allocation1 + $0x1] ss:$16 sm:%s1121_s5]   ;;  %v1202_v56 = vsel %vm587_vm4, %v1200_v50, %v1197_v53  ;;  %v1141_v59 = vld [vmem:[#allocation1 + $0x9] ss:$16 sm:%s1140_s24]   ;;  %s1143_s25 = smov 12  ;;  %s1148_s28 = smov 48 }
  0x49   :  { %v1127_v55 = vld [vmem:[#allocation1 + $0x1] ss:$16 sm:%s1126_s18]   ;;  %v1124_v57 = vsel %vm577_vm2, %v1122_v54, %v1119_v51  ;;  %v1469_v60 = vpack.i.bf16 %v1202_v56, %v1179_v48  ;;  %v1144_v62 = vld [vmem:[#allocation1 + $0x9] ss:$16 sm:%s1143_s25]   ;;  %s1153_s6 = smov 192  ;;  %s1480_s7 = smov 16  }
  0x4a   :  { %v1132_v58 = vld [vmem:[#allocation1 + $0x1] ss:$16 sm:%s1131_s19]   ;;  %v1129_v61 = vsel %vm582_vm3, %v1127_v55, %v1124_v57  ;;  %v1149_v63 = vld [vmem:[#allocation1 + $0x9] ss:$16 sm:%s1148_s28]   ;;  %v1146_v1 = vsel %vm577_vm2, %v1144_v62, %v1141_v59 }
  0x4b   :  { %v1134_v0 = vsel %vm587_vm4, %v1132_v58, %v1129_v61  ;;  %v1154_v2 = vld [vmem:[#allocation1 + $0x9] ss:$16 sm:%s1153_s6]   ;;  %v514_v3 = vld [vmem:[#allocation1] ss:$8 sm:$0xf]   ;;  %1470 = vrot.lane.b32.xlu1 %v1469_v60, %s1480_s7  ;;  %v1151_v4 = vsel %vm582_vm3, %v1149_v63, %v1146_v1 }
  0x4c   :  { %v517_v5 = vsel %vm516_vm0, %v515_v52, %v514_v3  ;;  %v542_v6 = vld [vmem:[#allocation1 + $0x80] ss:$8 sm:$0xf]   ;;  %v1156_v8 = vsel %vm587_vm4, %v1154_v2, %v1151_v4 }
  0x4d   :  { %v544_v7 = vld [vmem:[#allocation1 + $0x80] ss:$8 sm:$0xf0]   ;;  %519 = vst.msk [vmem:[#allocation0] ss:$8 sm:$0x3] %vm518_vm1, %v517_v5   ;;  %v1464_v12 = vpack.i.bf16 %v1156_v8, %v1134_v0 }
  0x4e   :  { %521 = vst.msk [vmem:[#allocation0 - $0xf] ss:$8 sm:$0xc] %vm518_vm1, %v517_v5   ;;  %523 = vst.msk [vmem:[#allocation0 - $0x1e] ss:$8 sm:$0x30] %vm518_vm1, %v517_v5   ;;  %v546_v9 = vsel %vm516_vm0, %v544_v7, %v542_v6 }
  0x4f   :  { %525 = vst.msk [vmem:[#allocation0 - $0x2d] ss:$8 sm:$0xc0] %vm518_vm1, %v517_v5   ;;  %v557_v10 = vld [vmem:[#allocation1 + $0xc0] ss:$8 sm:$0xf]   ;;  %1465 = vrot.lane.b32.xlu0 %v1464_v12, %s1480_s7 }
  0x50   :  { %v559_v11 = vld [vmem:[#allocation1 + $0xc0] ss:$8 sm:$0xf0]   ;;  %549 = vst.msk [vmem:[#allocation0 + $0x10] ss:$8 sm:$0x3] %vm518_vm1, %v546_v9  }
  0x51   :  { %551 = vst.msk [vmem:[#allocation0 + $0x1] ss:$8 sm:$0xc] %vm518_vm1, %v546_v9   ;;  %553 = vst.msk [vmem:[#allocation0 - $0xe] ss:$8 sm:$0x30] %vm518_vm1, %v546_v9   ;;  %v561_v13 = vsel %vm516_vm0, %v559_v11, %v557_v10 }
  0x52   :  { %555 = vst.msk [vmem:[#allocation0 - $0x1d] ss:$8 sm:$0xc0] %vm518_vm1, %v546_v9   ;;  %564 = vst.msk [vmem:[#allocation0 + $0x14] ss:$8 sm:$0x3] %vm518_vm1, %v561_v13  }
  0x53   :  { %566 = vst.msk [vmem:[#allocation0 + $0x5] ss:$8 sm:$0xc] %vm518_vm1, %v561_v13   ;;  %568 = vst.msk [vmem:[#allocation0 - $0xa] ss:$8 sm:$0x30] %vm518_vm1, %v561_v13  }
  0x54   :  { %570 = vst.msk [vmem:[#allocation0 - $0x19] ss:$8 sm:$0xc0] %vm518_vm1, %v561_v13  }
  0x8e   :  { %v1416_v14 = vpop.permute.xlu1 %1415 }
  0x8f   :  { %v1418_v15 = vunpack.i.h.bf16 %v1416_v14  ;;  %v1417_v16 = vunpack.i.l.bf16 %v1416_v14 }
  0x90   :  { %v1406_v17 = vpop.permute.xlu0 %1405 }
  0x91   :  { %v1408_v18 = vunpack.i.h.bf16 %v1406_v17  ;;  %v1407_v19 = vunpack.i.l.bf16 %v1406_v17 }
  0x93   :  { %592 = vst.msk [vmem:[#allocation0] sm:$0xff] %vm591_vm5, %v1407_v19   ;;  %615 = vst.msk [vmem:[#allocation0 + $0x8] sm:$0xff] %vm591_vm5, %v1408_v18  }
  0x94   :  { %v1421_v20 = vpop.permute.xlu1 %1420  ;;  %683 = vst.msk [vmem:[#allocation0] sm:$0xff] %vm682_vm6, %v1417_v16   ;;  %706 = vst.msk [vmem:[#allocation0 + $0x8] sm:$0xff] %vm682_vm6, %v1418_v15  }
  0x95   :  { %v1423_v21 = vunpack.i.h.bf16 %v1421_v20  ;;  %v1422_v22 = vunpack.i.l.bf16 %v1421_v20 }
  0x98   :  { %v1411_v23 = vpop.permute.xlu0 %1410 }
  0x99   :  { %v1413_v24 = vunpack.i.h.bf16 %v1411_v23  ;;  %v1412_v25 = vunpack.i.l.bf16 %v1411_v23 }
  0x9b   :  { %638 = vst.msk [vmem:[#allocation0 + $0x10] sm:$0xff] %vm591_vm5, %v1412_v25   ;;  %661 = vst.msk [vmem:[#allocation0 + $0x18] sm:$0xff] %vm591_vm5, %v1413_v24   ;;  %v1431_v26 = vpop.permute.xlu1 %1430 }
  0x9c   :  { %729 = vst.msk [vmem:[#allocation0 + $0x10] sm:$0xff] %vm682_vm6, %v1422_v22   ;;  %752 = vst.msk [vmem:[#allocation0 + $0x18] sm:$0xff] %vm682_vm6, %v1423_v21   ;;  %v1433_v27 = vunpack.i.h.bf16 %v1431_v26  ;;  %v1432_v28 = vunpack.i.l.bf16 %v1431_v26 }
  0x9e   :  { %820 = vst.msk [vmem:[#allocation0 + $0x10] sm:$0xff] %vm773_vm7, %v1432_v28   ;;  %843 = vst.msk [vmem:[#allocation0 + $0x18] sm:$0xff] %vm773_vm7, %v1433_v27  }
  0x9f   :  { %v1426_v29 = vpop.permute.xlu0 %1425 }
  0xa0   :  { %v1428_v30 = vunpack.i.h.bf16 %v1426_v29  ;;  %v1427_v31 = vunpack.i.l.bf16 %v1426_v29 }
  0xa2   :  { %797 = vst.msk [vmem:[#allocation0 + $0x8] sm:$0xff] %vm773_vm7, %v1428_v30   ;;  %774 = vst.msk [vmem:[#allocation0] sm:$0xff] %vm773_vm7, %v1427_v31  }
  0xa3   :  { %v1441_v32 = vpop.permute.xlu1 %1440 }
  0xa4   :  { %v1443_v33 = vunpack.i.h.bf16 %v1441_v32  ;;  %v1442_v34 = vunpack.i.l.bf16 %v1441_v32 }
  0xa6   :  { %911 = vst.msk [vmem:[#allocation0 + $0x10] sm:$0xff] %vm864_vm8, %v1442_v34   ;;  %934 = vst.msk [vmem:[#allocation0 + $0x18] sm:$0xff] %vm864_vm8, %v1443_v33  }
  0xa7   :  { %v1436_v35 = vpop.permute.xlu0 %1435 }
  0xa8   :  { %v1438_v36 = vunpack.i.h.bf16 %v1436_v35  ;;  %v1437_v37 = vunpack.i.l.bf16 %v1436_v35 }
  0xaa   :  { %865 = vst.msk [vmem:[#allocation0] sm:$0xff] %vm864_vm8, %v1437_v37   ;;  %888 = vst.msk [vmem:[#allocation0 + $0x8] sm:$0xff] %vm864_vm8, %v1438_v36  }
  0xac   :  { %v1451_v38 = vpop.permute.xlu1 %1450 }
  0xad   :  { %v1453_v39 = vunpack.i.h.bf16 %v1451_v38  ;;  %v1452_v40 = vunpack.i.l.bf16 %v1451_v38 }
  0xaf   :  { %1002 = vst.msk [vmem:[#allocation0 + $0x10] sm:$0xff] %vm955_vm9, %v1452_v40   ;;  %1025 = vst.msk [vmem:[#allocation0 + $0x18] sm:$0xff] %vm955_vm9, %v1453_v39  }
  0xb0   :  { %v1446_v41 = vpop.permute.xlu0 %1445 }
  0xb1   :  { %v1448_v42 = vunpack.i.h.bf16 %v1446_v41  ;;  %v1447_v43 = vunpack.i.l.bf16 %v1446_v41 }
  0xb3   :  { %956 = vst.msk [vmem:[#allocation0] sm:$0xff] %vm955_vm9, %v1447_v43   ;;  %979 = vst.msk [vmem:[#allocation0 + $0x8] sm:$0xff] %vm955_vm9, %v1448_v42  }
  0xb4   :  { %v1461_v44 = vpop.permute.xlu1 %1460 }
  0xb5   :  { %v1463_v45 = vunpack.i.h.bf16 %v1461_v44  ;;  %v1462_v46 = vunpack.i.l.bf16 %v1461_v44 }
  0xb7   :  { %1093 = vst.msk [vmem:[#allocation0 + $0x10] sm:$0xff] %vm1046_vm10, %v1462_v46   ;;  %1116 = vst.msk [vmem:[#allocation0 + $0x18] sm:$0xff] %vm1046_vm10, %v1463_v45  }
  0xb8   :  { %v1456_v47 = vpop.permute.xlu0 %1455 }
  0xb9   :  { %v1458_v48 = vunpack.i.h.bf16 %v1456_v47  ;;  %v1457_v49 = vunpack.i.l.bf16 %v1456_v47 }
  0xbb   :  { %1047 = vst.msk [vmem:[#allocation0] sm:$0xff] %vm1046_vm10, %v1457_v49   ;;  %1070 = vst.msk [vmem:[#allocation0 + $0x8] sm:$0xff] %vm1046_vm10, %v1458_v48  }
  0xbd   :  { %v1471_v50 = vpop.permute.xlu1 %1470 }
  0xbe   :  { %v1473_v51 = vunpack.i.h.bf16 %v1471_v50  ;;  %v1472_v52 = vunpack.i.l.bf16 %v1471_v50 }
  0xc0   :  { %1184 = vst.msk [vmem:[#allocation0 + $0x10] sm:$0xff] %vm1137_vm11, %v1472_v52   ;;  %1207 = vst.msk [vmem:[#allocation0 + $0x18] sm:$0xff] %vm1137_vm11, %v1473_v51  }
  0xc1   :  { %v1466_v53 = vpop.permute.xlu0 %1465 }
  0xc2   :  { %v1468_v54 = vunpack.i.h.bf16 %v1466_v53  ;;  %v1467_v55 = vunpack.i.l.bf16 %v1466_v53 }
  0xc4   :  { %1138 = vst.msk [vmem:[#allocation0] sm:$0xff] %vm1137_vm11, %v1467_v55   ;;  %1161 = vst.msk [vmem:[#allocation0 + $0x8] sm:$0xff] %vm1137_vm11, %v1468_v54  }
  0xc7   :  { %v1226_v56 = vld [vmem:[#allocation0 + $0x10] sm:$0xff]  ;;  %v1234_v57 = vld [vmem:[#allocation0 + $0x18] sm:$0xff] }
  0xc8   :  { %v1379_v58 = vpack.c.bf16 %v1234_v57, %v1226_v56 }
  0xca   :  { %1396 = vst [vmem:[%s1720_s1 + $0x8] sm:$0xff] %v1379_v58  }
  0xcb   :  { %v1213_v59 = vld [vmem:[#allocation0] sm:$0xff]  ;;  %v1219_v60 = vld [vmem:[#allocation0 + $0x8] sm:$0xff] }
  0xcc   :  { %v1374_v61 = vpack.c.bf16 %v1219_v60, %v1213_v59 }
  0xce   :  { %1375 = vst [vmem:[%s1720_s1] sm:$0xff] %v1374_v61  }

// kernel: _lambda_.16
= control target key start
LH: loop header
LB: loop body
LE: loop exit
PB: predicated region body
PF: predicated region fallthrough
CT: control target
= control target key end

     0   :  { %s547_s12 = smov 0   ;;  %s597_s0 = inlined_call_operand.vmem [shape: bf16[2,72,256], index: 0, kind: input, shape index: {}]   ;;  %s598_s1 = inlined_call_operand.vmem [shape: bf16[32,72], index: 1, kind: input, shape index: {}]   ;;  %s599_s2 = inlined_call_operand.vmem [shape: f32[32,1], index: 2, kind: input, shape index: {}]   ;;  %s600_s3 = inlined_call_operand.vmem [shape: bf16[2,8,1024], index: 3, kind: output, shape index: {}]  }
   0x1 LB: > { %s446_s13 = sadd.s32 4294967295, %s524_s12   ;;  %p450_p0 = scmp.ge.s32.totalorder %s524_s12, 1  ;;  %s524_s12 = sphi %s547_s12, %s13_s12  }
   0x2   : > { %p137_p1 = scmp.lt.s32.totalorder %s524_s12, 3 }
   0x4   : > { %p138_p2 = pnand %p450_p0, %p137_p1 }
   0x5   : > { %p161_p3 = scmp.lt.s32.totalorder (!%p138_p2), %s446_s13, 1 }
   0x6   : > { %141 = sbr.rel (%p138_p2) target bundleno = 247 (0xf7), region = 32 }
   0xb   : > { %v526_v0 = vmov 0   ;;  %s602_s13 = smov (!%p161_p3, %s446_s13), 1  ;;  %v187_v1 = vld [vmem:[%s599_s2 + $0x10] sm:$0xff]  ;;  %v185_v2 = vld [vmem:[%s599_s2] sm:$0xff]  ;;  %v188_v3 = vld [vmem:[%s599_s2 + $0x18] sm:$0xff]  ;;  %vm271_vm0 = vcmask 1043456  }
   0xc   : > { %310 = vmatprep.mubr.bf16.mxu0 %v526_v0  ;;  %320 = vmatprep.mubr.bf16.mxu1 %v526_v0  ;;  %s490_s18 = smul.u32 72, %s602_s13  ;;  %v186_v4 = vld [vmem:[%s599_s2 + $0x8] sm:$0xff]  ;;  %v516_v17 = vld [vmem:[%s598_s1] sm:$0xff]   ;;  %vm264_vm1 = vcmask 588800   ;;  %s475_s30 = sshll.u32 %s602_s13, 5 }
   0xd   : > { %501 = vset.pattern.permute.xlu1 %v526_v0  ;;  %500 = vset.pattern.permute.xlu0 %v526_v0  ;;  %v517_v18 = vld [vmem:[%s598_s1 + $0x8] sm:$0xff]   ;;  %s170_s6 = scalar_lea.vmem %s600_s3, %s475_s30 }
   0xe   : > { %201 = vperm.xlu1 %501, %v187_v1   ;;  %191 = vperm.xlu0 %500, %v185_v2   ;;  %s573_s25 = scalar_lea.vmem %s597_s0, %s490_s18 }
   0xf   : > { %v180_v5 = vld [vmem:[%s573_s25 + $0x40] sm:$0xff]  ;;  %v504_v8 = vld [vmem:[%s573_s25 + $0x34] ss:$8 sps:$4 sm:$0xff]   ;;  %v506_v10 = vld [vmem:[%s573_s25 + $0x30] ss:$8 sps:$4 sm:$0xff]  }
  0x10   : > { %v465_v6 = vcombine.high %v180_v5, %v180_v5  ;;  %v464_v7 = vcombine.low %v180_v5, %v180_v5  ;;  %v507_v11 = vld [vmem:[%s573_s25 + $0x24] ss:$8 sps:$4 sm:$0xff]   ;;  %v509_v12 = vld [vmem:[%s573_s25 + $0x20] ss:$8 sps:$4 sm:$0xff]   ;;  %v510_v13 = vld [vmem:[%s573_s25 + $0x14] ss:$8 sps:$4 sm:$0xff]  }
  0x11   : > { %v512_v14 = vld [vmem:[%s573_s25 + $0x10] ss:$8 sps:$4 sm:$0xff]   ;;  %v513_v15 = vld [vmem:[%s573_s25 + $0x4] ss:$8 sps:$4 sm:$0xff]   ;;  %v515_v16 = vld [vmem:[%s573_s25] ss:$8 sps:$4 sm:$0xff]  }
  0x12   : > { %206 = vperm.xlu1 %501, %v188_v3   ;;  %196 = vperm.xlu0 %500, %v186_v4   ;;  %v273_v9 = vsel %vm271_vm0, %v464_v7, 0 }
  0x13   : > { %466 = vmatprep.subr.msk.bf16.mxu0 %vm271_vm0, %v465_v6  ;;  %480 = vmatprep.subr.msk.bf16.mxu1 %vm271_vm0, %v465_v6 }
  0x14   : > { %285 = vmatpush1.bf16.msra.mxu0 %v273_v9  ;;  %485 = vmatpush1.bf16.msra.mxu1 %v273_v9 }
  0x15   : > { %286 = vmatprep.subr.bf16.mxu0 %v504_v8  ;;  %481 = vmatprep.subr.bf16.mxu1 %v504_v8 }
  0x18   : > { %287 = vmatpush1.bf16.msra.mxu0 %v506_v10  ;;  %486 = vmatpush1.bf16.msra.mxu1 %v506_v10 }
  0x19   : > { %288 = vmatprep.subr.bf16.mxu0 %v507_v11  ;;  %482 = vmatprep.subr.bf16.mxu1 %v507_v11 }
  0x1c   : > { %289 = vmatpush1.bf16.msra.mxu0 %v509_v12  ;;  %487 = vmatpush1.bf16.msra.mxu1 %v509_v12 }
  0x1d   : > { %290 = vmatprep.subr.bf16.mxu0 %v510_v13  ;;  %483 = vmatprep.subr.bf16.mxu1 %v510_v13 }
  0x20   : > { %291 = vmatpush1.bf16.msra.mxu0 %v512_v14  ;;  %488 = vmatpush1.bf16.msra.mxu1 %v512_v14 }
  0x21   : > { %292 = vmatprep.subr.bf16.mxu0 %v513_v15  ;;  %484 = vmatprep.subr.bf16.mxu1 %v513_v15 }
  0x24   : > { %293 = vmatpush1.bf16.msra.mxu0 %v515_v16  ;;  %489 = vmatpush1.bf16.msra.mxu1 %v515_v16 }
  0x27   : > { %467 = vmatmul.mubr.msk.bf16.vlgmr.msra.gmra.mxu0 %vm264_vm1, %v516_v17  ;;  %468 = vmatmul.mubr.msk.bf16.vlgmr.msra.gmra.mxu1 %vm264_vm1, %v517_v18 }
  0x89   : > { %v202_v19 = vpop.permute.xlu1 %201  ;;  %v192_v20 = vpop.permute.xlu0 %191 }
  0x8d   : > { %v207_v29 = vpop.permute.xlu1 %206  ;;  %v197_v30 = vpop.permute.xlu0 %196 }
  0xe7   : > { %v312_v21 = vpop.f32.mrf.mxu0  ;;  %v322_v22 = vpop.f32.mrf.mxu1 }
  0xe8   : > { %v313_v23 = vadd.f32 %v312_v21, %v192_v20  ;;  %v323_v24 = vadd.f32 %v322_v22, %v202_v19 }
  0xe9   : > { %v314_v25 = vpop.f32.mrf.mxu0  ;;  %v324_v26 = vpop.f32.mrf.mxu1 }
  0xea   : > { %v339_v27 = vmul.f32 0.2, %v313_v23  ;;  %v343_v28 = vmul.f32 0.2, %v323_v24  ;;  %vm331_vm2 = vcmp.ge.f32.partialorder %v313_v23, 0.0  ;;  %vm335_vm3 = vcmp.ge.f32.partialorder %v323_v24, 0.0 }
  0xeb   : > { %v315_v31 = vadd.f32 %v314_v25, %v192_v20  ;;  %v325_v32 = vadd.f32 %v324_v26, %v202_v19  ;;  %v316_v33 = vpop.f32.mrf.mxu0  ;;  %v326_v34 = vpop.f32.mrf.mxu1 }
  0xec   : > { %v317_v35 = vadd.f32 %v316_v33, %v197_v30  ;;  %v327_v36 = vadd.f32 %v326_v34, %v207_v29  ;;  %v347_v41 = vsel %vm331_vm2, %v313_v23, %v339_v27  ;;  %v351_v42 = vsel %vm335_vm3, %v323_v24, %v343_v28 }
  0xed   : > { %vm332_vm4 = vcmp.ge.f32.partialorder %v315_v31, 0.0  ;;  %v340_v37 = vmul.f32 0.2, %v315_v31  ;;  %vm336_vm5 = vcmp.ge.f32.partialorder %v325_v32, 0.0  ;;  %v344_v38 = vmul.f32 0.2, %v325_v32  ;;  %v318_v39 = vpop.f32.mrf.mxu0  ;;  %v328_v40 = vpop.f32.mrf.mxu1 }
  0xee   : > { %v341_v43 = vmul.f32 0.2, %v317_v35  ;;  %v345_v44 = vmul.f32 0.2, %v327_v36  ;;  %v319_v47 = vadd.f32 %v318_v39, %v197_v30  ;;  %v329_v48 = vadd.f32 %v328_v40, %v207_v29 }
  0xef   : > { %v348_v45 = vsel %vm332_vm4, %v315_v31, %v340_v37  ;;  %v352_v46 = vsel %vm336_vm5, %v325_v32, %v344_v38  ;;  %vm333_vm6 = vcmp.ge.f32.partialorder %v317_v35, 0.0  ;;  %vm337_vm7 = vcmp.ge.f32.partialorder %v327_v36, 0.0 }
  0xf0   : > { %v476_v49 = vpack.c.bf16 %v348_v45, %v347_v41  ;;  %v478_v50 = vpack.c.bf16 %v352_v46, %v351_v42  ;;  %vm334_vm8 = vcmp.ge.f32.partialorder %v319_v47, 0.0  ;;  %v342_v51 = vmul.f32 0.2, %v319_v47 }
  0xf1   : > { %vm338_vm9 = vcmp.ge.f32.partialorder %v329_v48, 0.0  ;;  %v346_v52 = vmul.f32 0.2, %v329_v48  ;;  %v349_v53 = vsel %vm333_vm6, %v317_v35, %v341_v43  ;;  %v353_v54 = vsel %vm337_vm7, %v327_v36, %v345_v44 }
  0xf2   : > { %363 = vst [vmem:[%s170_s6] sm:$0xff] %v476_v49  ;;  %381 = vst [vmem:[%s170_s6 + $0x10] sm:$0xff] %v478_v50  ;;  %v350_v55 = vsel %vm334_vm8, %v319_v47, %v342_v51 }
  0xf3   : > { %v354_v56 = vsel %vm338_vm9, %v329_v48, %v346_v52  ;;  %v477_v57 = vpack.c.bf16 %v350_v55, %v349_v53 }
  0xf4   : > { %v479_v58 = vpack.c.bf16 %v354_v56, %v353_v54 }
  0xf5   : > { %372 = vst [vmem:[%s170_s6 + $0x8] sm:$0xff] %v477_v57 }
  0xf6   : > { %390 = vst [vmem:[%s170_s6 + $0x18] sm:$0xff] %v479_v58 }
  0xf7 PF: > { %s13_s12 = sadd.s32 1, %s524_s12  }
  0xf8   : > { %p10_p4 = scmp.ge.s32.totalorder %s13_s12, 4  }
  0xfa   :  { %12 = sbr.rel (!%p10_p4) target bundleno = 1 (0x1), region = 62 }

// kernel: _lambda_.18
= control target key start
LH: loop header
LB: loop body
LE: loop exit
PB: predicated region body
PF: predicated region fallthrough
CT: control target
= control target key end

     0   :  { %s1229_s24 = smov 0   ;;  %s1353_s0 = inlined_call_operand.vmem [shape: bf16[2,72,256], index: 0, kind: input, shape index: {}]   ;;  %s1354_s1 = inlined_call_operand.vmem [shape: bf16[2,8,1024], index: 1, kind: input, shape index: {}]   ;;  %s1355_s2 = inlined_call_operand.vmem [shape: bf16[32,72], index: 2, kind: input, shape index: {}]   ;;  %s1356_s3 = inlined_call_operand.vmem [shape: f32[32,1], index: 3, kind: input, shape index: {}]   ;;  %s1357_s4 = inlined_call_operand.vmem [shape: bf16[8,8], index: 4, kind: input, shape index: {}]   ;;  %s1358_s5 = inlined_call_operand.vmem [shape: bf16[8,8], index: 5, kind: input, shape index: {}]   ;;  %s1359_s6 = inlined_call_operand.vmem [shape: f32[8,1], index: 6, kind: input, shape index: {}]   ;;  %s1360_s7 = inlined_call_operand.vmem [shape: bf16[2,8,1024], index: 7, kind: output, shape index: {}]  }
   0x1 LB: > { %s1083_s25 = sadd.s32 4294967295, %s1186_s24   ;;  %p1087_p0 = scmp.ge.s32.totalorder %s1186_s24, 1  ;;  %s1186_s24 = sphi %s1229_s24, %s17_s24  }
   0x2   : > { %p247_p1 = scmp.lt.s32.totalorder %s1186_s24, 3 }
   0x4   : > { %p248_p2 = pnand %p1087_p0, %p247_p1 }
   0x5   : > { %p284_p3 = scmp.lt.s32.totalorder (!%p248_p2), %s1083_s25, 1 }
   0x6   : > { %251 = sbr.rel (%p248_p2) target bundleno = 488 (0x1e8), region = 48 }
   0xb   : > { %v1188_v0 = vmov 0   ;;  %s1362_s25 = smov (!%p284_p3, %s1083_s25), 1  ;;  %v313_v1 = vld [vmem:[%s1356_s3] sm:$0xff]  ;;  %v315_v2 = vld [vmem:[%s1356_s3 + $0x10] sm:$0xff]  ;;  %v314_v3 = vld [vmem:[%s1356_s3 + $0x8] sm:$0xff]  ;;  %vm399_vm0 = vcmask 1043456  }
   0xc   : > { %438 = vmatprep.mubr.bf16.mxu0 %v1188_v0  ;;  %1154 = vset.pattern.permute.xlu0 %v1188_v0  ;;  %s1144_s30 = smul.u32 72, %s1362_s25  ;;  %v316_v4 = vld [vmem:[%s1356_s3 + $0x18] sm:$0xff]  ;;  %v486_v9 = vld [vmem:[%s1359_s6] sm:$0xff]  ;;  %vm392_vm1 = vcmask 588800   ;;  %v1171_v19 = vld [vmem:[%s1355_s2 + $0x8] sm:$0xff]   ;;  %s1138_s21 = sshll.u32 %s1362_s25, 5 }
   0xd   : > { %1155 = vset.pattern.permute.xlu1 %v1188_v0  ;;  %534 = vmatprep.mubr.bf16.mxu1 %v1188_v0  ;;  %v1170_v18 = vld [vmem:[%s1355_s2] sm:$0xff]   ;;  %s1278_s26 = scalar_lea.vmem %s1354_s1, %s1138_s21  ;;  %vm492_vm6 = vcmask 64512   ;;  %s1344_s23 = scalar_lea.vmem %s1360_s7, %s1138_s21 }
   0xe   : > { %319 = vperm.xlu0 %1154, %v313_v1   ;;  %329 = vperm.xlu1 %1155, %v315_v2   ;;  %s288_s14 = scalar_lea.vmem %s1353_s0, %s1144_s30  ;;  %v544_v30 = vld [vmem:[%s1278_s26] sm:$0xff] }
   0xf   : > { %v308_v5 = vld [vmem:[%s288_s14 + $0x40] sm:$0xff]  ;;  %v1158_v8 = vld [vmem:[%s288_s14 + $0x34] ss:$8 sps:$4 sm:$0xff]   ;;  %v1160_v11 = vld [vmem:[%s288_s14 + $0x30] ss:$8 sps:$4 sm:$0xff]   ;;  %v1111_v39 = vcombine.high %v544_v30, %v544_v30  ;;  %v1110_v40 = vcombine.low %v544_v30, %v544_v30 }
  0x10   : > { %v1104_v6 = vcombine.high %v308_v5, %v308_v5  ;;  %v1103_v7 = vcombine.low %v308_v5, %v308_v5  ;;  %v1161_v12 = vld [vmem:[%s288_s14 + $0x24] ss:$8 sps:$4 sm:$0xff]   ;;  %v1163_v13 = vld [vmem:[%s288_s14 + $0x20] ss:$8 sps:$4 sm:$0xff]   ;;  %v1164_v14 = vld [vmem:[%s288_s14 + $0x14] ss:$8 sps:$4 sm:$0xff]  }
  0x11   : > { %v1166_v15 = vld [vmem:[%s288_s14 + $0x10] ss:$8 sps:$4 sm:$0xff]   ;;  %v1167_v16 = vld [vmem:[%s288_s14 + $0x4] ss:$8 sps:$4 sm:$0xff]   ;;  %v1169_v17 = vld [vmem:[%s288_s14] ss:$8 sps:$4 sm:$0xff]  }
  0x12   : > { %324 = vperm.xlu0 %1154, %v314_v3   ;;  %334 = vperm.xlu1 %1155, %v316_v4   ;;  %v401_v10 = vsel %vm399_vm0, %v1103_v7, 0  ;;  %v485_v50 = vld [vmem:[%s1358_s5] sm:$0xf]  ;;  %v554_v52 = vsel %vm399_vm0, %v1110_v40, 0 }
  0x13   : > { %1105 = vmatprep.subr.msk.bf16.mxu0 %vm399_vm0, %v1104_v6  ;;  %v677_v6 = vld [vmem:[%s1278_s26 + $0x8] sm:$0xff] }
  0x14   : > { %413 = vmatpush1.bf16.msra.mxu0 %v401_v10 }
  0x15   : > { %414 = vmatprep.subr.bf16.mxu0 %v1158_v8  ;;  %v543_v8 = vld [vmem:[%s1357_s4] sm:$0xf] }
  0x16   : > { %489 = vperm.xlu0 %1154, %v486_v9   ;;  %623 = vperm.xlu1 %1155, %v486_v9  }
  0x18   : > { %415 = vmatpush1.bf16.msra.mxu0 %v1160_v11 }
  0x19   : > { %416 = vmatprep.subr.bf16.mxu0 %v1161_v12  ;;  %v1118_v12 = vcombine.high %v677_v6, %v677_v6 }
  0x1a   : > { %756 = vperm.xlu0 %1154, %v486_v9   ;;  %889 = vperm.xlu1 %1155, %v486_v9   ;;  %v752_v9 = vld [vmem:[%s1358_s5] sm:$0xf] }
  0x1c   : > { %417 = vmatpush1.bf16.msra.mxu0 %v1163_v13 }
  0x1d   : > { %418 = vmatprep.subr.bf16.mxu0 %v1164_v14  ;;  %v1117_v14 = vcombine.low %v677_v6, %v677_v6 }
  0x20   : > { %419 = vmatpush1.bf16.msra.mxu0 %v1166_v15  ;;  %v810_v15 = vld [vmem:[%s1278_s26 + $0x10] sm:$0xff] }
  0x21   : > { %420 = vmatprep.subr.bf16.mxu0 %v1167_v16  ;;  %v619_v16 = vld [vmem:[%s1358_s5] sm:$0xf] }
  0x24   : > { %421 = vmatpush1.bf16.msra.mxu0 %v1169_v17  ;;  %v885_v17 = vld [vmem:[%s1358_s5] sm:$0xf] }
  0x27   : > { %1106 = vmatmul.mubr.msk.bf16.vlgmr.msra.gmra.mxu0 %vm392_vm1, %v1170_v18  ;;  %v687_v18 = vsel %vm399_vm0, %v1117_v14, 0 }
  0x28   : > { %448 = vmatprep.mubr.bf16.mxu0 %v1188_v0 }
  0x2f   : > { %1107 = vmatmul.mubr.msk.bf16.gmra.mxu0 %vm392_vm1, %v1171_v19  ;;  %v1125_v19 = vcombine.high %v810_v15, %v810_v15 }
  0x30   : > { %800 = vmatprep.mubr.bf16.mxu0 %v1188_v0 }
  0x89   : > { %v320_v20 = vpop.permute.xlu0 %319  ;;  %v330_v33 = vpop.permute.xlu1 %329 }
  0x8d   : > { %v325_v27 = vpop.permute.xlu0 %324  ;;  %v335_v46 = vpop.permute.xlu1 %334 }
  0xe7   : > { %v440_v21 = vpop.f32.mrf.mxu0 }
  0xe8   : > { %v441_v22 = vadd.f32 %v440_v21, %v320_v20  ;;  %v943_v21 = vld [vmem:[%s1278_s26 + $0x18] sm:$0xff] }
  0xe9   : > { %v442_v23 = vpop.f32.mrf.mxu0 }
  0xea   : > { %v467_v24 = vmul.f32 0.2, %v441_v22  ;;  %v443_v25 = vadd.f32 %v442_v23, %v320_v20  ;;  %vm459_vm2 = vcmp.ge.f32.partialorder %v441_v22, 0.0  ;;  %v1124_v20 = vcombine.low %v810_v15, %v810_v15 }
  0xeb   : > { %v444_v26 = vpop.f32.mrf.mxu0 }
  0xec   : > { %v468_v28 = vmul.f32 0.2, %v443_v25  ;;  %vm460_vm3 = vcmp.ge.f32.partialorder %v443_v25, 0.0  ;;  %v475_v29 = vsel %vm459_vm2, %v441_v22, %v467_v24  ;;  %v445_v31 = vadd.f32 %v444_v26, %v325_v27  ;;  %v676_v22 = vld [vmem:[%s1357_s4] sm:$0xf] }
  0xed   : > { %v446_v32 = vpop.f32.mrf.mxu0  ;;  %v483_v34 = vpack.c.bf16 %v475_v29, %v475_v29  ;;  %v820_v23 = vsel %vm399_vm0, %v1124_v20, 0  ;;  %v1132_v24 = vcombine.high %v943_v21, %v943_v21  ;;  %v809_v26 = vld [vmem:[%s1357_s4] sm:$0xf] }
  0xee   : > { %v447_v35 = vadd.f32 %v446_v32, %v325_v27  ;;  %v476_v36 = vsel %vm460_vm3, %v443_v25, %v468_v28  ;;  %vm461_vm5 = vcmp.ge.f32.partialorder %v445_v31, 0.0  ;;  %v469_v43 = vmul.f32 0.2, %v445_v31  ;;  %v942_v28 = vld [vmem:[%s1357_s4] sm:$0xf]  ;;  %v490_v32 = vpop.permute.xlu0 %489 }
  0xef   : > { %v450_v37 = vpop.f32.mrf.mxu0  ;;  %v484_v38 = vpack.c.bf16 %v476_v36, %v476_v36  ;;  %v497_v45 = vsel %vm399_vm0, %v483_v34, 0  ;;  %v1131_v25 = vcombine.low %v943_v21, %v943_v21 }
  0xf0   : > { %vm462_vm4 = vcmp.ge.f32.partialorder %v447_v35, 0.0  ;;  %v470_v41 = vmul.f32 0.2, %v447_v35  ;;  %v451_v42 = vadd.f32 %v450_v37, %v330_v33  ;;  %v477_v56 = vsel %vm461_vm5, %v445_v31, %v469_v43 }
  0xf1   : > { %v452_v44 = vpop.f32.mrf.mxu0  ;;  %1108 = vmatprep.subr.msk.bf16.mxu1 %vm399_vm0, %v484_v38  ;;  %v617_v4 = vpack.c.bf16 %v477_v56, %v477_v56  ;;  %v953_v27 = vsel %vm399_vm0, %v1131_v25, 0  ;;  %v624_v56 = vpop.permute.xlu1 %623 }
  0xf2   : > { %v478_v47 = vsel %vm462_vm4, %v447_v35, %v470_v41  ;;  %vm463_vm7 = vcmp.ge.f32.partialorder %v451_v42, 0.0  ;;  %v471_v48 = vmul.f32 0.2, %v451_v42  ;;  %v453_v49 = vadd.f32 %v452_v44, %v330_v33  ;;  %517 = vmatpush1.bf16.msra.mxu1 %v497_v45 }
  0xf3   : > { %v454_v51 = vpop.f32.mrf.mxu0  ;;  %1112 = vmatprep.subr.msk.bf16.mxu1 %vm399_vm0, %v1111_v39  ;;  %v618_v57 = vpack.c.bf16 %v478_v47, %v478_v47  ;;  %v630_v13 = vsel %vm399_vm0, %v617_v4, 0 }
  0xf4   : > { %v479_v53 = vsel %vm463_vm7, %v451_v42, %v471_v48  ;;  %vm464_vm8 = vcmp.ge.f32.partialorder %v453_v49, 0.0  ;;  %v472_v54 = vmul.f32 0.2, %v453_v49  ;;  %v455_v55 = vadd.f32 %v454_v51, %v335_v46 }
  0xf5   : > { %v750_v58 = vpack.c.bf16 %v479_v53, %v479_v53  ;;  %1109 = vmatmul.mubr.msk.bf16.vlgmr.msra.gmra.mxu1 %vm492_vm6, %v485_v50  ;;  %v456_v59 = vpop.f32.mrf.mxu0 }
  0xf6   : > { %v480_v60 = vsel %vm464_vm8, %v453_v49, %v472_v54  ;;  %vm465_vm9 = vcmp.ge.f32.partialorder %v455_v55, 0.0  ;;  %v473_v61 = vmul.f32 0.2, %v455_v55  ;;  %574 = vmatpush1.bf16.msra.mxu1 %v554_v52  ;;  %v457_v62 = vadd.f32 %v456_v59, %v335_v46  ;;  %591 = vmatprep.mubr.bf16.mxu1 %v1188_v0 }
  0xf7   : > { %v751_v63 = vpack.c.bf16 %v480_v60, %v480_v60  ;;  %1115 = vmatprep.subr.msk.bf16.mxu1 %vm399_vm0, %v618_v57  ;;  %v763_v1 = vsel %vm399_vm0, %v750_v58, 0 }
  0xf8   : > { %v481_v2 = vsel %vm465_vm9, %v455_v55, %v473_v61  ;;  %vm466_vm10 = vcmp.ge.f32.partialorder %v457_v62, 0.0  ;;  %v474_v3 = vmul.f32 0.2, %v457_v62 }
  0xf9   : > { %v883_v5 = vpack.c.bf16 %v481_v2, %v481_v2  ;;  %1122 = vmatprep.subr.msk.bf16.mxu0 %vm399_vm0, %v751_v63 }
  0xfa   : > { %v482_v7 = vsel %vm466_vm10, %v457_v62, %v474_v3  ;;  %783 = vmatpush1.bf16.msra.mxu0 %v763_v1 }
  0xfb   : > { %v884_v10 = vpack.c.bf16 %v482_v7, %v482_v7  ;;  %v896_v11 = vsel %vm399_vm0, %v883_v5, 0  ;;  %v757_v5 = vpop.permute.xlu0 %756 }
  0xfd   : > { %1113 = vmatmul.mubr.msk.bf16.vlgmr.msra.gmra.mxu1 %vm492_vm6, %v543_v8  ;;  %1123 = vmatmul.mubr.msk.bf16.vlgmr.msra.gmra.mxu0 %vm492_vm6, %v752_v9 }
  0xfe   : > { %650 = vmatpush1.bf16.msra.mxu1 %v630_v13  ;;  %1129 = vmatprep.subr.msk.bf16.mxu0 %vm399_vm0, %v884_v10 }
  0xff   : > { %916 = vmatpush1.bf16.msra.mxu0 %v896_v11  ;;  %667 = vmatprep.mubr.bf16.mxu1 %v1188_v0 }
 0x100   : > { %933 = vmatprep.mubr.bf16.mxu0 %v1188_v0  ;;  %1119 = vmatprep.subr.msk.bf16.mxu1 %vm399_vm0, %v1118_v12 }
 0x105   : > { %1116 = vmatmul.mubr.msk.bf16.vlgmr.msra.gmra.mxu1 %vm492_vm6, %v619_v16  ;;  %1130 = vmatmul.mubr.msk.bf16.vlgmr.msra.gmra.mxu0 %vm492_vm6, %v885_v17 }
 0x106   : > { %707 = vmatpush1.bf16.msra.mxu1 %v687_v18  ;;  %724 = vmatprep.mubr.bf16.mxu1 %v1188_v0 }
 0x107   : > { %1126 = vmatprep.subr.msk.bf16.mxu1 %vm399_vm0, %v1125_v19  ;;  %v890_v19 = vpop.permute.xlu1 %889 }
 0x10d   : > { %1120 = vmatmul.mubr.msk.bf16.vlgmr.msra.gmra.mxu1 %vm492_vm6, %v676_v22 }
 0x10e   : > { %840 = vmatpush1.bf16.msra.mxu1 %v820_v23  ;;  %857 = vmatprep.mubr.bf16.mxu1 %v1188_v0 }
 0x10f   : > { %1133 = vmatprep.subr.msk.bf16.mxu1 %vm399_vm0, %v1132_v24 }
 0x115   : > { %1127 = vmatmul.mubr.msk.bf16.vlgmr.msra.gmra.mxu1 %vm492_vm6, %v809_v26 }
 0x116   : > { %973 = vmatpush1.bf16.msra.mxu1 %v953_v27  ;;  %990 = vmatprep.mubr.bf16.mxu1 %v1188_v0 }
 0x11d   : > { %1134 = vmatmul.mubr.msk.bf16.vlgmr.msra.gmra.mxu1 %vm492_vm6, %v942_v28 }
 0x1b5   : > { %v536_v29 = vpop.f32.mrf.mxu1 }
 0x1b6   : > { %v537_v34 = vadd.f32 %v536_v29, %v490_v32 }
 0x1b7   : > { %v538_v30 = vpop.f32.mrf.mxu1 }
 0x1b8   : > { %v539_v37 = vadd.f32 %v538_v30, %v490_v32 }
 0x1b9   : > { %v540_v31 = vpop.f32.mrf.mxu1 }
 0x1bb   : > { %v541_v33 = vpop.f32.mrf.mxu1 }
 0x1bd   : > { %v593_v35 = vpop.f32.mrf.mxu1  ;;  %v802_v36 = vpop.f32.mrf.mxu0 }
 0x1be   : > { %v600_v38 = vadd.f32 %v593_v35, %v537_v34  ;;  %v803_v7 = vadd.f32 %v802_v36, %v757_v5 }
 0x1bf   : > { %v595_v39 = vpop.f32.mrf.mxu1  ;;  %v804_v40 = vpop.f32.mrf.mxu0 }
 0x1c0   : > { %v604_v0 = vmul.f32 0.2, %v600_v38  ;;  %v601_v41 = vadd.f32 %v595_v39, %v539_v37  ;;  %vm602_vm11 = vcmp.ge.f32.partialorder %v600_v38, 0.0  ;;  %v805_v12 = vadd.f32 %v804_v40, %v757_v5 }
 0x1c1   : > { %v597_v42 = vpop.f32.mrf.mxu1  ;;  %v806_v43 = vpop.f32.mrf.mxu0 }
 0x1c2   : > { %vm603_vm12 = vcmp.ge.f32.partialorder %v601_v41, 0.0  ;;  %v605_v44 = vmul.f32 0.2, %v601_v41  ;;  %v606_v47 = vsel %vm602_vm11, %v600_v38, %v604_v0 }
 0x1c3   : > { %v598_v45 = vpop.f32.mrf.mxu1  ;;  %v807_v46 = vpop.f32.mrf.mxu0 }
 0x1c4   : > { %v607_v48 = vsel %vm603_vm12, %v601_v41, %v605_v44 }
 0x1c5   : > { %v1140_v49 = vpack.c.bf16 %v607_v48, %v606_v47  ;;  %v669_v50 = vpop.f32.mrf.mxu1  ;;  %v935_v51 = vpop.f32.mrf.mxu0 }
 0x1c6   : > { %v670_v59 = vadd.f32 %v669_v50, %v624_v56  ;;  %v936_v21 = vadd.f32 %v935_v51, %v890_v19 }
 0x1c7   : > { %616 = vst [vmem:[%s1344_s23] sm:$0xff] %v1140_v49  ;;  %v671_v52 = vpop.f32.mrf.mxu1  ;;  %v937_v53 = vpop.f32.mrf.mxu0 }
 0x1c8   : > { %v672_v61 = vadd.f32 %v671_v52, %v624_v56  ;;  %v938_v26 = vadd.f32 %v937_v53, %v890_v19 }
 0x1c9   : > { %v673_v54 = vpop.f32.mrf.mxu1  ;;  %v939_v55 = vpop.f32.mrf.mxu0 }
 0x1cb   : > { %v674_v57 = vpop.f32.mrf.mxu1  ;;  %v940_v58 = vpop.f32.mrf.mxu0 }
 0x1cd   : > { %v726_v60 = vpop.f32.mrf.mxu1 }
 0x1ce   : > { %v733_v62 = vadd.f32 %v726_v60, %v670_v59 }
 0x1cf   : > { %v728_v63 = vpop.f32.mrf.mxu1 }
 0x1d0   : > { %v737_v1 = vmul.f32 0.2, %v733_v62  ;;  %v734_v2 = vadd.f32 %v728_v63, %v672_v61  ;;  %vm735_vm13 = vcmp.ge.f32.partialorder %v733_v62, 0.0 }
 0x1d1   : > { %v730_v3 = vpop.f32.mrf.mxu1 }
 0x1d2   : > { %vm736_vm14 = vcmp.ge.f32.partialorder %v734_v2, 0.0  ;;  %v738_v4 = vmul.f32 0.2, %v734_v2  ;;  %v739_v8 = vsel %vm735_vm13, %v733_v62, %v737_v1 }
 0x1d3   : > { %v731_v6 = vpop.f32.mrf.mxu1 }
 0x1d4   : > { %v740_v9 = vsel %vm736_vm14, %v734_v2, %v738_v4 }
 0x1d5   : > { %v1141_v10 = vpack.c.bf16 %v740_v9, %v739_v8  ;;  %v859_v11 = vpop.f32.mrf.mxu1 }
 0x1d6   : > { %v866_v13 = vadd.f32 %v859_v11, %v803_v7 }
 0x1d7   : > { %749 = vst [vmem:[%s1344_s23 + $0x8] sm:$0xff] %v1141_v10  ;;  %v861_v14 = vpop.f32.mrf.mxu1 }
 0x1d8   : > { %v870_v15 = vmul.f32 0.2, %v866_v13  ;;  %v867_v16 = vadd.f32 %v861_v14, %v805_v12  ;;  %vm868_vm15 = vcmp.ge.f32.partialorder %v866_v13, 0.0 }
 0x1d9   : > { %v863_v17 = vpop.f32.mrf.mxu1 }
 0x1da   : > { %vm869_vm0 = vcmp.ge.f32.partialorder %v867_v16, 0.0  ;;  %v871_v18 = vmul.f32 0.2, %v867_v16  ;;  %v872_v22 = vsel %vm868_vm15, %v866_v13, %v870_v15 }
 0x1db   : > { %v864_v20 = vpop.f32.mrf.mxu1 }
 0x1dc   : > { %v873_v23 = vsel %vm869_vm0, %v867_v16, %v871_v18 }
 0x1dd   : > { %v1142_v24 = vpack.c.bf16 %v873_v23, %v872_v22  ;;  %v992_v25 = vpop.f32.mrf.mxu1 }
 0x1de   : > { %v999_v27 = vadd.f32 %v992_v25, %v936_v21 }
 0x1df   : > { %882 = vst [vmem:[%s1344_s23 + $0x10] sm:$0xff] %v1142_v24  ;;  %v994_v28 = vpop.f32.mrf.mxu1 }
 0x1e0   : > { %v1003_v29 = vmul.f32 0.2, %v999_v27  ;;  %v1000_v30 = vadd.f32 %v994_v28, %v938_v26  ;;  %vm1001_vm1 = vcmp.ge.f32.partialorder %v999_v27, 0.0 }
 0x1e1   : > { %v996_v31 = vpop.f32.mrf.mxu1 }
 0x1e2   : > { %vm1002_vm2 = vcmp.ge.f32.partialorder %v1000_v30, 0.0  ;;  %v1004_v32 = vmul.f32 0.2, %v1000_v30  ;;  %v1005_v34 = vsel %vm1001_vm1, %v999_v27, %v1003_v29 }
 0x1e3   : > { %v997_v33 = vpop.f32.mrf.mxu1 }
 0x1e4   : > { %v1006_v35 = vsel %vm1002_vm2, %v1000_v30, %v1004_v32 }
 0x1e5   : > { %v1143_v36 = vpack.c.bf16 %v1006_v35, %v1005_v34 }
 0x1e7   : > { %1015 = vst [vmem:[%s1344_s23 + $0x18] sm:$0xff] %v1143_v36 }
 0x1e8 PF: > { %s17_s24 = sadd.s32 1, %s1186_s24  }
 0x1e9   : > { %p14_p4 = scmp.ge.s32.totalorder %s17_s24, 4  }
 0x1eb   :  { %16 = sbr.rel (!%p14_p4) target bundleno = 1 (0x1), region = 81 }

// kernel: _lambda_.17
= control target key start
LH: loop header
LB: loop body
LE: loop exit
PB: predicated region body
PF: predicated region fallthrough
CT: control target
= control target key end

     0   :  { %s1099_s27 = smov 0   ;;  %s1197_s0 = inlined_call_operand.vmem [shape: bf16[2,288,256], index: 0, kind: input, shape index: {}]   ;;  %s1198_s1 = inlined_call_operand.vmem [shape: bf16[2,8,256], index: 1, kind: input, shape index: {}]   ;;  %s1199_s2 = inlined_call_operand.vmem [shape: bf16[8,288], index: 2, kind: input, shape index: {}]   ;;  %s1200_s3 = inlined_call_operand.vmem [shape: f32[8,1], index: 3, kind: input, shape index: {}]   ;;  %s1201_s4 = inlined_call_operand.vmem [shape: bf16[8,8], index: 4, kind: input, shape index: {}]   ;;  %s1202_s5 = inlined_call_operand.vmem [shape: bf16[8,8], index: 5, kind: input, shape index: {}]   ;;  %s1203_s6 = inlined_call_operand.vmem [shape: f32[8,1], index: 6, kind: input, shape index: {}]   ;;  %s1204_s7 = inlined_call_operand.vmem [shape: bf16[2,8,256], index: 7, kind: output, shape index: {0}]   ;;  %s1205_s8 = inlined_call_operand.vmem [shape: bf16[2,8,256], index: 8, kind: output, shape index: {1}]  }
   0x1 LB: > { %s908_s28 = sadd.s32 4294967295, %s1051_s27   ;;  %p912_p0 = scmp.ge.s32.totalorder %s1051_s27, 1  ;;  %s1051_s27 = sphi %s1099_s27, %s19_s27  }
   0x2   : > { %p275_p1 = scmp.lt.s32.totalorder %s1051_s27, 3 }
   0x4   : > { %p276_p2 = pnand %p912_p0, %p275_p1 }
   0x5   : > { %p319_p3 = scmp.lt.s32.totalorder (!%p276_p2), %s908_s28, 1 }
   0x6   : > { %279 = sbr.rel (%p276_p2) target bundleno = 499 (0x1f3), region = 48 }
   0xb   : > { %v1053_v0 = vmov 0   ;;  %v1111_v1 = vld [vmem:[%s1199_s2] sm:$0xff]  ;;  %s1207_s28 = smov (!%p319_p3, %s908_s28), 1  ;;  %v1039_v24 = vld [vmem:[%s1199_s2 + $0x8] ss:$0 sps:$4 sm:$0xff]   ;;  %vm574_vm0 = vcmask 261120  }
   0xc   : > { %651 = vmatprep.mubr.bf16.mxu1 %v1053_v0  ;;  %985 = vset.pattern.permute.xlu0 %v1053_v0  ;;  %v378_v2 = vld [vmem:[%s1200_s3] sm:$0xff]  ;;  %v921_v3 = vcombine.high %v1111_v1, %v1111_v1  ;;  %s975_s13 = smul.u32 288, %s1207_s28  ;;  %v920_v42 = vcombine.low %v1111_v1, %v1111_v1  ;;  %s1173_s19 = sshll.u32 %s1207_s28, 3  ;;  %vm686_vm3 = vcmask 1043456   ;;  %vm682_vm4 = vcmask 64512  }
   0xd   : > { %381 = vperm.xlu0 %985, %v378_v2   ;;  %v676_v4 = vld [vmem:[%s1203_s6] sm:$0xff]  ;;  %s328_s22 = scalar_lea.vmem %s1198_s1, %s1173_s19  ;;  %s333_s25 = scalar_lea.vmem %s1204_s7, %s1173_s19 }
   0xe   : > { %610 = vmatprep.mubr.bf16.mxu0 %v921_v3  ;;  %s1128_s16 = scalar_lea.vmem %s1197_s0, %s975_s13  ;;  %v735_v59 = vld [vmem:[%s328_s22] sm:$0xff]  ;;  %s338_s11 = scalar_lea.vmem %s1205_s8, %s1173_s19 }
   0xf   : > { %v986_v5 = vld [vmem:[%s1128_s16 + $0x74] ss:$8 sps:$4 sm:$0xff]   ;;  %v988_v6 = vld [vmem:[%s1128_s16 + $0x70] ss:$8 sps:$4 sm:$0xff]   ;;  %v989_v7 = vld [vmem:[%s1128_s16 + $0x64] ss:$8 sps:$4 sm:$0xff]   ;;  %v964_v1 = vcombine.high %v735_v59, %v735_v59  ;;  %v963_v2 = vcombine.low %v735_v59, %v735_v59 }
  0x10   : > { %578 = vmatprep.subr.bf16.mxu0 %v986_v5  ;;  %v991_v8 = vld [vmem:[%s1128_s16 + $0x60] ss:$8 sps:$4 sm:$0xff]   ;;  %v992_v9 = vld [vmem:[%s1128_s16 + $0x54] ss:$8 sps:$4 sm:$0xff]   ;;  %v994_v10 = vld [vmem:[%s1128_s16 + $0x50] ss:$8 sps:$4 sm:$0xff]  }
  0x11   : > { %679 = vperm.xlu0 %985, %v676_v4   ;;  %579 = vmatpush1.bf16.msra.mxu0 %v988_v6  ;;  %v995_v11 = vld [vmem:[%s1128_s16 + $0x44] ss:$8 sps:$4 sm:$0xff]   ;;  %v997_v12 = vld [vmem:[%s1128_s16 + $0x40] ss:$8 sps:$4 sm:$0xff]   ;;  %v998_v13 = vld [vmem:[%s1128_s16 + $0x34] ss:$8 sps:$4 sm:$0xff]  }
  0x12   : > { %580 = vmatprep.subr.bf16.mxu0 %v989_v7  ;;  %v1000_v14 = vld [vmem:[%s1128_s16 + $0x30] ss:$8 sps:$4 sm:$0xff]   ;;  %v1001_v15 = vld [vmem:[%s1128_s16 + $0x24] ss:$8 sps:$4 sm:$0xff]   ;;  %v1003_v16 = vld [vmem:[%s1128_s16 + $0x20] ss:$8 sps:$4 sm:$0xff]  }
  0x13   : > { %v1027_v17 = vld [vmem:[%s1128_s16 + $0x114] ss:$8 sps:$4 sm:$0xff]   ;;  %v1030_v18 = vld [vmem:[%s1128_s16 + $0x110] ss:$8 sps:$4 sm:$0xff]   ;;  %v1033_v20 = vld [vmem:[%s1128_s16 + $0x104] ss:$8 sps:$4 sm:$0xff]  }
  0x14   : > { %v1004_v19 = vld [vmem:[%s1128_s16 + $0x14] ss:$8 sps:$4 sm:$0xff]   ;;  %631 = vmatprep.subr.bf16.mxu1 %v1027_v17  ;;  %v1036_v21 = vld [vmem:[%s1128_s16 + $0x100] ss:$8 sps:$4 sm:$0xff]   ;;  %v1006_v22 = vld [vmem:[%s1128_s16 + $0x10] ss:$8 sps:$4 sm:$0xff]  }
  0x15   : > { %581 = vmatpush1.bf16.msra.mxu0 %v991_v8  ;;  %632 = vmatpush1.bf16.msra.mxu1 %v1030_v18  ;;  %v1007_v23 = vld [vmem:[%s1128_s16 + $0x4] ss:$8 sps:$4 sm:$0xff]   ;;  %v1009_v25 = vld [vmem:[%s1128_s16] ss:$8 sps:$4 sm:$0xff]   ;;  %v1010_v26 = vld [vmem:[%s1128_s16 + $0xf4] ss:$8 sps:$4 sm:$0xff]  }
  0x16   : > { %582 = vmatprep.subr.bf16.mxu0 %v992_v9  ;;  %633 = vmatprep.subr.bf16.mxu1 %v1033_v20  ;;  %v1012_v27 = vld [vmem:[%s1128_s16 + $0xf0] ss:$8 sps:$4 sm:$0xff]   ;;  %v1013_v28 = vld [vmem:[%s1128_s16 + $0xe4] ss:$8 sps:$4 sm:$0xff]   ;;  %v1015_v29 = vld [vmem:[%s1128_s16 + $0xe0] ss:$8 sps:$4 sm:$0xff]  }
  0x17   : > { %v1016_v30 = vld [vmem:[%s1128_s16 + $0xd4] ss:$8 sps:$4 sm:$0xff]   ;;  %v1018_v31 = vld [vmem:[%s1128_s16 + $0xd0] ss:$8 sps:$4 sm:$0xff]   ;;  %v1019_v32 = vld [vmem:[%s1128_s16 + $0xc4] ss:$8 sps:$4 sm:$0xff]  }
  0x18   : > { %v1021_v33 = vld [vmem:[%s1128_s16 + $0xc0] ss:$8 sps:$4 sm:$0xff]   ;;  %v1022_v34 = vld [vmem:[%s1128_s16 + $0xb4] ss:$8 sps:$4 sm:$0xff]   ;;  %v1024_v35 = vld [vmem:[%s1128_s16 + $0xb0] ss:$8 sps:$4 sm:$0xff]  }
  0x19   : > { %583 = vmatpush1.bf16.msra.mxu0 %v994_v10  ;;  %634 = vmatpush1.bf16.msra.mxu1 %v1036_v21  ;;  %v1025_v36 = vld [vmem:[%s1128_s16 + $0xa4] ss:$8 sps:$4 sm:$0xff]   ;;  %v1029_v37 = vld [vmem:[%s1128_s16 + $0xa0] ss:$8 sps:$4 sm:$0xff]   ;;  %v1031_v38 = vld [vmem:[%s1128_s16 + $0x94] ss:$8 sps:$4 sm:$0xff]  }
  0x1a   : > { %584 = vmatprep.subr.bf16.mxu0 %v995_v11  ;;  %v1035_v39 = vld [vmem:[%s1128_s16 + $0x90] ss:$8 sps:$4 sm:$0xff]   ;;  %v1037_v40 = vld [vmem:[%s1128_s16 + $0x84] ss:$8 sps:$4 sm:$0xff]   ;;  %v1040_v41 = vld [vmem:[%s1128_s16 + $0x80] ss:$8 sps:$4 sm:$0xff]  }
  0x1b   : > { %v675_v4 = vld [vmem:[%s1202_s5] sm:$0xf]  ;;  %v745_v5 = vsel %vm686_vm3, %v963_v2, 0 }
  0x1c   : > { %959 = vmatmul.mubr.msk.bf16.vlgmr.msra.gmra.mxu1 %vm574_vm0, %v1039_v24  ;;  %v734_v6 = vld [vmem:[%s1201_s4] sm:$0xf] }
  0x1d   : > { %585 = vmatpush1.bf16.msra.mxu0 %v997_v12  ;;  %725 = vmatprep.mubr.bf16.mxu1 %v1053_v0 }
  0x1e   : > { %586 = vmatprep.subr.bf16.mxu0 %v998_v13 }
  0x21   : > { %587 = vmatpush1.bf16.msra.mxu0 %v1000_v14 }
  0x22   : > { %588 = vmatprep.subr.bf16.mxu0 %v1001_v15 }
  0x25   : > { %589 = vmatpush1.bf16.msra.mxu0 %v1003_v16 }
  0x26   : > { %590 = vmatprep.subr.bf16.mxu0 %v1004_v19 }
  0x29   : > { %591 = vmatpush1.bf16.msra.mxu0 %v1006_v22 }
  0x2a   : > { %592 = vmatprep.subr.bf16.mxu0 %v1007_v23 }
  0x2d   : > { %593 = vmatpush1.bf16.msra.mxu0 %v1009_v25 }
  0x2e   : > { %594 = vmatprep.subr.bf16.mxu0 %v1010_v26 }
  0x31   : > { %595 = vmatpush2.bf16.msra.mxu0 %v1012_v27 }
  0x32   : > { %596 = vmatprep.subr.bf16.mxu0 %v1013_v28 }
  0x35   : > { %597 = vmatpush2.bf16.msra.mxu0 %v1015_v29 }
  0x36   : > { %598 = vmatprep.subr.bf16.mxu0 %v1016_v30 }
  0x39   : > { %599 = vmatpush2.bf16.msra.mxu0 %v1018_v31 }
  0x3a   : > { %600 = vmatprep.subr.bf16.mxu0 %v1019_v32 }
  0x3d   : > { %601 = vmatpush2.bf16.msra.mxu0 %v1021_v33 }
  0x3e   : > { %602 = vmatprep.subr.bf16.mxu0 %v1022_v34 }
  0x41   : > { %603 = vmatpush2.bf16.msra.mxu0 %v1024_v35 }
  0x42   : > { %604 = vmatprep.subr.bf16.mxu0 %v1025_v36 }
  0x45   : > { %605 = vmatpush2.bf16.msra.mxu0 %v1029_v37 }
  0x46   : > { %606 = vmatprep.subr.bf16.mxu0 %v1031_v38 }
  0x49   : > { %607 = vmatpush2.bf16.msra.mxu0 %v1035_v39 }
  0x4a   : > { %608 = vmatprep.subr.bf16.mxu0 %v1037_v40 }
  0x4d   : > { %609 = vmatpush2.bf16.msra.mxu0 %v1040_v41 }
  0x50   : > { %611 = vmatmul.mubr.bf16.vlgmr.msra.gmra.mxu0 %v920_v42 }
  0x88   : > { %v382_v47 = vpop.permute.xlu0 %381 }
  0x8c   : > { %v680_v10 = vpop.permute.xlu0 %679 }
  0xdc   : > { %v653_v43 = vpop.f32.mrf.mxu1 }
  0xde   : > { %v655_v44 = vpop.f32.mrf.mxu1 }
  0xe0   : > { %v657_v45 = vpop.f32.mrf.mxu1 }
  0xe2   : > { %v658_v46 = vpop.f32.mrf.mxu1 }
 0x110   : > { %v612_v48 = vpop.f32.mrf.mxu0 }
 0x111   : > { %v613_v49 = vadd.f32 %v612_v48, %v382_v47 }
 0x112   : > { %v614_v50 = vpop.f32.mrf.mxu0 }
 0x113   : > { %v654_v51 = vadd.f32 %v653_v43, %v613_v49  ;;  %v615_v52 = vadd.f32 %v614_v50, %v382_v47 }
 0x114   : > { %v616_v53 = vpop.f32.mrf.mxu0 }
 0x115   : > { %vm660_vm1 = vcmp.ge.f32.partialorder %v654_v51, 0.0  ;;  %v662_v54 = vmul.f32 0.2, %v654_v51  ;;  %v656_v55 = vadd.f32 %v655_v44, %v615_v52 }
 0x116   : > { %v617_v56 = vpop.f32.mrf.mxu0 }
 0x117   : > { %vm661_vm2 = vcmp.ge.f32.partialorder %v656_v55, 0.0  ;;  %v663_v57 = vmul.f32 0.2, %v656_v55  ;;  %v664_v58 = vsel %vm660_vm1, %v654_v51, %v662_v54 }
 0x118   : > { %v666_v60 = vpack.c.bf16 %v664_v58, %v664_v58 }
 0x119   : > { %v665_v61 = vsel %vm661_vm2, %v656_v55, %v663_v57 }
 0x11a   : > { %v667_v62 = vpack.c.bf16 %v665_v61, %v665_v61  ;;  %v973_v63 = vpack.c.bf16 %v665_v61, %v664_v58  ;;  %v688_v3 = vsel %vm686_vm3, %v666_v60, 0 }
 0x11c   : > { %961 = vmatprep.subr.msk.bf16.mxu1 %vm686_vm3, %v667_v62  ;;  %674 = vst [vmem:[%s333_s25] sm:$0xff] %v973_v63 }
 0x11d   : > { %708 = vmatpush1.bf16.msra.mxu1 %v688_v3 }
 0x11e   : > { %965 = vmatprep.subr.msk.bf16.mxu1 %vm686_vm3, %v964_v1 }
 0x120   : > { %962 = vmatmul.mubr.msk.bf16.vlgmr.msra.gmra.mxu1 %vm682_vm4, %v675_v4 }
 0x121   : > { %765 = vmatpush1.bf16.msra.mxu1 %v745_v5  ;;  %782 = vmatprep.mubr.bf16.mxu1 %v1053_v0 }
 0x128   : > { %966 = vmatmul.mubr.msk.bf16.vlgmr.msra.gmra.mxu1 %vm682_vm4, %v734_v6 }
 0x1e0   : > { %v727_v7 = vpop.f32.mrf.mxu1 }
 0x1e1   : > { %v728_v12 = vadd.f32 %v727_v7, %v680_v10 }
 0x1e2   : > { %v729_v8 = vpop.f32.mrf.mxu1 }
 0x1e3   : > { %v730_v14 = vadd.f32 %v729_v8, %v680_v10 }
 0x1e4   : > { %v731_v9 = vpop.f32.mrf.mxu1 }
 0x1e6   : > { %v732_v11 = vpop.f32.mrf.mxu1 }
 0x1e8   : > { %v784_v13 = vpop.f32.mrf.mxu1 }
 0x1e9   : > { %v791_v15 = vadd.f32 %v784_v13, %v728_v12 }
 0x1ea   : > { %v786_v16 = vpop.f32.mrf.mxu1 }
 0x1eb   : > { %v795_v17 = vmul.f32 0.2, %v791_v15  ;;  %v792_v18 = vadd.f32 %v786_v16, %v730_v14  ;;  %vm793_vm5 = vcmp.ge.f32.partialorder %v791_v15, 0.0 }
 0x1ec   : > { %v788_v0 = vpop.f32.mrf.mxu1 }
 0x1ed   : > { %vm794_vm6 = vcmp.ge.f32.partialorder %v792_v18, 0.0  ;;  %v796_v19 = vmul.f32 0.2, %v792_v18  ;;  %v797_v21 = vsel %vm793_vm5, %v791_v15, %v795_v17 }
 0x1ee   : > { %v789_v20 = vpop.f32.mrf.mxu1 }
 0x1ef   : > { %v798_v22 = vsel %vm794_vm6, %v792_v18, %v796_v19 }
 0x1f0   : > { %v974_v23 = vpack.c.bf16 %v798_v22, %v797_v21 }
 0x1f2   : > { %807 = vst [vmem:[%s338_s11] sm:$0xff] %v974_v23 }
 0x1f3 PF: > { %s19_s27 = sadd.s32 1, %s1051_s27  }
 0x1f4   : > { %p16_p4 = scmp.ge.s32.totalorder %s19_s27, 4  }
 0x1f6   :  { %18 = sbr.rel (!%p16_p4) target bundleno = 1 (0x1), region = 93 }

// kernel: _lambda_.19
= control target key start
LH: loop header
LB: loop body
LE: loop exit
PB: predicated region body
PF: predicated region fallthrough
CT: control target
= control target key end

     0   :  { %s1395_s21 = smov 0   ;;  %s1521_s0 = inlined_call_operand.vmem [shape: bf16[2,288,256], index: 0, kind: input, shape index: {}]   ;;  %s1522_s1 = inlined_call_operand.vmem [shape: bf16[2,8,256], index: 1, kind: input, shape index: {}]   ;;  %s1523_s2 = inlined_call_operand.vmem [shape: bf16[2,8,256], index: 2, kind: input, shape index: {}]   ;;  %s1524_s3 = inlined_call_operand.vmem [shape: bf16[8,288], index: 3, kind: input, shape index: {}]   ;;  %s1525_s4 = inlined_call_operand.vmem [shape: f32[8,1], index: 4, kind: input, shape index: {}]   ;;  %s1526_s5 = inlined_call_operand.vmem [shape: bf16[8,8], index: 5, kind: input, shape index: {}]   ;;  %s1527_s6 = inlined_call_operand.vmem [shape: bf16[8,8], index: 6, kind: input, shape index: {}]   ;;  %s1528_s7 = inlined_call_operand.vmem [shape: f32[8,1], index: 7, kind: input, shape index: {}]   ;;  %s1529_s8 = inlined_call_operand.vmem [shape: bf16[8,8], index: 8, kind: input, shape index: {}]   ;;  %s1530_s9 = inlined_call_operand.vmem [shape: bf16[8,8], index: 9, kind: input, shape index: {}]   ;;  %s1531_s10 = inlined_call_operand.vmem [shape: f32[8,1], index: 10, kind: input, shape index: {}]   ;;  %s1532_s11 = inlined_call_operand.vmem [shape: bf16[2,8,256], index: 11, kind: output, shape index: {0}]   ;;  %s1533_s12 = inlined_call_operand.vmem [shape: bf16[2,8,256], index: 12, kind: output, shape index: {1}]  }
   0x1 LB: > { %s1172_s22 = sadd.s32 4294967295, %s1327_s21   ;;  %p1176_p0 = scmp.ge.s32.totalorder %s1327_s21, 1  ;;  %s1327_s21 = sphi %s1395_s21, %s23_s21  }
   0x2   : > { %p385_p1 = scmp.lt.s32.totalorder %s1327_s21, 3 }
   0x4   : > { %p386_p2 = pnand %p1176_p0, %p385_p1 }
   0x5   : > { %p442_p3 = scmp.lt.s32.totalorder (!%p386_p2), %s1172_s22, 1 }
   0x6   : > { %389 = sbr.rel (%p386_p2) target bundleno = 715 (0x2cb), region = 64 }
   0xb   : > { %v1329_v0 = vmov 0   ;;  %v1407_v1 = vld [vmem:[%s1524_s3] sm:$0xff]  ;;  %s1535_s22 = smov (!%p442_p3, %s1172_s22), 1  ;;  %v1313_v24 = vld [vmem:[%s1524_s3 + $0x8] ss:$0 sps:$4 sm:$0xff]   ;;  %vm702_vm0 = vcmask 261120  }
   0xc   : > { %779 = vmatprep.mubr.bf16.mxu1 %v1329_v0  ;;  %1258 = vset.pattern.permute.xlu0 %v1329_v0  ;;  %v506_v2 = vld [vmem:[%s1525_s4] sm:$0xff]  ;;  %v1187_v3 = vcombine.high %v1407_v1, %v1407_v1  ;;  %s1248_s29 = smul.u32 288, %s1535_s22  ;;  %v1186_v42 = vcombine.low %v1407_v1, %v1407_v1  ;;  %s1470_s17 = sshll.u32 %s1535_s22, 3  ;;  %vm807_vm3 = vcmask 1043456   ;;  %vm803_vm4 = vcmask 64512  }
   0xd   : > { %509 = vperm.xlu0 %1258, %v506_v2   ;;  %1259 = vset.pattern.permute.xlu1 %v1329_v0  ;;  %v797_v4 = vld [vmem:[%s1528_s7] sm:$0xff]  ;;  %s451_s20 = scalar_lea.vmem %s1522_s1, %s1470_s17  ;;  %s456_s30 = scalar_lea.vmem %s1523_s2, %s1470_s17 }
   0xe   : > { %738 = vmatprep.mubr.bf16.mxu0 %v1187_v3  ;;  %s1425_s14 = scalar_lea.vmem %s1521_s0, %s1248_s29  ;;  %v856_v59 = vld [vmem:[%s451_s20] sm:$0xff]  ;;  %s461_s15 = scalar_lea.vmem %s1532_s11, %s1470_s17 }
   0xf   : > { %v1260_v5 = vld [vmem:[%s1425_s14 + $0x74] ss:$8 sps:$4 sm:$0xff]   ;;  %v1262_v6 = vld [vmem:[%s1425_s14 + $0x70] ss:$8 sps:$4 sm:$0xff]   ;;  %v1263_v7 = vld [vmem:[%s1425_s14 + $0x64] ss:$8 sps:$4 sm:$0xff]   ;;  %v1229_v63 = vcombine.high %v856_v59, %v856_v59  ;;  %v1228_v1 = vcombine.low %v856_v59, %v856_v59  ;;  %s466_s24 = scalar_lea.vmem %s1533_s12, %s1470_s17 }
  0x10   : > { %706 = vmatprep.subr.bf16.mxu0 %v1260_v5  ;;  %v1265_v8 = vld [vmem:[%s1425_s14 + $0x60] ss:$8 sps:$4 sm:$0xff]   ;;  %v1266_v9 = vld [vmem:[%s1425_s14 + $0x54] ss:$8 sps:$4 sm:$0xff]   ;;  %v1268_v10 = vld [vmem:[%s1425_s14 + $0x50] ss:$8 sps:$4 sm:$0xff]  }
  0x11   : > { %800 = vperm.xlu0 %1258, %v797_v4   ;;  %707 = vmatpush1.bf16.msra.mxu0 %v1262_v6  ;;  %v1269_v11 = vld [vmem:[%s1425_s14 + $0x44] ss:$8 sps:$4 sm:$0xff]   ;;  %v1271_v12 = vld [vmem:[%s1425_s14 + $0x40] ss:$8 sps:$4 sm:$0xff]   ;;  %v1272_v13 = vld [vmem:[%s1425_s14 + $0x34] ss:$8 sps:$4 sm:$0xff]  }
  0x12   : > { %708 = vmatprep.subr.bf16.mxu0 %v1263_v7  ;;  %v1274_v14 = vld [vmem:[%s1425_s14 + $0x30] ss:$8 sps:$4 sm:$0xff]   ;;  %v1275_v15 = vld [vmem:[%s1425_s14 + $0x24] ss:$8 sps:$4 sm:$0xff]   ;;  %v1277_v16 = vld [vmem:[%s1425_s14 + $0x20] ss:$8 sps:$4 sm:$0xff]  }
  0x13   : > { %v1301_v17 = vld [vmem:[%s1425_s14 + $0x114] ss:$8 sps:$4 sm:$0xff]   ;;  %v1304_v18 = vld [vmem:[%s1425_s14 + $0x110] ss:$8 sps:$4 sm:$0xff]   ;;  %v1307_v20 = vld [vmem:[%s1425_s14 + $0x104] ss:$8 sps:$4 sm:$0xff]  }
  0x14   : > { %v1278_v19 = vld [vmem:[%s1425_s14 + $0x14] ss:$8 sps:$4 sm:$0xff]   ;;  %759 = vmatprep.subr.bf16.mxu1 %v1301_v17  ;;  %v1310_v21 = vld [vmem:[%s1425_s14 + $0x100] ss:$8 sps:$4 sm:$0xff]   ;;  %v1280_v22 = vld [vmem:[%s1425_s14 + $0x10] ss:$8 sps:$4 sm:$0xff]  }
  0x15   : > { %709 = vmatpush1.bf16.msra.mxu0 %v1265_v8  ;;  %760 = vmatpush1.bf16.msra.mxu1 %v1304_v18  ;;  %v1281_v23 = vld [vmem:[%s1425_s14 + $0x4] ss:$8 sps:$4 sm:$0xff]   ;;  %v1283_v25 = vld [vmem:[%s1425_s14] ss:$8 sps:$4 sm:$0xff]   ;;  %v1284_v26 = vld [vmem:[%s1425_s14 + $0xf4] ss:$8 sps:$4 sm:$0xff]  }
  0x16   : > { %710 = vmatprep.subr.bf16.mxu0 %v1266_v9  ;;  %761 = vmatprep.subr.bf16.mxu1 %v1307_v20  ;;  %v1286_v27 = vld [vmem:[%s1425_s14 + $0xf0] ss:$8 sps:$4 sm:$0xff]   ;;  %v1287_v28 = vld [vmem:[%s1425_s14 + $0xe4] ss:$8 sps:$4 sm:$0xff]   ;;  %v1289_v29 = vld [vmem:[%s1425_s14 + $0xe0] ss:$8 sps:$4 sm:$0xff]  }
  0x17   : > { %v1290_v30 = vld [vmem:[%s1425_s14 + $0xd4] ss:$8 sps:$4 sm:$0xff]   ;;  %v1292_v31 = vld [vmem:[%s1425_s14 + $0xd0] ss:$8 sps:$4 sm:$0xff]   ;;  %v1293_v32 = vld [vmem:[%s1425_s14 + $0xc4] ss:$8 sps:$4 sm:$0xff]  }
  0x18   : > { %v1295_v33 = vld [vmem:[%s1425_s14 + $0xc0] ss:$8 sps:$4 sm:$0xff]   ;;  %v1296_v34 = vld [vmem:[%s1425_s14 + $0xb4] ss:$8 sps:$4 sm:$0xff]   ;;  %v1298_v35 = vld [vmem:[%s1425_s14 + $0xb0] ss:$8 sps:$4 sm:$0xff]  }
  0x19   : > { %711 = vmatpush1.bf16.msra.mxu0 %v1268_v10  ;;  %762 = vmatpush1.bf16.msra.mxu1 %v1310_v21  ;;  %v1299_v36 = vld [vmem:[%s1425_s14 + $0xa4] ss:$8 sps:$4 sm:$0xff]   ;;  %v1303_v37 = vld [vmem:[%s1425_s14 + $0xa0] ss:$8 sps:$4 sm:$0xff]   ;;  %v1305_v38 = vld [vmem:[%s1425_s14 + $0x94] ss:$8 sps:$4 sm:$0xff]  }
  0x1a   : > { %712 = vmatprep.subr.bf16.mxu0 %v1269_v11  ;;  %v1309_v39 = vld [vmem:[%s1425_s14 + $0x90] ss:$8 sps:$4 sm:$0xff]   ;;  %v1311_v40 = vld [vmem:[%s1425_s14 + $0x84] ss:$8 sps:$4 sm:$0xff]   ;;  %v1314_v41 = vld [vmem:[%s1425_s14 + $0x80] ss:$8 sps:$4 sm:$0xff]  }
  0x1b   : > { %v796_v3 = vld [vmem:[%s1527_s6] sm:$0xf]  ;;  %v866_v4 = vsel %vm807_vm3, %v1228_v1, 0 }
  0x1c   : > { %1225 = vmatmul.mubr.msk.bf16.vlgmr.msra.gmra.mxu1 %vm702_vm0, %v1313_v24  ;;  %v855_v5 = vld [vmem:[%s1526_s5] sm:$0xf] }
  0x1d   : > { %713 = vmatpush1.bf16.msra.mxu0 %v1271_v12  ;;  %846 = vmatprep.mubr.bf16.mxu1 %v1329_v0  ;;  %v1037_v6 = vld [vmem:[%s1531_s10] sm:$0xff] }
  0x1e   : > { %714 = vmatprep.subr.bf16.mxu0 %v1272_v13  ;;  %1040 = vperm.xlu1 %1259, %v1037_v6  }
  0x21   : > { %715 = vmatpush1.bf16.msra.mxu0 %v1274_v14 }
  0x22   : > { %716 = vmatprep.subr.bf16.mxu0 %v1275_v15 }
  0x25   : > { %717 = vmatpush1.bf16.msra.mxu0 %v1277_v16 }
  0x26   : > { %718 = vmatprep.subr.bf16.mxu0 %v1278_v19 }
  0x29   : > { %719 = vmatpush1.bf16.msra.mxu0 %v1280_v22  ;;  %v930_v22 = vld [vmem:[%s456_s30] sm:$0xff] }
  0x2a   : > { %720 = vmatprep.subr.bf16.mxu0 %v1281_v23 }
  0x2d   : > { %721 = vmatpush1.bf16.msra.mxu0 %v1283_v25 }
  0x2e   : > { %722 = vmatprep.subr.bf16.mxu0 %v1284_v26 }
  0x31   : > { %723 = vmatpush2.bf16.msra.mxu0 %v1286_v27 }
  0x32   : > { %724 = vmatprep.subr.bf16.mxu0 %v1287_v28  ;;  %v1236_v28 = vcombine.high %v930_v22, %v930_v22 }
  0x35   : > { %725 = vmatpush2.bf16.msra.mxu0 %v1289_v29  ;;  %v1235_v29 = vcombine.low %v930_v22, %v930_v22 }
  0x36   : > { %726 = vmatprep.subr.bf16.mxu0 %v1290_v30 }
  0x39   : > { %727 = vmatpush2.bf16.msra.mxu0 %v1292_v31  ;;  %v931_v31 = vld [vmem:[%s1530_s9] sm:$0xf] }
  0x3a   : > { %728 = vmatprep.subr.bf16.mxu0 %v1293_v32  ;;  %v991_v32 = vsel %vm807_vm3, %v1235_v29, 0 }
  0x3d   : > { %729 = vmatpush2.bf16.msra.mxu0 %v1295_v33  ;;  %v929_v33 = vld [vmem:[%s1529_s8] sm:$0xf] }
  0x3e   : > { %730 = vmatprep.subr.bf16.mxu0 %v1296_v34 }
  0x41   : > { %731 = vmatpush2.bf16.msra.mxu0 %v1298_v35 }
  0x42   : > { %732 = vmatprep.subr.bf16.mxu0 %v1299_v36 }
  0x45   : > { %733 = vmatpush2.bf16.msra.mxu0 %v1303_v37 }
  0x46   : > { %734 = vmatprep.subr.bf16.mxu0 %v1305_v38 }
  0x49   : > { %735 = vmatpush2.bf16.msra.mxu0 %v1309_v39 }
  0x4a   : > { %736 = vmatprep.subr.bf16.mxu0 %v1311_v40 }
  0x4d   : > { %737 = vmatpush2.bf16.msra.mxu0 %v1314_v41 }
  0x50   : > { %739 = vmatmul.mubr.bf16.vlgmr.msra.gmra.mxu0 %v1186_v42 }
  0x88   : > { %v510_v47 = vpop.permute.xlu0 %509 }
  0x8c   : > { %v801_v10 = vpop.permute.xlu0 %800 }
  0x99   : > { %v1041_v39 = vpop.permute.xlu1 %1040 }
  0xdc   : > { %v781_v43 = vpop.f32.mrf.mxu1 }
  0xde   : > { %v783_v44 = vpop.f32.mrf.mxu1 }
  0xe0   : > { %v785_v45 = vpop.f32.mrf.mxu1 }
  0xe2   : > { %v786_v46 = vpop.f32.mrf.mxu1 }
 0x110   : > { %v740_v48 = vpop.f32.mrf.mxu0 }
 0x111   : > { %v741_v49 = vadd.f32 %v740_v48, %v510_v47 }
 0x112   : > { %v742_v50 = vpop.f32.mrf.mxu0 }
 0x113   : > { %v782_v51 = vadd.f32 %v781_v43, %v741_v49  ;;  %v743_v52 = vadd.f32 %v742_v50, %v510_v47 }
 0x114   : > { %v744_v53 = vpop.f32.mrf.mxu0 }
 0x115   : > { %vm788_vm1 = vcmp.ge.f32.partialorder %v782_v51, 0.0  ;;  %v790_v54 = vmul.f32 0.2, %v782_v51  ;;  %v784_v55 = vadd.f32 %v783_v44, %v743_v52 }
 0x116   : > { %v745_v56 = vpop.f32.mrf.mxu0 }
 0x117   : > { %vm789_vm2 = vcmp.ge.f32.partialorder %v784_v55, 0.0  ;;  %v791_v57 = vmul.f32 0.2, %v784_v55  ;;  %v792_v58 = vsel %vm788_vm1, %v782_v51, %v790_v54 }
 0x118   : > { %v794_v60 = vpack.c.bf16 %v792_v58, %v792_v58 }
 0x119   : > { %v793_v61 = vsel %vm789_vm2, %v784_v55, %v791_v57 }
 0x11a   : > { %v795_v62 = vpack.c.bf16 %v793_v61, %v793_v61  ;;  %v809_v2 = vsel %vm807_vm3, %v794_v60, 0 }
 0x11c   : > { %1226 = vmatprep.subr.msk.bf16.mxu1 %vm807_vm3, %v795_v62 }
 0x11d   : > { %829 = vmatpush1.bf16.msra.mxu1 %v809_v2 }
 0x11e   : > { %1230 = vmatprep.subr.msk.bf16.mxu1 %vm807_vm3, %v1229_v63 }
 0x120   : > { %1227 = vmatmul.mubr.msk.bf16.vlgmr.msra.gmra.mxu1 %vm803_vm4, %v796_v3 }
 0x121   : > { %886 = vmatpush1.bf16.msra.mxu1 %v866_v4  ;;  %903 = vmatprep.mubr.bf16.mxu1 %v1329_v0 }
 0x128   : > { %1231 = vmatmul.mubr.msk.bf16.vlgmr.msra.gmra.mxu1 %vm803_vm4, %v855_v5 }
 0x129   : > { %973 = vmatprep.mubr.bf16.mxu1 %v1329_v0 }
 0x1e0   : > { %v848_v7 = vpop.f32.mrf.mxu1 }
 0x1e1   : > { %v849_v12 = vadd.f32 %v848_v7, %v801_v10 }
 0x1e2   : > { %v850_v8 = vpop.f32.mrf.mxu1 }
 0x1e3   : > { %v851_v14 = vadd.f32 %v850_v8, %v801_v10 }
 0x1e4   : > { %v852_v9 = vpop.f32.mrf.mxu1 }
 0x1e6   : > { %v853_v11 = vpop.f32.mrf.mxu1 }
 0x1e8   : > { %v905_v13 = vpop.f32.mrf.mxu1 }
 0x1e9   : > { %v912_v15 = vadd.f32 %v905_v13, %v849_v12 }
 0x1ea   : > { %v907_v16 = vpop.f32.mrf.mxu1 }
 0x1eb   : > { %vm914_vm5 = vcmp.ge.f32.partialorder %v912_v15, 0.0  ;;  %v916_v17 = vmul.f32 0.2, %v912_v15  ;;  %v913_v18 = vadd.f32 %v907_v16, %v851_v14 }
 0x1ec   : > { %v909_v19 = vpop.f32.mrf.mxu1 }
 0x1ed   : > { %v918_v20 = vsel %vm914_vm5, %v912_v15, %v916_v17  ;;  %vm915_vm6 = vcmp.ge.f32.partialorder %v913_v18, 0.0  ;;  %v917_v21 = vmul.f32 0.2, %v913_v18 }
 0x1ee   : > { %v910_v23 = vpop.f32.mrf.mxu1  ;;  %v920_v24 = vpack.c.bf16 %v918_v20, %v918_v20 }
 0x1ef   : > { %v919_v25 = vsel %vm915_vm6, %v913_v18, %v917_v21 }
 0x1f0   : > { %v921_v26 = vpack.c.bf16 %v919_v25, %v919_v25  ;;  %v1246_v27 = vpack.c.bf16 %v919_v25, %v918_v20  ;;  %v936_v30 = vsel %vm807_vm3, %v920_v24, 0 }
 0x1f2   : > { %928 = vst [vmem:[%s461_s15] sm:$0xff] %v1246_v27  ;;  %1233 = vmatprep.subr.msk.bf16.mxu1 %vm807_vm3, %v921_v26 }
 0x1f3   : > { %956 = vmatpush1.bf16.msra.mxu1 %v936_v30 }
 0x1f4   : > { %1237 = vmatprep.subr.msk.bf16.mxu1 %vm807_vm3, %v1236_v28 }
 0x1f6   : > { %1234 = vmatmul.mubr.msk.bf16.vlgmr.msra.gmra.mxu1 %vm803_vm4, %v931_v31 }
 0x1f7   : > { %1011 = vmatpush1.bf16.msra.mxu1 %v991_v32  ;;  %1028 = vmatprep.mubr.bf16.mxu1 %v1329_v0 }
 0x1fe   : > { %1238 = vmatmul.mubr.msk.bf16.vlgmr.msra.gmra.mxu1 %vm803_vm4, %v929_v33 }
 0x2b6   : > { %v975_v34 = vpop.f32.mrf.mxu1 }
 0x2b8   : > { %v977_v35 = vpop.f32.mrf.mxu1 }
 0x2ba   : > { %v979_v36 = vpop.f32.mrf.mxu1 }
 0x2bc   : > { %v980_v37 = vpop.f32.mrf.mxu1 }
 0x2be   : > { %v1030_v38 = vpop.f32.mrf.mxu1 }
 0x2bf   : > { %v1031_v40 = vadd.f32 %v1030_v38, %v975_v34 }
 0x2c0   : > { %v1032_v41 = vpop.f32.mrf.mxu1 }
 0x2c1   : > { %v1043_v42 = vadd.f32 %v1041_v39, %v1031_v40  ;;  %v1033_v43 = vadd.f32 %v1032_v41, %v977_v35 }
 0x2c2   : > { %v1034_v44 = vpop.f32.mrf.mxu1 }
 0x2c3   : > { %v1047_v45 = vmul.f32 0.2, %v1043_v42  ;;  %v1044_v0 = vadd.f32 %v1041_v39, %v1033_v43  ;;  %vm1045_vm7 = vcmp.ge.f32.partialorder %v1043_v42, 0.0 }
 0x2c4   : > { %v1035_v46 = vpop.f32.mrf.mxu1 }
 0x2c5   : > { %vm1046_vm8 = vcmp.ge.f32.partialorder %v1044_v0, 0.0  ;;  %v1048_v47 = vmul.f32 0.2, %v1044_v0  ;;  %v1049_v48 = vsel %vm1045_vm7, %v1043_v42, %v1047_v45 }
 0x2c7   : > { %v1050_v49 = vsel %vm1046_vm8, %v1044_v0, %v1048_v47 }
 0x2c8   : > { %v1247_v50 = vpack.c.bf16 %v1050_v49, %v1049_v48 }
 0x2ca   : > { %1059 = vst [vmem:[%s466_s24] sm:$0xff] %v1247_v50 }
 0x2cb PF: > { %s23_s21 = sadd.s32 1, %s1327_s21  }
 0x2cc   : > { %p20_p4 = scmp.ge.s32.totalorder %s23_s21, 4  }
 0x2ce   :  { %22 = sbr.rel (!%p20_p4) target bundleno = 1 (0x1), region = 112 }

// kernel: _lambda_.25
= control target key start
LH: loop header
LB: loop body
LE: loop exit
PB: predicated region body
PF: predicated region fallthrough
CT: control target
= control target key end

     0   :  { %s1694_s0 = inlined_call_operand.vmem [shape: bf16[2,288,256], index: 0, kind: input, shape index: {}]   ;;  %s1695_s1 = inlined_call_operand.vmem [shape: bf16[2,8,256], index: 1, kind: input, shape index: {}]   ;;  %s1696_s2 = inlined_call_operand.vmem [shape: bf16[2,8,256], index: 2, kind: input, shape index: {}]   ;;  %s1697_s3 = inlined_call_operand.vmem [shape: bf16[8,288], index: 3, kind: input, shape index: {}]   ;;  %s1698_s4 = inlined_call_operand.vmem [shape: f32[8,1], index: 4, kind: input, shape index: {}]   ;;  %s1699_s5 = inlined_call_operand.vmem [shape: bf16[8,8], index: 5, kind: input, shape index: {}]   ;;  %s1700_s6 = inlined_call_operand.vmem [shape: bf16[8,8], index: 6, kind: input, shape index: {}]   ;;  %s1701_s7 = inlined_call_operand.vmem [shape: f32[8,1], index: 7, kind: input, shape index: {}]   ;;  %s1702_s8 = inlined_call_operand.vmem [shape: bf16[8,8], index: 8, kind: input, shape index: {}]   ;;  %s1703_s9 = inlined_call_operand.vmem [shape: bf16[8,8], index: 9, kind: input, shape index: {}]   ;;  %s1704_s10 = inlined_call_operand.vmem [shape: f32[8,1], index: 10, kind: input, shape index: {}]   ;;  %s1705_s11 = inlined_call_operand.vmem [shape: bf16[2,8,256], index: 11, kind: output, shape index: {0}]   ;;  %s1706_s12 = inlined_call_operand.hbm [shape: bf16[2,8,256], index: 12, kind: output, shape index: {1}]  }
   0x1   :  { %1707 = sst [smem:[#allocation5_spill]] %s1694_s0 }
   0x2   :  { %1708 = sst [smem:[#allocation6_spill]] %s1695_s1 }
   0x3   :  { %1709 = sst [smem:[#allocation7_spill]] %s1696_s2 }
   0x4   :  { %18 = vsyncpa [#allocation3], 0 }
   0x5   :  { %20 = vsyncpa [#allocation3 + $0x1], 0  ;;  %s1499_s21 = smov 0   ;;  %s1501_s22 = smov 0  }
   0x6   :  { %s1503_s23 = smov 0   ;;  %s1505_s24 = smov 0  }
   0x7 LB: > { %s1520_s25 = sadd.s32 4294967295, %s1430_s24   ;;  %s1189_s26 = sadd.s32 4294967294, %s1430_s24   ;;  %s1430_s24 = sphi %s1505_s24, %s1718_s24   ;;  %s1426_s23 = sphi %s1503_s23, %s1717_s23   ;;  %s1422_s22 = sphi %s1501_s22, %s1716_s22   ;;  %s1418_s21 = sphi %s1499_s21, %s1715_s21  }
   0x8   : > { %s1524_s27 = sadd.s32 1, %s1430_s24   ;;  %s305_s28 = sadd.s32 1, %s1426_s23 }
   0x9   : > { %s302_s29 = ssub.s32 %s1430_s24, %s1524_s27  ;;  %p315_p0 = scmp.ne.s32.totalorder %s1426_s23, %s1422_s22 }
   0xa   : > { %p303_p1 = scmp.eq.s32.totalorder %s302_s29, 0  ;;  %p316_p2 = scmp.eq.s32.totalorder %s1520_s25, 1 }
   0xb   : > { %p321_p3 = scmp.ne.s32.totalorder %s1422_s22, %s1418_s21  ;;  %p322_p4 = scmp.eq.s32.totalorder %s1189_s26, 1 }
   0xc   : > { %s1535_s30 = scalar_select %p303_p1, %s1426_s23, %s305_s28  }
   0xd   : > { %p1537_p5 = por %p316_p2, %p315_p0  ;;  %p1541_p6 = por %p322_p4, %p321_p3 }
   0xe   : > { %p1192_p7 = scmp.ge.s32.totalorder %s1430_s24, 1  ;;  %p388_p8 = scmp.lt.s32.totalorder %s1430_s24, 3 }
  0x10   : > { %p389_p9 = pnand %p1192_p7, %p388_p8 }
  0x11   : > { %p445_p10 = scmp.lt.s32.totalorder (!%p389_p9), %s1520_s25, 1  ;;  %s1712_s0 = sld [smem:[#allocation5_spill]] (!%p389_p9) }
  0x12   : > { %392 = sbr.rel (%p389_p9) target bundleno = 740 (0x2e4), region = 64  ;;  %s1713_s1 = sld [smem:[#allocation6_spill]] (!%p389_p9) }
  0x13   : > { %s1714_s2 = sld [smem:[#allocation7_spill]] (!%p389_p9)  ;;  %s1265_s15 = sshll.u32 (!%p389_p9), %s1520_s25, 7 }
  0x17   : > { %v1432_v0 = vmov 0   ;;  %v1552_v1 = vld [vmem:[%s1697_s3] sm:$0xff]  ;;  %s1559_s19 = scalar_select %p445_p10, %s1520_s25, 1  ;;  %v1362_v24 = vld [vmem:[%s1697_s3 + $0x8] ss:$0 sps:$4 sm:$0xff]   ;;  %vm700_vm0 = vcmask 261120  }
  0x18   : > { %777 = vmatprep.mubr.bf16.mxu1 %v1432_v0  ;;  %1307 = vset.pattern.permute.xlu0 %v1432_v0  ;;  %v504_v2 = vld [vmem:[%s1698_s4] sm:$0xff]  ;;  %v1202_v3 = vcombine.high %v1552_v1, %v1552_v1  ;;  %v1201_v42 = vcombine.low %v1552_v1, %v1552_v1  ;;  %vm805_vm3 = vcmask 1043456   ;;  %vm801_vm4 = vcmask 64512  }
  0x19   : > { %507 = vperm.xlu0 %1307, %v504_v2   ;;  %1308 = vset.pattern.permute.xlu1 %v1432_v0  ;;  %v795_v4 = vld [vmem:[%s1701_s7] sm:$0xff]  ;;  %s1266_s28 = smul.u32 288, %s1559_s19  ;;  %s1616_s20 = sshll.u32 %s1559_s19, 3 }
  0x1a   : > { %736 = vmatprep.mubr.bf16.mxu0 %v1202_v3  ;;  %s454_s29 = scalar_lea.vmem %s1713_s1, %s1616_s20  ;;  %v794_v3 = vld [vmem:[%s1700_s6] sm:$0xf]  ;;  %s459_s19 = scalar_lea.vmem %s1714_s2, %s1616_s20 }
  0x1b   : > { %s1571_s16 = scalar_lea.vmem %s1712_s0, %s1266_s28  ;;  %v854_v59 = vld [vmem:[%s454_s29] sm:$0xff]  ;;  %s464_s17 = scalar_lea.vmem %s1705_s11, %s1616_s20 }
  0x1c   : > { %v1309_v5 = vld [vmem:[%s1571_s16 + $0x74] ss:$8 sps:$4 sm:$0xff]   ;;  %v1311_v6 = vld [vmem:[%s1571_s16 + $0x70] ss:$8 sps:$4 sm:$0xff]   ;;  %v1312_v7 = vld [vmem:[%s1571_s16 + $0x64] ss:$8 sps:$4 sm:$0xff]   ;;  %v1244_v63 = vcombine.high %v854_v59, %v854_v59  ;;  %v1243_v1 = vcombine.low %v854_v59, %v854_v59  ;;  %s1079_s20 = scalar_lea.hbm %s1706_s12, %s1265_s15 }
  0x1d   : > { %798 = vperm.xlu0 %1307, %v795_v4   ;;  %704 = vmatprep.subr.bf16.mxu0 %v1309_v5  ;;  %v1314_v8 = vld [vmem:[%s1571_s16 + $0x60] ss:$8 sps:$4 sm:$0xff]   ;;  %v1315_v9 = vld [vmem:[%s1571_s16 + $0x54] ss:$8 sps:$4 sm:$0xff]   ;;  %v1317_v10 = vld [vmem:[%s1571_s16 + $0x50] ss:$8 sps:$4 sm:$0xff]  }
  0x1e   : > { %705 = vmatpush1.bf16.msra.mxu0 %v1311_v6  ;;  %v1318_v11 = vld [vmem:[%s1571_s16 + $0x44] ss:$8 sps:$4 sm:$0xff]   ;;  %v1320_v12 = vld [vmem:[%s1571_s16 + $0x40] ss:$8 sps:$4 sm:$0xff]   ;;  %v1321_v13 = vld [vmem:[%s1571_s16 + $0x34] ss:$8 sps:$4 sm:$0xff]  }
  0x1f   : > { %706 = vmatprep.subr.bf16.mxu0 %v1312_v7  ;;  %v1323_v14 = vld [vmem:[%s1571_s16 + $0x30] ss:$8 sps:$4 sm:$0xff]   ;;  %v1324_v15 = vld [vmem:[%s1571_s16 + $0x24] ss:$8 sps:$4 sm:$0xff]   ;;  %v1326_v16 = vld [vmem:[%s1571_s16 + $0x20] ss:$8 sps:$4 sm:$0xff]  }
  0x20   : > { %v1350_v17 = vld [vmem:[%s1571_s16 + $0x114] ss:$8 sps:$4 sm:$0xff]   ;;  %v1353_v18 = vld [vmem:[%s1571_s16 + $0x110] ss:$8 sps:$4 sm:$0xff]   ;;  %v1356_v20 = vld [vmem:[%s1571_s16 + $0x104] ss:$8 sps:$4 sm:$0xff]  }
  0x21   : > { %v1327_v19 = vld [vmem:[%s1571_s16 + $0x14] ss:$8 sps:$4 sm:$0xff]   ;;  %757 = vmatprep.subr.bf16.mxu1 %v1350_v17  ;;  %v1359_v21 = vld [vmem:[%s1571_s16 + $0x100] ss:$8 sps:$4 sm:$0xff]   ;;  %v1329_v22 = vld [vmem:[%s1571_s16 + $0x10] ss:$8 sps:$4 sm:$0xff]  }
  0x22   : > { %707 = vmatpush1.bf16.msra.mxu0 %v1314_v8  ;;  %758 = vmatpush1.bf16.msra.mxu1 %v1353_v18  ;;  %v1330_v23 = vld [vmem:[%s1571_s16 + $0x4] ss:$8 sps:$4 sm:$0xff]   ;;  %v1332_v25 = vld [vmem:[%s1571_s16] ss:$8 sps:$4 sm:$0xff]   ;;  %v1333_v26 = vld [vmem:[%s1571_s16 + $0xf4] ss:$8 sps:$4 sm:$0xff]  }
  0x23   : > { %708 = vmatprep.subr.bf16.mxu0 %v1315_v9  ;;  %759 = vmatprep.subr.bf16.mxu1 %v1356_v20  ;;  %v1335_v27 = vld [vmem:[%s1571_s16 + $0xf0] ss:$8 sps:$4 sm:$0xff]   ;;  %v1336_v28 = vld [vmem:[%s1571_s16 + $0xe4] ss:$8 sps:$4 sm:$0xff]   ;;  %v1338_v29 = vld [vmem:[%s1571_s16 + $0xe0] ss:$8 sps:$4 sm:$0xff]  }
  0x24   : > { %v1339_v30 = vld [vmem:[%s1571_s16 + $0xd4] ss:$8 sps:$4 sm:$0xff]   ;;  %v1341_v31 = vld [vmem:[%s1571_s16 + $0xd0] ss:$8 sps:$4 sm:$0xff]   ;;  %v1342_v32 = vld [vmem:[%s1571_s16 + $0xc4] ss:$8 sps:$4 sm:$0xff]  }
  0x25   : > { %v1344_v33 = vld [vmem:[%s1571_s16 + $0xc0] ss:$8 sps:$4 sm:$0xff]   ;;  %v1345_v34 = vld [vmem:[%s1571_s16 + $0xb4] ss:$8 sps:$4 sm:$0xff]   ;;  %v1347_v35 = vld [vmem:[%s1571_s16 + $0xb0] ss:$8 sps:$4 sm:$0xff]  }
  0x26   : > { %709 = vmatpush1.bf16.msra.mxu0 %v1317_v10  ;;  %760 = vmatpush1.bf16.msra.mxu1 %v1359_v21  ;;  %v1348_v36 = vld [vmem:[%s1571_s16 + $0xa4] ss:$8 sps:$4 sm:$0xff]   ;;  %v1352_v37 = vld [vmem:[%s1571_s16 + $0xa0] ss:$8 sps:$4 sm:$0xff]   ;;  %v1354_v38 = vld [vmem:[%s1571_s16 + $0x94] ss:$8 sps:$4 sm:$0xff]  }
  0x27   : > { %710 = vmatprep.subr.bf16.mxu0 %v1318_v11  ;;  %v1358_v39 = vld [vmem:[%s1571_s16 + $0x90] ss:$8 sps:$4 sm:$0xff]   ;;  %v1360_v40 = vld [vmem:[%s1571_s16 + $0x84] ss:$8 sps:$4 sm:$0xff]   ;;  %v1363_v41 = vld [vmem:[%s1571_s16 + $0x80] ss:$8 sps:$4 sm:$0xff]  }
  0x28   : > { %v864_v4 = vsel %vm805_vm3, %v1243_v1, 0  ;;  %v853_v5 = vld [vmem:[%s1699_s5] sm:$0xf]  ;;  %s442_s29 = sand.u32 1, %s1422_s22   ;;  %s1433_s1 = smov [#allocation2]  }
  0x29   : > { %1240 = vmatmul.mubr.msk.bf16.vlgmr.msra.gmra.mxu1 %vm700_vm0, %v1362_v24  ;;  %v1035_v6 = vld [vmem:[%s1704_s10] sm:$0xff]  ;;  %s1064_s28 = scalar_lea.sflag [#allocation3], %s442_s29  ;;  %s1374_s2 = sshll.u32 %s1433_s1, 4  ;;  %s1375_s2 = int_to_ptr.vmem [resolvable:$false] %s1374_s2 }
  0x2a   : > { %711 = vmatpush1.bf16.msra.mxu0 %v1320_v12  ;;  %844 = vmatprep.mubr.bf16.mxu1 %v1432_v0  ;;  %s1376_s25 = scalar_lea.vmem %s1375_s2, 256 }
  0x2b   : > { %712 = vmatprep.subr.bf16.mxu0 %v1321_v13  ;;  %1038 = vperm.xlu1 %1308, %v1035_v6  }
  0x2e   : > { %713 = vmatpush1.bf16.msra.mxu0 %v1323_v14 }
  0x2f   : > { %714 = vmatprep.subr.bf16.mxu0 %v1324_v15 }
  0x32   : > { %715 = vmatpush1.bf16.msra.mxu0 %v1326_v16 }
  0x33   : > { %716 = vmatprep.subr.bf16.mxu0 %v1327_v19 }
  0x36   : > { %717 = vmatpush1.bf16.msra.mxu0 %v1329_v22  ;;  %v928_v22 = vld [vmem:[%s459_s19] sm:$0xff]  ;;  %s1193_s19 = sshll.u32 %s442_s29, 3 }
  0x37   : > { %718 = vmatprep.subr.bf16.mxu0 %v1330_v23  ;;  %s444_s16 = scalar_lea.vmem [#allocation2], %s1193_s19 }
  0x3a   : > { %719 = vmatpush1.bf16.msra.mxu0 %v1332_v25 }
  0x3b   : > { %720 = vmatprep.subr.bf16.mxu0 %v1333_v26 }
  0x3e   : > { %721 = vmatpush2.bf16.msra.mxu0 %v1335_v27 }
  0x3f   : > { %722 = vmatprep.subr.bf16.mxu0 %v1336_v28  ;;  %v1251_v28 = vcombine.high %v928_v22, %v928_v22 }
  0x42   : > { %723 = vmatpush2.bf16.msra.mxu0 %v1338_v29  ;;  %v1250_v29 = vcombine.low %v928_v22, %v928_v22 }
  0x43   : > { %724 = vmatprep.subr.bf16.mxu0 %v1339_v30 }
  0x46   : > { %725 = vmatpush2.bf16.msra.mxu0 %v1341_v31  ;;  %v929_v31 = vld [vmem:[%s1703_s9] sm:$0xf] }
  0x47   : > { %726 = vmatprep.subr.bf16.mxu0 %v1342_v32  ;;  %v989_v32 = vsel %vm805_vm3, %v1250_v29, 0 }
  0x4a   : > { %727 = vmatpush2.bf16.msra.mxu0 %v1344_v33  ;;  %v927_v33 = vld [vmem:[%s1702_s8] sm:$0xf] }
  0x4b   : > { %728 = vmatprep.subr.bf16.mxu0 %v1345_v34 }
  0x4e   : > { %729 = vmatpush2.bf16.msra.mxu0 %v1347_v35 }
  0x4f   : > { %730 = vmatprep.subr.bf16.mxu0 %v1348_v36 }
  0x52   : > { %731 = vmatpush2.bf16.msra.mxu0 %v1352_v37 }
  0x53   : > { %732 = vmatprep.subr.bf16.mxu0 %v1354_v38 }
  0x56   : > { %733 = vmatpush2.bf16.msra.mxu0 %v1358_v39 }
  0x57   : > { %734 = vmatprep.subr.bf16.mxu0 %v1360_v40 }
  0x5a   : > { %735 = vmatpush2.bf16.msra.mxu0 %v1363_v41 }
  0x5d   : > { %737 = vmatmul.mubr.bf16.vlgmr.msra.gmra.mxu0 %v1201_v42 }
  0x94   : > { %v508_v47 = vpop.permute.xlu0 %507 }
  0x98   : > { %v799_v10 = vpop.permute.xlu0 %798 }
  0xa6   : > { %v1039_v39 = vpop.permute.xlu1 %1038 }
  0xe9   : > { %v779_v43 = vpop.f32.mrf.mxu1 }
  0xeb   : > { %v781_v44 = vpop.f32.mrf.mxu1 }
  0xed   : > { %v783_v45 = vpop.f32.mrf.mxu1 }
  0xef   : > { %v784_v46 = vpop.f32.mrf.mxu1 }
 0x11d   : > { %v738_v48 = vpop.f32.mrf.mxu0 }
 0x11e   : > { %v739_v49 = vadd.f32 %v738_v48, %v508_v47 }
 0x11f   : > { %v740_v50 = vpop.f32.mrf.mxu0 }
 0x120   : > { %v780_v51 = vadd.f32 %v779_v43, %v739_v49  ;;  %v741_v52 = vadd.f32 %v740_v50, %v508_v47 }
 0x121   : > { %v742_v53 = vpop.f32.mrf.mxu0 }
 0x122   : > { %vm786_vm1 = vcmp.ge.f32.partialorder %v780_v51, 0.0  ;;  %v788_v54 = vmul.f32 0.2, %v780_v51  ;;  %v782_v55 = vadd.f32 %v781_v44, %v741_v52 }
 0x123   : > { %v743_v56 = vpop.f32.mrf.mxu0 }
 0x124   : > { %vm787_vm2 = vcmp.ge.f32.partialorder %v782_v55, 0.0  ;;  %v789_v57 = vmul.f32 0.2, %v782_v55  ;;  %v790_v58 = vsel %vm786_vm1, %v780_v51, %v788_v54 }
 0x125   : > { %v792_v60 = vpack.c.bf16 %v790_v58, %v790_v58 }
 0x126   : > { %v791_v61 = vsel %vm787_vm2, %v782_v55, %v789_v57 }
 0x127   : > { %v793_v62 = vpack.c.bf16 %v791_v61, %v791_v61  ;;  %v807_v2 = vsel %vm805_vm3, %v792_v60, 0 }
 0x129   : > { %1241 = vmatprep.subr.msk.bf16.mxu1 %vm805_vm3, %v793_v62 }
 0x12a   : > { %827 = vmatpush1.bf16.msra.mxu1 %v807_v2 }
 0x12b   : > { %1245 = vmatprep.subr.msk.bf16.mxu1 %vm805_vm3, %v1244_v63 }
 0x12d   : > { %1242 = vmatmul.mubr.msk.bf16.vlgmr.msra.gmra.mxu1 %vm801_vm4, %v794_v3 }
 0x12e   : > { %884 = vmatpush1.bf16.msra.mxu1 %v864_v4  ;;  %901 = vmatprep.mubr.bf16.mxu1 %v1432_v0 }
 0x135   : > { %1246 = vmatmul.mubr.msk.bf16.vlgmr.msra.gmra.mxu1 %vm801_vm4, %v853_v5 }
 0x136   : > { %971 = vmatprep.mubr.bf16.mxu1 %v1432_v0 }
 0x1ed   : > { %v846_v7 = vpop.f32.mrf.mxu1 }
 0x1ee   : > { %v847_v12 = vadd.f32 %v846_v7, %v799_v10 }
 0x1ef   : > { %v848_v8 = vpop.f32.mrf.mxu1 }
 0x1f0   : > { %v849_v14 = vadd.f32 %v848_v8, %v799_v10 }
 0x1f1   : > { %v850_v9 = vpop.f32.mrf.mxu1 }
 0x1f3   : > { %v851_v11 = vpop.f32.mrf.mxu1 }
 0x1f5   : > { %v903_v13 = vpop.f32.mrf.mxu1 }
 0x1f6   : > { %v910_v15 = vadd.f32 %v903_v13, %v847_v12 }
 0x1f7   : > { %v905_v16 = vpop.f32.mrf.mxu1 }
 0x1f8   : > { %vm912_vm5 = vcmp.ge.f32.partialorder %v910_v15, 0.0  ;;  %v914_v17 = vmul.f32 0.2, %v910_v15  ;;  %v911_v18 = vadd.f32 %v905_v16, %v849_v14 }
 0x1f9   : > { %v907_v19 = vpop.f32.mrf.mxu1 }
 0x1fa   : > { %v916_v20 = vsel %vm912_vm5, %v910_v15, %v914_v17  ;;  %vm913_vm6 = vcmp.ge.f32.partialorder %v911_v18, 0.0  ;;  %v915_v21 = vmul.f32 0.2, %v911_v18 }
 0x1fb   : > { %v908_v23 = vpop.f32.mrf.mxu1  ;;  %v918_v24 = vpack.c.bf16 %v916_v20, %v916_v20 }
 0x1fc   : > { %v917_v25 = vsel %vm913_vm6, %v911_v18, %v915_v21 }
 0x1fd   : > { %v919_v26 = vpack.c.bf16 %v917_v25, %v917_v25  ;;  %v1263_v27 = vpack.c.bf16 %v917_v25, %v916_v20  ;;  %v934_v30 = vsel %vm805_vm3, %v918_v24, 0 }
 0x1ff   : > { %926 = vst [vmem:[%s464_s17] sm:$0xff] %v1263_v27  ;;  %1248 = vmatprep.subr.msk.bf16.mxu1 %vm805_vm3, %v919_v26  ;;  %s1081_s17 = sshll.u32 %s444_s16, 4  ;;  %s1082_s17 = int_to_ptr.vmem [resolvable:$true] %s1081_s17 }
 0x200   : > { %954 = vmatpush1.bf16.msra.mxu1 %v934_v30  ;;  %s1370_s0 = scalar_lea.vmem %s1082_s17, 128  ;;  %p1377_p0 = scmp.lt.s32.totalorder %s1082_s17, %s1375_s2 }
 0x201   : > { %1252 = vmatprep.subr.msk.bf16.mxu1 %vm805_vm3, %v1251_v28  ;;  %p1371_p11 = scmp.ne.s32.totalorder %s1082_s17, %s1370_s0  ;;  %p1378_p1 = scmp.lt.s32.totalorder %s1376_s25, %s1370_s0 }
 0x203   : > { %1249 = vmatmul.mubr.msk.bf16.vlgmr.msra.gmra.mxu1 %vm801_vm4, %v929_v31  ;;  %p1372_p12 = pnand %p1371_p11, %p1537_p5  ;;  %p1379_p2 = por %p1378_p1, %p1377_p0 }
 0x204   : > { %1009 = vmatpush1.bf16.msra.mxu1 %v989_v32  ;;  %1026 = vmatprep.mubr.bf16.mxu1 %v1432_v0 }
 0x205   : > { %p1373_p13 = pneg %p1372_p12 }
 0x207   : > { %p1380_p3 = pnand %p1379_p2, %p1373_p13 }
 0x20b   : > { %1253 = vmatmul.mubr.msk.bf16.vlgmr.msra.gmra.mxu1 %vm801_vm4, %v927_v33 }
 0x2c3   : > { %v973_v34 = vpop.f32.mrf.mxu1 }
 0x2c5   : > { %v975_v35 = vpop.f32.mrf.mxu1 }
 0x2c7   : > { %v977_v36 = vpop.f32.mrf.mxu1 }
 0x2c9   : > { %v978_v37 = vpop.f32.mrf.mxu1 }
 0x2cb   : > { %v1028_v38 = vpop.f32.mrf.mxu1 }
 0x2cc   : > { %v1029_v40 = vadd.f32 %v1028_v38, %v973_v34 }
 0x2cd   : > { %v1030_v41 = vpop.f32.mrf.mxu1 }
 0x2ce   : > { %v1041_v42 = vadd.f32 %v1039_v39, %v1029_v40  ;;  %v1031_v43 = vadd.f32 %v1030_v41, %v975_v35 }
 0x2cf   : > { %v1032_v0 = vpop.f32.mrf.mxu1 }
 0x2d0   : > { %v1045_v44 = vmul.f32 0.2, %v1041_v42  ;;  %v1042_v45 = vadd.f32 %v1039_v39, %v1031_v43  ;;  %vm1043_vm7 = vcmp.ge.f32.partialorder %v1041_v42, 0.0 }
 0x2d1   : > { %v1033_v46 = vpop.f32.mrf.mxu1 }
 0x2d2   : > { %vm1044_vm8 = vcmp.ge.f32.partialorder %v1042_v45, 0.0  ;;  %v1046_v47 = vmul.f32 0.2, %v1042_v45  ;;  %v1047_v48 = vsel %vm1043_vm7, %v1041_v42, %v1045_v44 }
 0x2d4   : > { %v1048_v49 = vsel %vm1044_vm8, %v1042_v45, %v1046_v47 }
 0x2d5   : > { %v1264_v50 = vpack.c.bf16 %v1048_v49, %v1047_v48 }
 0x2d7   : > { %1057 = vst [vmem:[%s444_s16] sm:$0xff] %v1264_v50 }
 0x2d8   : > { %1383 = shalt.err (!%p1380_p3)
}
 0x2d9   : > { %s1384_s19 = scalar_lea.hbm %s1079_s20, 128  ;;  %s1388_s16 = scalar_lea.hbm %s1706_s12, 256 }
 0x2da   : > { %p1385_p4 = scmp.ne.s32.totalorder %s1079_s20, %s1384_s19  ;;  %p1389_p9 = scmp.lt.s32.totalorder %s1079_s20, %s1706_s12 }
 0x2db   : > { %p1390_p10 = scmp.lt.s32.totalorder %s1388_s16, %s1384_s19 }
 0x2dc   : > { %p1386_p7 = pnand %p1385_p4, %p1537_p5 }
 0x2dd   : > { %p1391_p11 = por %p1390_p10, %p1389_p9 }
 0x2de   : > { %p1387_p8 = pneg %p1386_p7 }
 0x2e0   : > { %p1392_p12 = pnand %p1391_p11, %p1387_p8 }
 0x2e2   : > { %1395 = shalt.err (!%p1392_p12)
}
 0x2e3   : > { %1267 = dma.vmem_to_hbm [thread:$0]  (%p1537_p5), %s1082_s17, 128, %s1079_s20, %s1064_s28  }
 0x2e4 PF: > { %p1273_p13 = scmp.ge.s32.totalorder %s1430_s24, 2  ;;  %s1101_s0 = sand.u32 1, %s1418_s21  }
 0x2e5   : > { %s1102_s1 = scalar_lea.sflag [#allocation3], %s1101_s0 }
 0x2e6   : > { %p1270_p0 = pnand %p1273_p13, %p1541_p6 }
 0x2e8   : > { %p1271_p1 = pneg %p1270_p0 }
 0x2ea   : > { %1413 = dma.done.wait (%p1271_p1), %s1102_s1, 128  }
 0x2eb   : > { %1415 = vsyncadd (%p1271_p1), %s1102_s1, 4294967168  ;;  %p23_p2 = scmp.ge.s32.totalorder %s1524_s27, 4   ;;  %s1715_s21 = smov %s1422_s22 }
 0x2ec   : > { %s1716_s22 = smov %s1426_s23  ;;  %s1717_s23 = smov %s1535_s30 }
 0x2ed   : > { %s1718_s24 = smov %s1524_s27  ;;  %25 = sbr.rel (!%p23_p2) target bundleno = 7 (0x7), region = 117 }
 0x2f2   :  { %1107 = vsyncpa [#allocation3], 1 }
 0x2f3   :  { %1109 = vsyncpa [#allocation3 + $0x1], 1 }

// kernel: _lambda_.27
= control target key start
LH: loop header
LB: loop body
LE: loop exit
PB: predicated region body
PF: predicated region fallthrough
CT: control target
= control target key end

     0   :  { %s865_s15 = smov 0   ;;  %s950_s0 = inlined_call_operand.vmem [shape: bf16[2,72,1024], index: 0, kind: input, shape index: {}]   ;;  %s951_s1 = inlined_call_operand.vmem [shape: f32[2,3,1024], index: 1, kind: input, shape index: {}]   ;;  %s952_s2 = inlined_call_operand.vmem [shape: bf16[3,72], index: 2, kind: input, shape index: {}]   ;;  %s953_s3 = inlined_call_operand.vmem [shape: f32[3,1], index: 3, kind: input, shape index: {}]   ;;  %s954_s4 = inlined_call_operand.vmem [shape: f32[2,3,1024], index: 4, kind: output, shape index: {}]  }
   0x1 LB: > { %s746_s16 = sadd.s32 4294967295, %s837_s15   ;;  %p750_p0 = scmp.ge.s32.totalorder %s837_s15, 1  ;;  %s837_s15 = sphi %s865_s15, %s14_s15  }
   0x2   : > { %p172_p1 = scmp.lt.s32.totalorder %s837_s15, 3 }
   0x4   : > { %p173_p2 = pnand %p750_p0, %p172_p1 }
   0x5   : > { %p203_p3 = scmp.lt.s32.totalorder (!%p173_p2), %s746_s16, 1 }
   0x6   : > { %176 = sbr.rel (%p173_p2) target bundleno = 260 (0x104), region = 36 }
   0xb   : > { %v839_v0 = vmov 0   ;;  %v256_v1 = vld [vmem:[%s953_s3] sm:$0x7]  ;;  %s956_s16 = smov (!%p203_p3, %s746_s16), 1  ;;  %vm446_vm0 = vcmask 1043456   ;;  %vm442_vm1 = vcmask 588800  }
   0xc   : > { %503 = vmatprep.mubr.bf16.mxu0 %v839_v0  ;;  %544 = vmatprep.mubr.bf16.mxu1 %v839_v0  ;;  %s808_s19 = smul.u32 288, %s956_s16  ;;  %v219_v52 = vld [vmem:[%s952_s2] sm:$0x3]  ;;  %s806_s25 = sshll.u32 %s956_s16, 5 }
   0xd   : > { %818 = vset.pattern.permute.xlu0 %v839_v0  ;;  %s212_s28 = scalar_lea.vmem %s951_s1, %s806_s25  ;;  %s217_s5 = scalar_lea.vmem %s954_s4, %s806_s25 }
   0xe   : > { %259 = vperm.xlu0 %818, %v256_v1   ;;  %s885_s22 = scalar_lea.vmem %s950_s0, %s808_s19 }
   0xf   : > { %v252_v2 = vld [vmem:[%s885_s22 + $0x100] sm:$0xff]  ;;  %v253_v3 = vld [vmem:[%s885_s22 + $0x108] sm:$0xff]  ;;  %v254_v40 = vld [vmem:[%s885_s22 + $0x110] sm:$0xff] }
  0x10   : > { %v244_v4 = vld [vmem:[%s885_s22 + $0xc0] sm:$0xff]  ;;  %v789_v5 = vcombine.high %v252_v2, %v252_v2  ;;  %v791_v6 = vcombine.high %v253_v3, %v253_v3  ;;  %v788_v7 = vcombine.low %v252_v2, %v252_v2  ;;  %v790_v8 = vcombine.low %v253_v3, %v253_v3  ;;  %v245_v10 = vld [vmem:[%s885_s22 + $0xc8] sm:$0xff]  ;;  %v255_v41 = vld [vmem:[%s885_s22 + $0x118] sm:$0xff] }
  0x11   : > { %v248_v9 = vld [vmem:[%s885_s22 + $0xe0] sm:$0xff]  ;;  %v249_v11 = vld [vmem:[%s885_s22 + $0xe8] sm:$0xff]  ;;  %v793_v44 = vcombine.high %v254_v40, %v254_v40  ;;  %v795_v45 = vcombine.high %v255_v41, %v255_v41  ;;  %v792_v46 = vcombine.low %v254_v40, %v254_v40  ;;  %v794_v47 = vcombine.low %v255_v41, %v255_v41  ;;  %v246_v48 = vld [vmem:[%s885_s22 + $0xd0] sm:$0xff] }
  0x12   : > { %v781_v12 = vcombine.high %v244_v4, %v248_v9  ;;  %v783_v13 = vcombine.high %v245_v10, %v249_v11  ;;  %v236_v14 = vld [vmem:[%s885_s22 + $0x80] sm:$0xff]  ;;  %v237_v16 = vld [vmem:[%s885_s22 + $0x88] sm:$0xff]  ;;  %796 = vmatprep.subr.msk.bf16.mxu0 %vm446_vm0, %v789_v5  ;;  %798 = vmatprep.subr.msk.bf16.mxu1 %vm446_vm0, %v791_v6  ;;  %v448_v17 = vsel %vm446_vm0, %v788_v7, 0  ;;  %v454_v18 = vsel %vm446_vm0, %v790_v8, 0  ;;  %v250_v49 = vld [vmem:[%s885_s22 + $0xf0] sm:$0xff] }
  0x13   : > { %v240_v15 = vld [vmem:[%s885_s22 + $0xa0] sm:$0xff]  ;;  %v241_v19 = vld [vmem:[%s885_s22 + $0xa8] sm:$0xff]  ;;  %478 = vmatpush1.bf16.msra.mxu0 %v448_v17  ;;  %519 = vmatpush1.bf16.msra.mxu1 %v454_v18  ;;  %v780_v20 = vcombine.low %v244_v4, %v248_v9  ;;  %v782_v21 = vcombine.low %v245_v10, %v249_v11  ;;  %v247_v50 = vld [vmem:[%s885_s22 + $0xd8] sm:$0xff]  ;;  %v460_v53 = vsel %vm446_vm0, %v792_v46, 0  ;;  %v466_v54 = vsel %vm446_vm0, %v794_v47, 0 }
  0x14   : > { %479 = vmatprep.subr.bf16.mxu0 %v781_v12  ;;  %520 = vmatprep.subr.bf16.mxu1 %v783_v13  ;;  %v773_v22 = vcombine.high %v236_v14, %v240_v15  ;;  %v775_v23 = vcombine.high %v237_v16, %v241_v19  ;;  %v228_v24 = vld [vmem:[%s885_s22 + $0x40] sm:$0xff]  ;;  %v229_v26 = vld [vmem:[%s885_s22 + $0x48] sm:$0xff]  ;;  %v772_v28 = vcombine.low %v236_v14, %v240_v15  ;;  %v251_v51 = vld [vmem:[%s885_s22 + $0xf8] sm:$0xff] }
  0x15   : > { %v232_v25 = vld [vmem:[%s885_s22 + $0x60] sm:$0xff]  ;;  %v233_v27 = vld [vmem:[%s885_s22 + $0x68] sm:$0xff]  ;;  %v774_v29 = vcombine.low %v237_v16, %v241_v19  ;;  %v785_v55 = vcombine.high %v246_v48, %v250_v49  ;;  %v787_v56 = vcombine.high %v247_v50, %v251_v51  ;;  %v238_v57 = vld [vmem:[%s885_s22 + $0x90] sm:$0xff]  ;;  %v784_v61 = vcombine.low %v246_v48, %v250_v49 }
  0x16   : > { %v765_v30 = vcombine.high %v228_v24, %v232_v25  ;;  %v767_v31 = vcombine.high %v229_v26, %v233_v27  ;;  %v220_v32 = vld [vmem:[%s885_s22] sm:$0xff]  ;;  %v221_v34 = vld [vmem:[%s885_s22 + $0x8] sm:$0xff]  ;;  %v764_v36 = vcombine.low %v228_v24, %v232_v25  ;;  %v766_v37 = vcombine.low %v229_v26, %v233_v27  ;;  %v242_v58 = vld [vmem:[%s885_s22 + $0xb0] sm:$0xff] }
  0x17   : > { %480 = vmatpush1.bf16.msra.mxu0 %v780_v20  ;;  %521 = vmatpush1.bf16.msra.mxu1 %v782_v21  ;;  %v224_v33 = vld [vmem:[%s885_s22 + $0x20] sm:$0xff]  ;;  %v225_v35 = vld [vmem:[%s885_s22 + $0x28] sm:$0xff]  ;;  %v239_v59 = vld [vmem:[%s885_s22 + $0x98] sm:$0xff]  ;;  %v786_v62 = vcombine.low %v247_v50, %v251_v51  ;;  %v777_v63 = vcombine.high %v238_v57, %v242_v58  ;;  %v776_v6 = vcombine.low %v238_v57, %v242_v58 }
  0x18   : > { %481 = vmatprep.subr.bf16.mxu0 %v773_v22  ;;  %522 = vmatprep.subr.bf16.mxu1 %v775_v23  ;;  %v757_v38 = vcombine.high %v220_v32, %v224_v33  ;;  %v759_v39 = vcombine.high %v221_v34, %v225_v35  ;;  %v756_v42 = vcombine.low %v220_v32, %v224_v33  ;;  %v243_v60 = vld [vmem:[%s885_s22 + $0xb8] sm:$0xff]  ;;  %v230_v2 = vld [vmem:[%s885_s22 + $0x50] sm:$0xff]  ;;  %v635_v20 = vld [vmem:[%s212_s28] sm:$0x77] }
  0x19   : > { %v758_v43 = vcombine.low %v221_v34, %v225_v35  ;;  %v779_v1 = vcombine.high %v239_v59, %v243_v60  ;;  %v234_v3 = vld [vmem:[%s885_s22 + $0x70] sm:$0xff]  ;;  %v231_v4 = vld [vmem:[%s885_s22 + $0x58] sm:$0xff]  ;;  %v778_v7 = vcombine.low %v239_v59, %v243_v60  ;;  %v636_v21 = vld [vmem:[%s212_s28 + $0x8] sm:$0x77]  ;;  %v643_v25 = vcombine.high %v635_v20, %v635_v20 }
  0x1a   : > { %v235_v5 = vld [vmem:[%s885_s22 + $0x78] sm:$0xff]  ;;  %v769_v8 = vcombine.high %v230_v2, %v234_v3  ;;  %v222_v10 = vld [vmem:[%s885_s22 + $0x10] sm:$0xff]  ;;  %v768_v14 = vcombine.low %v230_v2, %v234_v3  ;;  %v644_v27 = vcombine.high %v636_v21, %v636_v21 }
  0x1b   : > { %482 = vmatpush1.bf16.msra.mxu0 %v772_v28  ;;  %523 = vmatpush1.bf16.msra.mxu1 %v774_v29  ;;  %v771_v9 = vcombine.high %v231_v4, %v235_v5  ;;  %v226_v11 = vld [vmem:[%s885_s22 + $0x30] sm:$0xff]  ;;  %v223_v12 = vld [vmem:[%s885_s22 + $0x18] sm:$0xff]  ;;  %v770_v15 = vcombine.low %v231_v4, %v235_v5 }
  0x1c   : > { %483 = vmatprep.subr.bf16.mxu0 %v765_v30  ;;  %524 = vmatprep.subr.bf16.mxu1 %v767_v31  ;;  %v227_v13 = vld [vmem:[%s885_s22 + $0x38] sm:$0xff]  ;;  %v760_v17 = vcombine.low %v222_v10, %v226_v11 }
  0x1d   : > { %v763_v16 = vcombine.high %v223_v12, %v227_v13  ;;  %v762_v18 = vcombine.low %v223_v12, %v227_v13 }
  0x1f   : > { %484 = vmatpush1.bf16.msra.mxu0 %v764_v36  ;;  %525 = vmatpush1.bf16.msra.mxu1 %v766_v37 }
  0x20   : > { %485 = vmatprep.subr.bf16.mxu0 %v757_v38  ;;  %526 = vmatprep.subr.bf16.mxu1 %v759_v39 }
  0x23   : > { %486 = vmatpush1.bf16.msra.mxu0 %v756_v42  ;;  %527 = vmatpush1.bf16.msra.mxu1 %v758_v43  ;;  %v637_v42 = vld [vmem:[%s212_s28 + $0x10] sm:$0x77]  ;;  %v638_v43 = vld [vmem:[%s212_s28 + $0x18] sm:$0x77] }
  0x24   : > { %800 = vmatprep.subr.msk.bf16.mxu0 %vm446_vm0, %v793_v44  ;;  %802 = vmatprep.subr.msk.bf16.mxu1 %vm446_vm0, %v795_v45  ;;  %v645_v48 = vcombine.high %v637_v42, %v637_v42  ;;  %v646_v49 = vcombine.high %v638_v43, %v638_v43 }
  0x26   : > { %797 = vmatmul.mubr.msk.bf16.vlgmr.msra.gmra.mxu0 %vm442_vm1, %v219_v52  ;;  %799 = vmatmul.mubr.msk.bf16.vlgmr.msra.gmra.mxu1 %vm442_vm1, %v219_v52 }
  0x27   : > { %560 = vmatpush1.bf16.msra.mxu0 %v460_v53  ;;  %601 = vmatpush1.bf16.msra.mxu1 %v466_v54 }
  0x28   : > { %561 = vmatprep.subr.bf16.mxu0 %v785_v55  ;;  %602 = vmatprep.subr.bf16.mxu1 %v787_v56 }
  0x29   : > { %585 = vmatprep.mubr.bf16.mxu0 %v839_v0  ;;  %626 = vmatprep.mubr.bf16.mxu1 %v839_v0  ;;  %v761_v0 = vcombine.high %v222_v10, %v226_v11 }
  0x2b   : > { %562 = vmatpush1.bf16.msra.mxu0 %v784_v61  ;;  %603 = vmatpush1.bf16.msra.mxu1 %v786_v62 }
  0x2c   : > { %563 = vmatprep.subr.bf16.mxu0 %v777_v63  ;;  %604 = vmatprep.subr.bf16.mxu1 %v779_v1 }
  0x2f   : > { %564 = vmatpush1.bf16.msra.mxu0 %v776_v6  ;;  %605 = vmatpush1.bf16.msra.mxu1 %v778_v7 }
  0x30   : > { %565 = vmatprep.subr.bf16.mxu0 %v769_v8  ;;  %606 = vmatprep.subr.bf16.mxu1 %v771_v9 }
  0x33   : > { %566 = vmatpush1.bf16.msra.mxu0 %v768_v14  ;;  %607 = vmatpush1.bf16.msra.mxu1 %v770_v15 }
  0x34   : > { %567 = vmatprep.subr.bf16.mxu0 %v761_v0  ;;  %608 = vmatprep.subr.bf16.mxu1 %v763_v16 }
  0x37   : > { %568 = vmatpush1.bf16.msra.mxu0 %v760_v17  ;;  %609 = vmatpush1.bf16.msra.mxu1 %v762_v18 }
  0x3a   : > { %801 = vmatmul.mubr.msk.bf16.vlgmr.msra.gmra.mxu0 %vm442_vm1, %v219_v52  ;;  %803 = vmatmul.mubr.msk.bf16.vlgmr.msra.gmra.mxu1 %vm442_vm1, %v219_v52 }
  0x89   : > { %v260_v19 = vpop.permute.xlu0 %259 }
  0xe6   : > { %v505_v22 = vpop.f32.mrf.mxu0  ;;  %v546_v23 = vpop.f32.mrf.mxu1 }
  0xe7   : > { %v506_v24 = vadd.f32 %v505_v22, %v260_v19  ;;  %v547_v26 = vadd.f32 %v546_v23, %v260_v19 }
  0xe8   : > { %v507_v28 = vpop.f32.mrf.mxu0  ;;  %v548_v29 = vpop.f32.mrf.mxu1 }
  0xe9   : > { %v508_v30 = vadd.f32 %v507_v28, %v260_v19  ;;  %v651_v31 = vadd.f32 %v635_v20, %v506_v24  ;;  %v549_v32 = vadd.f32 %v548_v29, %v260_v19  ;;  %v653_v33 = vadd.f32 %v636_v21, %v547_v26 }
  0xea   : > { %v509_v34 = vpop.f32.mrf.mxu0  ;;  %v550_v35 = vpop.f32.mrf.mxu1 }
  0xeb   : > { %v652_v36 = vadd.f32 %v643_v25, %v508_v30  ;;  %v654_v37 = vadd.f32 %v644_v27, %v549_v32 }
  0xec   : > { %v510_v38 = vpop.f32.mrf.mxu0  ;;  %v551_v39 = vpop.f32.mrf.mxu1 }
  0xed   : > { %v667_v40 = vcombine.low %v651_v31, %v652_v36  ;;  %v668_v41 = vcombine.low %v653_v33, %v654_v37 }
  0xef   : > { %675 = vst [vmem:[%s217_s5] sm:$0x77] %v667_v40  ;;  %676 = vst [vmem:[%s217_s5 + $0x8] sm:$0x77] %v668_v41 }
  0xfa   : > { %v587_v44 = vpop.f32.mrf.mxu0  ;;  %v628_v45 = vpop.f32.mrf.mxu1 }
  0xfb   : > { %v588_v46 = vadd.f32 %v587_v44, %v260_v19  ;;  %v629_v47 = vadd.f32 %v628_v45, %v260_v19 }
  0xfc   : > { %v589_v50 = vpop.f32.mrf.mxu0  ;;  %v630_v51 = vpop.f32.mrf.mxu1 }
  0xfd   : > { %v590_v52 = vadd.f32 %v589_v50, %v260_v19  ;;  %v631_v53 = vadd.f32 %v630_v51, %v260_v19  ;;  %v655_v56 = vadd.f32 %v637_v42, %v588_v46  ;;  %v657_v57 = vadd.f32 %v638_v43, %v629_v47 }
  0xfe   : > { %v591_v54 = vpop.f32.mrf.mxu0  ;;  %v632_v55 = vpop.f32.mrf.mxu1 }
  0xff   : > { %v656_v58 = vadd.f32 %v645_v48, %v590_v52  ;;  %v658_v59 = vadd.f32 %v646_v49, %v631_v53 }
 0x100   : > { %v592_v60 = vpop.f32.mrf.mxu0  ;;  %v633_v61 = vpop.f32.mrf.mxu1 }
 0x101   : > { %v669_v62 = vcombine.low %v655_v56, %v656_v58  ;;  %v670_v63 = vcombine.low %v657_v57, %v658_v59 }
 0x103   : > { %677 = vst [vmem:[%s217_s5 + $0x10] sm:$0x77] %v669_v62  ;;  %678 = vst [vmem:[%s217_s5 + $0x18] sm:$0x77] %v670_v63 }
 0x104 PF: > { %s14_s15 = sadd.s32 1, %s837_s15  }
 0x105   : > { %p11_p4 = scmp.ge.s32.totalorder %s14_s15, 4  }
 0x107   :  { %13 = sbr.rel (!%p11_p4) target bundleno = 1 (0x1), region = 69 }

</bundles_post_ra>
